<compile_context>
chip_gen: v5e
topology: v5e:2x2
jax: 0.10.0
libtpu: 0.0.40
codegen_flags: <defaults>
</compile_context>

<pallas_src>
import functools

import jax
import jax.numpy as jnp
from jax.experimental import pallas as pl
from jax.experimental.pallas import tpu as pltpu


_INV_SQRT2 = 0.7071067811865476
_LANE = 128
_WEIGHT_DTYPE = jnp.bfloat16

# Flipped to False (once) if this jax build rejects single-buffered
# (pl.Buffered(1)) grid-invariant operands; we then fall back to defaults.
_SINGLE_BUFFER_OK = {"ok": True}


def _gelu_exact(x):
    # PyTorch F.gelu default = exact erf-based gelu (computed in f32).
    return 0.5 * x * (1.0 + jax.lax.erf(x * _INV_SQRT2))


def _round_up(v, m):
    return ((v + m - 1) // m) * m


def _mlp_kernel(x_ref, w0_ref, b0_ref, w_hid_ref, b_hid_ref, w_out_ref,
                b_out_ref, o_ref, *, h_pad, has_proj):
    """One batch tile of the MLP.

    w0 is [N, H] (no projection) or the fused [N, 2H] = [w_in | w_proj]
    (projection path).  MXU matmuls take bf16 inputs with f32 accumulation;
    bias / gelu / residual math stays in f32 (v5e has no bf16 VPU/EUP anyway).
    """
    x_in = x_ref[...]
    x_mxu = x_in if x_in.dtype == w0_ref.dtype else x_in.astype(w0_ref.dtype)

    # lin_in (+ fused skip projection when present): one MXU pass over x.
    t = jnp.dot(x_mxu, w0_ref[...], preferred_element_type=jnp.float32)
    t = t + b0_ref[...]

    if has_proj:
        h = _gelu_exact(t[:, :h_pad])
        skip = t[:, h_pad:]
    else:
        h = _gelu_exact(t)
        skip = x_in.astype(jnp.float32)     # identity residual (N == H)

    # hid  (dropout = identity in eval mode)
    h2 = jnp.dot(h.astype(w_hid_ref.dtype), w_hid_ref[...],
                 preferred_element_type=jnp.float32)
    h2 = h2 + b_hid_ref[...]

    z = skip + _gelu_exact(h2)

    # lin_out
    out = jnp.dot(z.astype(w_out_ref.dtype), w_out_ref[...],
                  preferred_element_type=jnp.float32)
    out = out + b_out_ref[...]
    o_ref[...] = out.astype(o_ref.dtype)


def prepare_mlp_params(params):
    """One-time weight preparation (hoisted out of the per-call path).

    Pads every feature axis to a multiple of 128 (lane-dense vregs), casts
    weights to bf16 (MXU-native input width, f32 biases), and fuses the two
    matmuls that share x into one wide RHS [w_in | w_proj] when the
    projection layer exists.  Returns (prepared_arrays, meta)."""
    N, H = params["w_in"].shape
    O = params["w_out"].shape[1]
    has_proj = "w_proj" in params

    n_pad = _round_up(N, _LANE)
    h_pad = _round_up(H, _LANE)
    o_pad = _round_up(O, _LANE)

    def pad2(a, rows, cols):
        return jnp.pad(a, ((0, rows - a.shape[0]), (0, cols - a.shape[1])))

    w_in = pad2(params["w_in"], n_pad, h_pad).astype(_WEIGHT_DTYPE)
    b_in = pad2(params["b_in"], 1, h_pad).astype(jnp.float32)
    w_hid = pad2(params["w_hid"], h_pad, h_pad).astype(_WEIGHT_DTYPE)
    b_hid = pad2(params["b_hid"], 1, h_pad).astype(jnp.float32)
    w_out = pad2(params["w_out"], h_pad, o_pad).astype(_WEIGHT_DTYPE)
    b_out = pad2(params["b_out"], 1, o_pad).astype(jnp.float32)

    if has_proj:
        w_proj = pad2(params["w_proj"], n_pad, h_pad).astype(_WEIGHT_DTYPE)
        b_proj = pad2(params["b_proj"], 1, h_pad).astype(jnp.float32)
        w0 = jnp.concatenate([w_in, w_proj], axis=1)    # [N_pad, 2*H_pad]
        b0 = jnp.concatenate([b_in, b_proj], axis=1)    # [1, 2*H_pad]
    else:
        w0, b0 = w_in, b_in

    prepared = dict(w0=w0, b0=b0, w_hid=w_hid, b_hid=b_hid,
                    w_out=w_out, b_out=b_out)
    prepared = jax.block_until_ready(
        jax.tree_util.tree_map(jnp.asarray, prepared))
    meta = dict(n=N, h=H, o=O, has_proj=has_proj)
    return prepared, meta


def _choose_block_b(B, h_pad, block_b):
    # Multiple of 128 for MXU M-occupancy; >=8 grid steps (>=4 per core on
    # dual-core chips) when the batch allows; prefer a divisor of B so the
    # batch never gets padded/sliced through HBM around the kernel.
    target_steps = 8
    bb_cap = max(_LANE, _round_up(min(block_b, max(B, 1)), _LANE))
    bb = min(bb_cap, max(_LANE, _round_up(pl.cdiv(B, target_steps), _LANE)))
    if h_pad >= 2048:
        bb = min(bb, _LANE)     # bound the bb x (2*h_pad, ...) f32 intermediates
    if B % bb != 0:
        for cand in range(bb, _LANE - 1, -_LANE):
            if B % cand == 0:
                bb = cand
                break
        # TODO(synk): a masked last-tile store would remove the remaining
        # batch padding when B is not a multiple of 128.
    return bb


def _vmem_limit_bytes(bb, n_pad, w0_cols, h_pad, o_pad, has_proj,
                      single_buffer):
    w_bufs = 1 if single_buffer else 2
    x_bytes = 2 if has_proj else 4
    weights = w_bufs * 2 * (n_pad * w0_cols + h_pad * h_pad + h_pad * o_pad)
    biases = w_bufs * 4 * (w0_cols + h_pad + o_pad)
    io_tiles = 2 * bb * (n_pad * x_bytes + o_pad * 4)    # double-buffered x/out
    # All f32 intermediates coexist across the three matmuls:
    # t[bb,w0_cols], h, skip, h2, z (h_pad/n_pad wide), out[bb,o_pad].
    skip_cols = h_pad if has_proj else n_pad
    inter = 4 * bb * (w0_cols + 3 * h_pad + skip_cols + o_pad)
    resident = weights + biases + io_tiles + inter
    try:
        capacity = int(pltpu.get_tpu_info().vmem_capacity_bytes)
    except Exception:  # noqa: BLE001
        capacity = 64 << 20     # assume the smallest (v7x per-TC) VMEM
    cap = int(0.75 * capacity)
    return int(max(min(2 * resident + (8 << 20), cap), min(32 << 20, cap)))


@functools.partial(
    jax.jit,
    static_argnames=("bb", "has_proj", "out_features", "single_buffer",
                     "vmem_limit"))
def _mlp_pallas(x, w0, b0, w_hid, b_hid, w_out, b_out, *, bb, has_proj,
                out_features, single_buffer, vmem_limit):
    B, N = x.shape
    n_pad, w0_cols = w0.shape
    h_pad = w_hid.shape[0]
    o_pad = w_out.shape[1]
    out_dtype = x.dtype

    # x is the only per-call tensor still needing padding / casting.
    x_dtype = w0.dtype if has_proj else x.dtype
    b_pad = _round_up(B, bb)
    if (b_pad, n_pad) != (B, N):
        x = jnp.pad(x, ((0, b_pad - B), (0, n_pad - N)))
    if x.dtype != x_dtype:
        x = x.astype(x_dtype)

    grid = (b_pad // bb,)

    def row_map(i):
        return (i, 0)

    def rep_map(i):
        return (0, 0)

    if single_buffer:
        # Grid-invariant operands: one VMEM buffer (no wasted second copy).
        def w_spec(shape):
            return pl.BlockSpec(shape, rep_map, pipeline_mode=pl.Buffered(1))
    else:
        def w_spec(shape):
            return pl.BlockSpec(shape, rep_map)

    in_specs = [
        pl.BlockSpec((bb, n_pad), row_map),     # x tile (bf16 when has_proj)
        w_spec((n_pad, w0_cols)),               # w_in or [w_in | w_proj]
        w_spec((1, w0_cols)),                   # b_in or [b_in | b_proj]
        w_spec((h_pad, h_pad)),                 # w_hid
        w_spec((1, h_pad)),                     # b_hid
        w_spec((h_pad, o_pad)),                 # w_out
        w_spec((1, o_pad)),                     # b_out
    ]
    out_spec = pl.BlockSpec((bb, o_pad), row_map)

    flops = 2 * b_pad * (n_pad * w0_cols + h_pad * h_pad + h_pad * o_pad)
    transcendentals = 2 * b_pad * h_pad
    x_bytes = 2 if has_proj else 4
    bytes_accessed = (
        b_pad * (n_pad * x_bytes + o_pad * 4)
        + 2 * (n_pad * w0_cols + h_pad * h_pad + h_pad * o_pad)
        + 4 * (w0_cols + h_pad + o_pad))

    kernel = functools.partial(_mlp_kernel, h_pad=h_pad, has_proj=has_proj)

    out = pl.pallas_call(
        kernel,
        out_shape=jax.ShapeDtypeStruct((b_pad, o_pad), out_dtype),
        grid_spec=pltpu.PrefetchScalarGridSpec(
            num_scalar_prefetch=0,
            grid=grid,
            in_specs=in_specs,
            out_specs=out_spec,
        ),
        compiler_params=pltpu.CompilerParams(
            dimension_semantics=("parallel",),
            vmem_limit_bytes=vmem_limit,
        ),
        cost_estimate=pl.CostEstimate(
            flops=int(flops),
            transcendentals=int(transcendentals),
            bytes_accessed=int(bytes_accessed),
        ),
    )(x, w0, b0, w_hid, b_hid, w_out, b_out)

    if (b_pad, o_pad) != (B, out_features):
        out = out[:B, :out_features]
    return out


def mlp_forward(x, prepared, meta, block_b=512):
    """x: [B, n_points] float32.  prepared/meta from prepare_mlp_params()."""
    B, N = x.shape
    if N != meta["n"]:
        raise ValueError(f"expected n_points={meta['n']}, got {N}")
    if not meta["has_proj"] and meta["n"] != meta["h"]:
        raise ValueError("residual add requires n_points == hidden_size "
                         "when there is no projection layer")

    n_pad, w0_cols = prepared["w0"].shape
    h_pad = prepared["w_hid"].shape[0]
    o_pad = prepared["w_out"].shape[1]
    bb = _choose_block_b(B, h_pad, block_b)

    attempts = (True, False) if _SINGLE_BUFFER_OK["ok"] else (False,)
    last_err = None
    for single_buffer in attempts:
        vmem_limit = _vmem_limit_bytes(bb, n_pad, w0_cols, h_pad, o_pad,
                                       meta["has_proj"], single_buffer)
        try:
            return _mlp_pallas(
                x, prepared["w0"], prepared["b0"], prepared["w_hid"],
                prepared["b_hid"], prepared["w_out"], prepared["b_out"],
                bb=bb, has_proj=meta["has_proj"], out_features=meta["o"],
                single_buffer=single_buffer, vmem_limit=vmem_limit)
        except Exception as e:  # noqa: BLE001 - fall back to default buffering
            last_err = e
            if single_buffer:
                _SINGLE_BUFFER_OK["ok"] = False
                continue
            raise
    raise last_err


def init_mlp_params(key, n_points, output_size, hidden_size):
    """nn.Linear-style init: uniform(-1/sqrt(fan_in), 1/sqrt(fan_in)).

    Weights are stored pre-transposed as [in_features, out_features] (f32).
    The projection layer exists only when n_points > hidden_size (as in torch)."""
    def linear(k, fan_in, fan_out):
        kw, kb = jax.random.split(k)
        bound = 1.0 / jnp.sqrt(fan_in)
        w = jax.random.uniform(kw, (fan_in, fan_out), jnp.float32, -bound, bound)
        b = jax.random.uniform(kb, (1, fan_out), jnp.float32, -bound, bound)
        return w, b

    k1, k2, k3, k4 = jax.random.split(key, 4)
    w_in, b_in = linear(k1, n_points, hidden_size)
    w_hid, b_hid = linear(k2, hidden_size, hidden_size)
    w_out, b_out = linear(k3, hidden_size, output_size)
    params = dict(w_in=w_in, b_in=b_in, w_hid=w_hid, b_hid=b_hid,
                  w_out=w_out, b_out=b_out)
    if n_points > hidden_size:
        w_proj, b_proj = linear(k4, n_points, hidden_size)
        params.update(w_proj=w_proj, b_proj=b_proj)
    return params


def mlp_reference(x, params, cast_dtype=None):
    """Pure-JAX reference. cast_dtype=jnp.bfloat16 emulates the kernel's MXU
    input casts (with f32 accumulation); cast_dtype=None is the full-f32
    PyTorch-semantics reference."""
    c = (lambda a: a.astype(cast_dtype)) if cast_dtype is not None else (lambda a: a)
    h = jnp.dot(c(x), c(params["w_in"]), preferred_element_type=jnp.float32) + params["b_in"]
    h = _gelu_exact(h)
    h2 = jnp.dot(c(h), c(params["w_hid"]), preferred_element_type=jnp.float32) + params["b_hid"]
    if "w_proj" in params:
        skip = jnp.dot(c(x), c(params["w_proj"]), preferred_element_type=jnp.float32) + params["b_proj"]
    else:
        skip = x
    z = skip + _gelu_exact(h2)
    return jnp.dot(c(z), c(params["w_out"]), preferred_element_type=jnp.float32) + params["b_out"]


if __name__ == "__main__":
    key = jax.random.PRNGKey(0)
    kx, kp, kx2, kp2 = jax.random.split(key, 4)

    # --- projection branch: n_points > hidden_size (bb=128 -> 4 grid steps) ---
    B, N, H, O = 512, 64, 32, 16
    x = jax.random.normal(kx, (B, N), jnp.float32)
    params = init_mlp_params(kp, n_points=N, output_size=O, hidden_size=H)
    prepared, meta = prepare_mlp_params(params)      # one-time weight prep

    out = jax.block_until_ready(mlp_forward(x, prepared, meta, block_b=512))
    assert out.shape == (B, O)
    ref_bf16 = mlp_reference(x, params, cast_dtype=jnp.bfloat16)
    ref_f32 = mlp_reference(x, params)
    assert jnp.allclose(out, ref_bf16, atol=5e-3, rtol=5e-3), "proj: mismatch vs bf16-emulated ref"
    assert jnp.allclose(out, ref_f32, atol=6e-2, rtol=6e-2), "proj: mismatch vs f32 ref"

    # second call reuses the prepared weights and the compiled kernel.
    out_again = jax.block_until_ready(mlp_forward(x, prepared, meta, block_b=512))
    assert jnp.allclose(out, out_again)

    # --- no-projection branch: n_points == hidden_size (identity residual) ---
    B2, N2, H2, O2 = 256, 32, 32, 16
    x2 = jax.random.normal(kx2, (B2, N2), jnp.float32)
    params2 = init_mlp_params(kp2, n_points=N2, output_size=O2, hidden_size=H2)
    prepared2, meta2 = prepare_mlp_params(params2)

    out2 = jax.block_until_ready(mlp_forward(x2, prepared2, meta2, block_b=512))
    assert out2.shape == (B2, O2)
    ref2_bf16 = mlp_reference(x2, params2, cast_dtype=jnp.bfloat16)
    ref2_f32 = mlp_reference(x2, params2)
    assert jnp.allclose(out2, ref2_bf16, atol=5e-3, rtol=5e-3), "noproj: mismatch vs bf16-emulated ref"
    assert jnp.allclose(out2, ref2_f32, atol=6e-2, rtol=6e-2), "noproj: mismatch vs f32 ref"

    print("KERNEL_OK")
</pallas_src>

<mosaic_0001>
module attributes {stable_mosaic.version = 11 : i64} {
  func.func @_mlp_kernel(%arg0: i32, %arg1: memref<128x128xbf16, #tpu.memory_space<vmem>>, %arg2: memref<128x256xbf16, #tpu.memory_space<vmem>>, %arg3: memref<1x256xf32, #tpu.memory_space<vmem>>, %arg4: memref<128x128xbf16, #tpu.memory_space<vmem>>, %arg5: memref<1x128xf32, #tpu.memory_space<vmem>>, %arg6: memref<128x128xbf16, #tpu.memory_space<vmem>>, %arg7: memref<1x128xf32, #tpu.memory_space<vmem>>, %arg8: memref<128x128xf32, #tpu.memory_space<vmem>>) attributes {dimension_semantics = [#tpu.dimension_semantics<parallel>], iteration_bounds = array<i64: 4>, scalar_prefetch = 0 : i64, scratch_operands = 0 : i64, tpu.core_type = #tpu.core_type<tc>, window_params = [{transform_indices = @transform_0, window_bounds = array<i64: 128, 128>}, {pipeline_mode = #tpu.pipeline_mode<synchronous>, transform_indices = @transform_1, window_bounds = array<i64: 128, 256>}, {pipeline_mode = #tpu.pipeline_mode<synchronous>, transform_indices = @transform_2, window_bounds = array<i64: 1, 256>}, {pipeline_mode = #tpu.pipeline_mode<synchronous>, transform_indices = @transform_3, window_bounds = array<i64: 128, 128>}, {pipeline_mode = #tpu.pipeline_mode<synchronous>, transform_indices = @transform_4, window_bounds = array<i64: 1, 128>}, {pipeline_mode = #tpu.pipeline_mode<synchronous>, transform_indices = @transform_5, window_bounds = array<i64: 128, 128>}, {pipeline_mode = #tpu.pipeline_mode<synchronous>, transform_indices = @transform_6, window_bounds = array<i64: 1, 128>}, {transform_indices = @transform_7, window_bounds = array<i64: 128, 128>}]} {
    %c0 = arith.constant 0 : index
    %c0_0 = arith.constant 0 : index
    %0 = vector.load %arg1[%c0, %c0_0] : memref<128x128xbf16, #tpu.memory_space<vmem>>, vector<128x128xbf16>
    %c0_1 = arith.constant 0 : index
    %c0_2 = arith.constant 0 : index
    %1 = vector.load %arg2[%c0_1, %c0_2] : memref<128x256xbf16, #tpu.memory_space<vmem>>, vector<128x256xbf16>
    %cst = arith.constant dense<0.000000e+00> : vector<128x256xf32>
    %2 = tpu.matmul %0, %1, %cst {dimension_numbers = #tpu.dot_dimension_numbers<[1], [0], [0], [1], [0, 0, 1, 1], [], []>} : vector<128x128xbf16>, vector<128x256xbf16>, vector<128x256xf32> -> vector<128x256xf32>
    %c0_3 = arith.constant 0 : index
    %c0_4 = arith.constant 0 : index
    %3 = vector.load %arg3[%c0_3, %c0_4] : memref<1x256xf32, #tpu.memory_space<vmem>>, vector<1x256xf32>
    %4 = vector.broadcast %3 : vector<1x256xf32> to vector<128x256xf32>
    %5 = arith.addf %2, %4 : vector<128x256xf32>
    %6 = vector.extract_strided_slice %5 {offsets = [0, 0], sizes = [128, 128], strides = [1, 1]} : vector<128x256xf32> to vector<128x128xf32>
    %cst_5 = arith.constant 5.000000e-01 : f32
    %7 = vector.broadcast %cst_5 : f32 to vector<128x128xf32>
    %8 = arith.mulf %7, %6 : vector<128x128xf32>
    %cst_6 = arith.constant 0.707106769 : f32
    %9 = vector.broadcast %cst_6 : f32 to vector<128x128xf32>
    %10 = arith.mulf %6, %9 : vector<128x128xf32>
    %11 = math.erf %10 : vector<128x128xf32>
    %cst_7 = arith.constant 1.000000e+00 : f32
    %12 = vector.broadcast %cst_7 : f32 to vector<128x128xf32>
    %13 = arith.addf %12, %11 : vector<128x128xf32>
    %14 = arith.mulf %8, %13 : vector<128x128xf32>
    %15 = vector.extract_strided_slice %5 {offsets = [0, 128], sizes = [128, 128], strides = [1, 1]} : vector<128x256xf32> to vector<128x128xf32>
    %16 = arith.truncf %14 : vector<128x128xf32> to vector<128x128xbf16>
    %c0_8 = arith.constant 0 : index
    %c0_9 = arith.constant 0 : index
    %17 = vector.load %arg4[%c0_8, %c0_9] : memref<128x128xbf16, #tpu.memory_space<vmem>>, vector<128x128xbf16>
    %cst_10 = arith.constant dense<0.000000e+00> : vector<128x128xf32>
    %18 = tpu.matmul %16, %17, %cst_10 {dimension_numbers = #tpu.dot_dimension_numbers<[1], [0], [0], [1], [0, 0, 1, 1], [], []>} : vector<128x128xbf16>, vector<128x128xbf16>, vector<128x128xf32> -> vector<128x128xf32>
    %c0_11 = arith.constant 0 : index
    %c0_12 = arith.constant 0 : index
    %19 = vector.load %arg5[%c0_11, %c0_12] : memref<1x128xf32, #tpu.memory_space<vmem>>, vector<1x128xf32>
    %20 = vector.broadcast %19 : vector<1x128xf32> to vector<128x128xf32>
    %21 = arith.addf %18, %20 : vector<128x128xf32>
    %cst_13 = arith.constant 5.000000e-01 : f32
    %22 = vector.broadcast %cst_13 : f32 to vector<128x128xf32>
    %23 = arith.mulf %22, %21 : vector<128x128xf32>
    %cst_14 = arith.constant 0.707106769 : f32
    %24 = vector.broadcast %cst_14 : f32 to vector<128x128xf32>
    %25 = arith.mulf %21, %24 : vector<128x128xf32>
    %26 = math.erf %25 : vector<128x128xf32>
    %cst_15 = arith.constant 1.000000e+00 : f32
    %27 = vector.broadcast %cst_15 : f32 to vector<128x128xf32>
    %28 = arith.addf %27, %26 : vector<128x128xf32>
    %29 = arith.mulf %23, %28 : vector<128x128xf32>
    %30 = arith.addf %15, %29 : vector<128x128xf32>
    %31 = arith.truncf %30 : vector<128x128xf32> to vector<128x128xbf16>
    %c0_16 = arith.constant 0 : index
    %c0_17 = arith.constant 0 : index
    %32 = vector.load %arg6[%c0_16, %c0_17] : memref<128x128xbf16, #tpu.memory_space<vmem>>, vector<128x128xbf16>
    %cst_18 = arith.constant dense<0.000000e+00> : vector<128x128xf32>
    %33 = tpu.matmul %31, %32, %cst_18 {dimension_numbers = #tpu.dot_dimension_numbers<[1], [0], [0], [1], [0, 0, 1, 1], [], []>} : vector<128x128xbf16>, vector<128x128xbf16>, vector<128x128xf32> -> vector<128x128xf32>
    %c0_19 = arith.constant 0 : index
    %c0_20 = arith.constant 0 : index
    %34 = vector.load %arg7[%c0_19, %c0_20] : memref<1x128xf32, #tpu.memory_space<vmem>>, vector<1x128xf32>
    %35 = vector.broadcast %34 : vector<1x128xf32> to vector<128x128xf32>
    %36 = arith.addf %33, %35 : vector<128x128xf32>
    %c0_21 = arith.constant 0 : index
    %c0_22 = arith.constant 0 : index
    %37 = vector.load %arg8[%c0_21, %c0_22] : memref<128x128xf32, #tpu.memory_space<vmem>>, vector<128x128xf32>
    tpu.vector_store %arg8[%c0_21, %c0_22], %36 {strides = array<i32>} : memref<128x128xf32, #tpu.memory_space<vmem>>, vector<128x128xf32>,
    return
  }
  func.func @transform_0(%arg0: i32) -> (i32, i32) {
    %c0_i32 = arith.constant 0 : i32
    %c0_i32_0 = arith.constant 0 : i32
    return %arg0, %c0_i32 : i32, i32
  }
  func.func @transform_1(%arg0: i32) -> (i32, i32) {
    %c0_i32 = arith.constant 0 : i32
    %c0_i32_0 = arith.constant 0 : i32
    %c0_i32_1 = arith.constant 0 : i32
    return %c0_i32, %c0_i32_0 : i32, i32
  }
  func.func @transform_2(%arg0: i32) -> (i32, i32) {
    %c0_i32 = arith.constant 0 : i32
    %c0_i32_0 = arith.constant 0 : i32
    %c0_i32_1 = arith.constant 0 : i32
    return %c0_i32, %c0_i32_0 : i32, i32
  }
  func.func @transform_3(%arg0: i32) -> (i32, i32) {
    %c0_i32 = arith.constant 0 : i32
    %c0_i32_0 = arith.constant 0 : i32
    %c0_i32_1 = arith.constant 0 : i32
    return %c0_i32, %c0_i32_0 : i32, i32
  }
  func.func @transform_4(%arg0: i32) -> (i32, i32) {
    %c0_i32 = arith.constant 0 : i32
    %c0_i32_0 = arith.constant 0 : i32
    %c0_i32_1 = arith.constant 0 : i32
    return %c0_i32, %c0_i32_0 : i32, i32
  }
  func.func @transform_5(%arg0: i32) -> (i32, i32) {
    %c0_i32 = arith.constant 0 : i32
    %c0_i32_0 = arith.constant 0 : i32
    %c0_i32_1 = arith.constant 0 : i32
    return %c0_i32, %c0_i32_0 : i32, i32
  }
  func.func @transform_6(%arg0: i32) -> (i32, i32) {
    %c0_i32 = arith.constant 0 : i32
    %c0_i32_0 = arith.constant 0 : i32
    %c0_i32_1 = arith.constant 0 : i32
    return %c0_i32, %c0_i32_0 : i32, i32
  }
  func.func @transform_7(%arg0: i32) -> (i32, i32) {
    %c0_i32 = arith.constant 0 : i32
    %c0_i32_0 = arith.constant 0 : i32
    return %arg0, %c0_i32 : i32, i32
  }
}

module attributes {stable_mosaic.version = 11 : i64} {
  func.func @_mlp_kernel(%arg0: i32, %arg1: memref<128x128xbf16, #tpu.memory_space<vmem>>, %arg2: memref<128x256xbf16, #tpu.memory_space<vmem>>, %arg3: memref<1x256xf32, #tpu.memory_space<vmem>>, %arg4: memref<128x128xbf16, #tpu.memory_space<vmem>>, %arg5: memref<1x128xf32, #tpu.memory_space<vmem>>, %arg6: memref<128x128xbf16, #tpu.memory_space<vmem>>, %arg7: memref<1x128xf32, #tpu.memory_space<vmem>>, %arg8: memref<128x128xf32, #tpu.memory_space<vmem>>) attributes {dimension_semantics = [#tpu.dimension_semantics<parallel>], iteration_bounds = array<i64: 4>, scalar_prefetch = 0 : i64, scratch_operands = 0 : i64, tpu.core_type = #tpu.core_type<tc>, window_params = [{transform_indices = @transform_0, window_bounds = array<i64: 128, 128>}, {pipeline_mode = #tpu.pipeline_mode<synchronous>, transform_indices = @transform_1, window_bounds = array<i64: 128, 256>}, {pipeline_mode = #tpu.pipeline_mode<synchronous>, transform_indices = @transform_2, window_bounds = array<i64: 1, 256>}, {pipeline_mode = #tpu.pipeline_mode<synchronous>, transform_indices = @transform_3, window_bounds = array<i64: 128, 128>}, {pipeline_mode = #tpu.pipeline_mode<synchronous>, transform_indices = @transform_4, window_bounds = array<i64: 1, 128>}, {pipeline_mode = #tpu.pipeline_mode<synchronous>, transform_indices = @transform_5, window_bounds = array<i64: 128, 128>}, {pipeline_mode = #tpu.pipeline_mode<synchronous>, transform_indices = @transform_6, window_bounds = array<i64: 1, 128>}, {transform_indices = @transform_7, window_bounds = array<i64: 128, 128>}]} {
    %c0 = arith.constant 0 : index
    %c0_0 = arith.constant 0 : index
    %0 = vector.load %arg1[%c0, %c0_0] : memref<128x128xbf16, #tpu.memory_space<vmem>>, vector<128x128xbf16>
    %c0_1 = arith.constant 0 : index
    %c0_2 = arith.constant 0 : index
    %1 = vector.load %arg2[%c0_1, %c0_2] : memref<128x256xbf16, #tpu.memory_space<vmem>>, vector<128x256xbf16>
    %cst = arith.constant dense<0.000000e+00> : vector<128x256xf32>
    %2 = tpu.matmul %0, %1, %cst {dimension_numbers = #tpu.dot_dimension_numbers<[1], [0], [0], [1], [0, 0, 1, 1], [], []>} : vector<128x128xbf16>, vector<128x256xbf16>, vector<128x256xf32> -> vector<128x256xf32>
    %c0_3 = arith.constant 0 : index
    %c0_4 = arith.constant 0 : index
    %3 = vector.load %arg3[%c0_3, %c0_4] : memref<1x256xf32, #tpu.memory_space<vmem>>, vector<1x256xf32>
    %4 = vector.broadcast %3 : vector<1x256xf32> to vector<128x256xf32>
    %5 = arith.addf %2, %4 : vector<128x256xf32>
    %6 = vector.extract_strided_slice %5 {offsets = [0, 0], sizes = [128, 128], strides = [1, 1]} : vector<128x256xf32> to vector<128x128xf32>
    %cst_5 = arith.constant 5.000000e-01 : f32
    %7 = vector.broadcast %cst_5 : f32 to vector<128x128xf32>
    %8 = arith.mulf %7, %6 : vector<128x128xf32>
    %cst_6 = arith.constant 0.707106769 : f32
    %9 = vector.broadcast %cst_6 : f32 to vector<128x128xf32>
    %10 = arith.mulf %6, %9 : vector<128x128xf32>
    %11 = math.erf %10 : vector<128x128xf32>
    %cst_7 = arith.constant 1.000000e+00 : f32
    %12 = vector.broadcast %cst_7 : f32 to vector<128x128xf32>
    %13 = arith.addf %12, %11 : vector<128x128xf32>
    %14 = arith.mulf %8, %13 : vector<128x128xf32>
    %15 = vector.extract_strided_slice %5 {offsets = [0, 128], sizes = [128, 128], strides = [1, 1]} : vector<128x256xf32> to vector<128x128xf32>
    %16 = arith.truncf %14 : vector<128x128xf32> to vector<128x128xbf16>
    %c0_8 = arith.constant 0 : index
    %c0_9 = arith.constant 0 : index
    %17 = vector.load %arg4[%c0_8, %c0_9] : memref<128x128xbf16, #tpu.memory_space<vmem>>, vector<128x128xbf16>
    %cst_10 = arith.constant dense<0.000000e+00> : vector<128x128xf32>
    %18 = tpu.matmul %16, %17, %cst_10 {dimension_numbers = #tpu.dot_dimension_numbers<[1], [0], [0], [1], [0, 0, 1, 1], [], []>} : vector<128x128xbf16>, vector<128x128xbf16>, vector<128x128xf32> -> vector<128x128xf32>
    %c0_11 = arith.constant 0 : index
    %c0_12 = arith.constant 0 : index
    %19 = vector.load %arg5[%c0_11, %c0_12] : memref<1x128xf32, #tpu.memory_space<vmem>>, vector<1x128xf32>
    %20 = vector.broadcast %19 : vector<1x128xf32> to vector<128x128xf32>
    %21 = arith.addf %18, %20 : vector<128x128xf32>
    %cst_13 = arith.constant 5.000000e-01 : f32
    %22 = vector.broadcast %cst_13 : f32 to vector<128x128xf32>
    %23 = arith.mulf %22, %21 : vector<128x128xf32>
    %cst_14 = arith.constant 0.707106769 : f32
    %24 = vector.broadcast %cst_14 : f32 to vector<128x128xf32>
    %25 = arith.mulf %21, %24 : vector<128x128xf32>
    %26 = math.erf %25 : vector<128x128xf32>
    %cst_15 = arith.constant 1.000000e+00 : f32
    %27 = vector.broadcast %cst_15 : f32 to vector<128x128xf32>
    %28 = arith.addf %27, %26 : vector<128x128xf32>
    %29 = arith.mulf %23, %28 : vector<128x128xf32>
    %30 = arith.addf %15, %29 : vector<128x128xf32>
    %31 = arith.truncf %30 : vector<128x128xf32> to vector<128x128xbf16>
    %c0_16 = arith.constant 0 : index
    %c0_17 = arith.constant 0 : index
    %32 = vector.load %arg6[%c0_16, %c0_17] : memref<128x128xbf16, #tpu.memory_space<vmem>>, vector<128x128xbf16>
    %cst_18 = arith.constant dense<0.000000e+00> : vector<128x128xf32>
    %33 = tpu.matmul %31, %32, %cst_18 {dimension_numbers = #tpu.dot_dimension_numbers<[1], [0], [0], [1], [0, 0, 1, 1], [], []>} : vector<128x128xbf16>, vector<128x128xbf16>, vector<128x128xf32> -> vector<128x128xf32>
    %c0_19 = arith.constant 0 : index
    %c0_20 = arith.constant 0 : index
    %34 = vector.load %arg7[%c0_19, %c0_20] : memref<1x128xf32, #tpu.memory_space<vmem>>, vector<1x128xf32>
    %35 = vector.broadcast %34 : vector<1x128xf32> to vector<128x128xf32>
    %36 = arith.addf %33, %35 : vector<128x128xf32>
    %c0_21 = arith.constant 0 : index
    %c0_22 = arith.constant 0 : index
    %37 = vector.load %arg8[%c0_21, %c0_22] : memref<128x128xf32, #tpu.memory_space<vmem>>, vector<128x128xf32>
    tpu.vector_store %arg8[%c0_21, %c0_22], %36 {strides = array<i32>} : memref<128x128xf32, #tpu.memory_space<vmem>>, vector<128x128xf32>,
    return
  }
  func.func @transform_0(%arg0: i32) -> (i32, i32) {
    %c0_i32 = arith.constant 0 : i32
    %c0_i32_0 = arith.constant 0 : i32
    return %arg0, %c0_i32 : i32, i32
  }
  func.func @transform_1(%arg0: i32) -> (i32, i32) {
    %c0_i32 = arith.constant 0 : i32
    %c0_i32_0 = arith.constant 0 : i32
    %c0_i32_1 = arith.constant 0 : i32
    return %c0_i32, %c0_i32_0 : i32, i32
  }
  func.func @transform_2(%arg0: i32) -> (i32, i32) {
    %c0_i32 = arith.constant 0 : i32
    %c0_i32_0 = arith.constant 0 : i32
    %c0_i32_1 = arith.constant 0 : i32
    return %c0_i32, %c0_i32_0 : i32, i32
  }
  func.func @transform_3(%arg0: i32) -> (i32, i32) {
    %c0_i32 = arith.constant 0 : i32
    %c0_i32_0 = arith.constant 0 : i32
    %c0_i32_1 = arith.constant 0 : i32
    return %c0_i32, %c0_i32_0 : i32, i32
  }
  func.func @transform_4(%arg0: i32) -> (i32, i32) {
    %c0_i32 = arith.constant 0 : i32
    %c0_i32_0 = arith.constant 0 : i32
    %c0_i32_1 = arith.constant 0 : i32
    return %c0_i32, %c0_i32_0 : i32, i32
  }
  func.func @transform_5(%arg0: i32) -> (i32, i32) {
    %c0_i32 = arith.constant 0 : i32
    %c0_i32_0 = arith.constant 0 : i32
    %c0_i32_1 = arith.constant 0 : i32
    return %c0_i32, %c0_i32_0 : i32, i32
  }
  func.func @transform_6(%arg0: i32) -> (i32, i32) {
    %c0_i32 = arith.constant 0 : i32
    %c0_i32_0 = arith.constant 0 : i32
    %c0_i32_1 = arith.constant 0 : i32
    return %c0_i32, %c0_i32_0 : i32, i32
  }
  func.func @transform_7(%arg0: i32) -> (i32, i32) {
    %c0_i32 = arith.constant 0 : i32
    %c0_i32_0 = arith.constant 0 : i32
    return %arg0, %c0_i32 : i32, i32
  }
}

</mosaic_0001>

<bundles_post_ra>
// kernel: _mlp_pallas.1
= control target key start
LH: loop header
LB: loop body
LE: loop exit
PB: predicated region body
PF: predicated region fallthrough
CT: control target
= control target key end

     0   :  { %s2666_s24 = smov 0   ;;  %s4184_s0 = inlined_call_operand.vmem [shape: bf16[512,128], index: 0, kind: input, shape index: {}]   ;;  %s4185_s1 = inlined_call_operand.vmem [shape: bf16[128,256], index: 1, kind: input, shape index: {}]   ;;  %s4186_s2 = inlined_call_operand.vmem [shape: f32[1,256], index: 2, kind: input, shape index: {}]   ;;  %s4187_s3 = inlined_call_operand.vmem [shape: bf16[128,128], index: 3, kind: input, shape index: {}]   ;;  %s4188_s4 = inlined_call_operand.vmem [shape: f32[1,128], index: 4, kind: input, shape index: {}]   ;;  %s4189_s5 = inlined_call_operand.vmem [shape: bf16[128,128], index: 5, kind: input, shape index: {}]   ;;  %s4190_s6 = inlined_call_operand.vmem [shape: f32[1,128], index: 6, kind: input, shape index: {}]   ;;  %s4191_s7 = inlined_call_operand.vmem [shape: f32[512,128], index: 7, kind: output, shape index: {}]  }
   0x1 LB: > { %s2292_s25 = sadd.s32 4294967295, %s2624_s24   ;;  %p2296_p0 = scmp.ge.s32.totalorder %s2624_s24, 1  ;;  %s2624_s24 = sphi %s2666_s24, %s17_s24  }
   0x2   : > { %p238_p1 = scmp.lt.s32.totalorder %s2624_s24, 5 }
   0x4   : > { %p239_p2 = pnand %p2296_p0, %p238_p1 }
   0x5   : > { %s2297_s23 = sshll.u32 (!%p239_p2), %s2292_s25, 4 }
   0x6   : > { %242 = sbr.rel (%p239_p2) target bundleno = 742 (0x2e6), region = 48  ;;  %p271_p3 = scmp.lt.s32.totalorder (!%p239_p2), %s2297_s23, 63 }
   0xb   : > { %v2391_v0 = vld [vmem:[%s4185_s1 + $0x70] sm:$0xf]  ;;  %v2518_v1 = vld [vmem:[%s4185_s1 + $0x74] sm:$0xf0]  ;;  %v2383_v2 = vld [vmem:[%s4185_s1 + $0x60] sm:$0xf] }
   0xc   : > { %v2392_v3 = vor.u32 %v2518_v1, %v2391_v0  ;;  %v2516_v4 = vld [vmem:[%s4185_s1 + $0x64] sm:$0xf0]  ;;  %v2375_v6 = vld [vmem:[%s4185_s1 + $0x50] sm:$0xf]  ;;  %v2514_v7 = vld [vmem:[%s4185_s1 + $0x54] sm:$0xf0] }
   0xd   : > { %v2384_v5 = vor.u32 %v2516_v4, %v2383_v2  ;;  %v2376_v8 = vor.u32 %v2514_v7, %v2375_v6  ;;  %v2367_v9 = vld [vmem:[%s4185_s1 + $0x40] sm:$0xf]  ;;  %v2512_v10 = vld [vmem:[%s4185_s1 + $0x44] sm:$0xf0]  ;;  %v2359_v12 = vld [vmem:[%s4185_s1 + $0x30] sm:$0xf] }
   0xe   : > { %448 = vmatpush.bf16.msra.mxu0 %v2392_v3  ;;  %v2368_v11 = vor.u32 %v2512_v10, %v2367_v9  ;;  %v2510_v13 = vld [vmem:[%s4185_s1 + $0x34] sm:$0xf0]  ;;  %v2351_v15 = vld [vmem:[%s4185_s1 + $0x20] sm:$0xf]  ;;  %v2508_v16 = vld [vmem:[%s4185_s1 + $0x24] sm:$0xf0] }
   0xf   : > { %v2360_v14 = vor.u32 %v2510_v13, %v2359_v12  ;;  %v2352_v17 = vor.u32 %v2508_v16, %v2351_v15  ;;  %v2343_v18 = vld [vmem:[%s4185_s1 + $0x10] sm:$0xf]  ;;  %v2506_v19 = vld [vmem:[%s4185_s1 + $0x14] sm:$0xf0]  ;;  %s4239_s23 = smov (!%p271_p3, %s2297_s23), 63  ;;  %v2524_v42 = vld [vmem:[%s4187_s3 + $0x28] sm:$0xff] }
  0x10   : > { %v2344_v20 = vor.u32 %v2506_v19, %v2343_v18  ;;  %v2335_v21 = vld [vmem:[%s4185_s1] sm:$0xf]  ;;  %v2504_v22 = vld [vmem:[%s4185_s1 + $0x4] sm:$0xf0]  ;;  %s2298_s14 = sshll.u32 %s4239_s23, 2  ;;  %v2526_v35 = vld [vmem:[%s4187_s3 + $0x38] sm:$0xff] }
  0x11   : > { %v2336_v23 = vor.u32 %v2504_v22, %v2335_v21  ;;  %s2728_s17 = scalar_lea.vmem %s4184_s0, %s2298_s14  ;;  %v314_v32 = vld [vmem:[%s4186_s2] sm:$0x3]  ;;  %1326 = vmatpush.bf16.msra.mxu2 %v2526_v35  ;;  %v2525_v38 = vld [vmem:[%s4187_s3 + $0x30] sm:$0xff]  ;;  %v2522_v55 = vld [vmem:[%s4187_s3 + $0x18] sm:$0xff]  ;;  %s2300_s9 = sshll.u32 %s4239_s23, 3 }
  0x12   : > { %449 = vmatpush.bf16.msra.mxu0 %v2384_v5  ;;  %v2731_v24 = vld [vmem:[%s2728_s17] sm:$0xff]  ;;  %v2496_v25 = vld [vmem:[%s2728_s17 + $0x8] sm:$0xff]  ;;  %v2497_v26 = vld [vmem:[%s2728_s17 + $0x10] sm:$0xff]  ;;  %v2744_v33 = vperm.slane %v314_v32, 0  ;;  %s4135_s11 = scalar_lea.vmem %s4191_s7, %s2300_s9 }
  0x13   : > { %v2498_v27 = vld [vmem:[%s2728_s17 + $0x18] sm:$0xff]  ;;  %v2499_v28 = vld [vmem:[%s2728_s17 + $0x20] sm:$0xff]  ;;  %v2500_v29 = vld [vmem:[%s2728_s17 + $0x28] sm:$0xff] }
  0x14   : > { %v2501_v30 = vld [vmem:[%s2728_s17 + $0x30] sm:$0xff]  ;;  %v2502_v31 = vld [vmem:[%s2728_s17 + $0x38] sm:$0xff]  ;;  %v2523_v48 = vld [vmem:[%s4187_s3 + $0x20] sm:$0xff] }
  0x15   : > { %1327 = vmatpush.bf16.msra.mxu2 %v2525_v38  ;;  %v2521_v0 = vld [vmem:[%s4187_s3 + $0x10] sm:$0xff]  ;;  %v2520_v10 = vld [vmem:[%s4187_s3 + $0x8] sm:$0xff] }
  0x16   : > { %450 = vmatpush.bf16.msra.mxu0 %v2376_v8 }
  0x19   : > { %1328 = vmatpush.bf16.msra.mxu2 %v2524_v42 }
  0x1a   : > { %451 = vmatpush.bf16.msra.mxu0 %v2368_v11 }
  0x1d   : > { %1329 = vmatpush.bf16.msra.mxu2 %v2523_v48 }
  0x1e   : > { %452 = vmatpush.bf16.msra.mxu0 %v2360_v14 }
  0x21   : > { %1330 = vmatpush.bf16.msra.mxu2 %v2522_v55 }
  0x22   : > { %453 = vmatpush.bf16.msra.mxu0 %v2352_v17 }
  0x25   : > { %1331 = vmatpush.bf16.msra.mxu2 %v2521_v0 }
  0x26   : > { %454 = vmatpush.bf16.msra.mxu0 %v2344_v20  ;;  %v2519_v20 = vld [vmem:[%s4187_s3] sm:$0xff] }
  0x29   : > { %1332 = vmatpush.bf16.msra.mxu2 %v2520_v10 }
  0x2a   : > { %455 = vmatpush.bf16.msra.mxu0 %v2336_v23 }
  0x2d   : > { %456 = vmatmul.bf16.vlgmr.msra.gmra.mxu0 %v2731_v24  ;;  %1333 = vmatpush.bf16.msra.mxu2 %v2519_v20 }
  0x3d   : > { %461 = vmatmul.bf16.gmra.mxu0 %v2496_v25 }
  0x4d   : > { %466 = vmatmul.bf16.gmra.mxu0 %v2497_v26 }
  0x5d   : > { %471 = vmatmul.bf16.gmra.mxu0 %v2498_v27 }
  0x6d   : > { %476 = vmatmul.bf16.gmra.mxu0 %v2499_v28 }
  0x7d   : > { %481 = vmatmul.bf16.gmra.mxu0 %v2500_v29 }
  0x8d   : > { %486 = vmatmul.bf16.gmra.mxu0 %v2501_v30 }
  0x9d   : > { %491 = vmatmul.bf16.gmra.mxu0 %v2502_v31 }
  0xaa   : > { %v457_v34 = vpop.f32.mrf.mxu0 }
  0xab   : > { %v2750_v36 = vadd.f32 %v457_v34, %v2744_v33 }
  0xad   : > { %v2753_v37 = vmul.f32 0.70710677, %v2750_v36 }
  0xaf   : > { %v578_v39 = vmul.f32 %v2753_v37, %v2753_v37 }
  0xb1   : > { %v2760_v40 = vmin.f32 %v578_v39, 16.0 }
  0xb2   : > { %v459_v41 = vpop.f32.mrf.mxu0 }
  0xb3   : > { %v580_v43 = vmul.f32 2.1237322e-06, %v2760_v40  ;;  %v2767_v44 = vadd.f32 %v459_v41, %v2744_v33  ;;  %v591_v45 = vmul.f32 3.8918573e-05, %v2760_v40 }
  0xb5   : > { %v581_v46 = vadd.f32 0.00028619796, %v580_v43  ;;  %v2771_v47 = vmul.f32 0.70710677, %v2767_v44  ;;  %v592_v49 = vadd.f32 0.001143296, %v591_v45 }
  0xb7   : > { %v618_v50 = vmul.f32 %v2771_v47, %v2771_v47  ;;  %v593_v51 = vmul.f32 %v592_v49, %v2760_v40  ;;  %v582_v52 = vmul.f32 %v581_v46, %v2760_v40 }
  0xb9   : > { %v2780_v53 = vmin.f32 %v618_v50, 16.0  ;;  %v594_v56 = vadd.f32 0.014752088, %v593_v51  ;;  %v583_v61 = vadd.f32 0.0036580483, %v582_v52 }
  0xba   : > { %v462_v54 = vpop.f32.mrf.mxu0 }
  0xbb   : > { %v620_v57 = vmul.f32 2.1237322e-06, %v2780_v53  ;;  %v2787_v58 = vadd.f32 %v462_v54, %v2744_v33  ;;  %v631_v59 = vmul.f32 3.8918573e-05, %v2780_v53  ;;  %v595_v60 = vmul.f32 %v594_v56, %v2760_v40 }
  0xbc   : > { %v584_v7 = vmul.f32 %v583_v61, %v2760_v40 }
  0xbd   : > { %v621_v62 = vadd.f32 0.00028619796, %v620_v57  ;;  %v2792_v63 = vmul.f32 0.70710677, %v2787_v58  ;;  %v596_v1 = vadd.f32 0.112945676, %v595_v60 }
  0xbe   : > { %v632_v3 = vadd.f32 0.001143296, %v631_v59  ;;  %v585_v18 = vadd.f32 0.05243302, %v584_v7 }
  0xbf   : > { %v622_v2 = vmul.f32 %v621_v62, %v2780_v53  ;;  %v658_v4 = vmul.f32 %v2792_v63, %v2792_v63  ;;  %v597_v5 = vmul.f32 %v596_v1, %v2760_v40 }
  0xc0   : > { %v633_v6 = vmul.f32 %v632_v3, %v2780_v53  ;;  %v586_v28 = vmul.f32 %v585_v18, %v2760_v40 }
  0xc1   : > { %v2803_v8 = vmin.f32 %v658_v4, 16.0  ;;  %v598_v11 = vadd.f32 0.4994258, %v597_v5  ;;  %v623_v12 = vadd.f32 0.0036580483, %v622_v2 }
  0xc2   : > { %v464_v9 = vpop.f32.mrf.mxu0  ;;  %v634_v14 = vadd.f32 0.014752088, %v633_v6  ;;  %v587_v45 = vadd.f32 0.18741608, %v586_v28 }
  0xc3   : > { %v2809_v13 = vadd.f32 %v464_v9, %v2744_v33  ;;  %v599_v15 = vmul.f32 %v598_v11, %v2760_v40  ;;  %v671_v16 = vmul.f32 3.8918573e-05, %v2803_v8  ;;  %v624_v22 = vmul.f32 %v623_v12, %v2780_v53 }
  0xc4   : > { %v635_v17 = vmul.f32 %v634_v14, %v2780_v53  ;;  %v660_v34 = vmul.f32 2.1237322e-06, %v2803_v8  ;;  %v588_v59 = vmul.f32 %v587_v45, %v2760_v40 }
  0xc5   : > { %v2815_v19 = vmul.f32 0.70710677, %v2809_v13  ;;  %v600_v21 = vadd.f32 1.0, %v599_v15  ;;  %v672_v25 = vadd.f32 0.001143296, %v671_v16 }
  0xc6   : > { %v636_v23 = vadd.f32 0.112945676, %v635_v17  ;;  %v625_v32 = vadd.f32 0.05243302, %v624_v22  ;;  %v661_v50 = vadd.f32 0.00028619796, %v660_v34 }
  0xc7   : > { %v698_v26 = vmul.f32 %v2815_v19, %v2815_v19  ;;  %2545 = vrcp.f32 %v600_v21  ;;  %v673_v31 = vmul.f32 %v672_v25, %v2803_v8  ;;  %v612_v7 = vand.u32 2147483648, %v600_v21 }
  0xc8   : > { %v637_v27 = vmul.f32 %v636_v23, %v2780_v53  ;;  %v626_v49 = vmul.f32 %v625_v32, %v2780_v53  ;;  %v662_v62 = vmul.f32 %v661_v50, %v2803_v8  ;;  %vm606_vm1 = vweird.f32 %v600_v21 }
  0xc9   : > { %v2825_v29 = vmin.f32 %v698_v26, 16.0  ;;  %v674_v41 = vadd.f32 0.014752088, %v673_v31  ;;  %v610_v9 = vand.u32 2147483647, %v600_v21  ;;  %v613_v23 = vor.u32 1.1754944e-38, %v612_v7 }
  0xca   : > { %v467_v30 = vpop.f32.mrf.mxu0  ;;  %v638_v39 = vadd.f32 0.4994258, %v637_v27  ;;  %v627_v61 = vadd.f32 0.18741608, %v626_v49  ;;  %v589_v10 = vadd.f32 1.1283791, %v588_v59 }
  0xcb   : > { %v2830_v35 = vadd.f32 %v467_v30, %v2744_v33  ;;  %v700_v38 = vmul.f32 2.1237322e-06, %v2825_v29  ;;  %v675_v48 = vmul.f32 %v674_v41, %v2803_v8  ;;  %v711_v4 = vmul.f32 3.8918573e-05, %v2825_v29 }
  0xcc   : > { %v639_v46 = vmul.f32 %v638_v39, %v2780_v53  ;;  %v628_v11 = vmul.f32 %v627_v61, %v2780_v53  ;;  %v663_v12 = vadd.f32 0.0036580483, %v662_v62  ;;  %vm611_vm3 = vcmp.eq.f32.partialorder %v610_v9, 8.507059e+37 }
  0xcd   : > { %v2834_v42 = vmul.f32 0.70710677, %v2830_v35  ;;  %v2546_v43 = vpop.eup %2545  ;;  %v701_v52 = vadd.f32 0.00028619796, %v700_v38  ;;  %v676_v55 = vadd.f32 0.112945676, %v675_v48  ;;  %v590_v28 = vmul.f32 %v589_v10, %v2753_v37 }
  0xce   : > { %v602_v51 = vmul.f32 %v2546_v43, %v600_v21  ;;  %v2839_v54 = vadd.f32 1.0, %v639_v46  ;;  %vm607_vm0 = vweird.f32 %v2546_v43  ;;  %v712_v20 = vadd.f32 0.001143296, %v711_v4 }
  0xcf   : > { %v738_v56 = vmul.f32 %v2834_v42, %v2834_v42  ;;  %v702_v2 = vmul.f32 %v701_v52, %v2825_v29  ;;  %v677_v3 = vmul.f32 %v676_v55, %v2803_v8  ;;  %vm2858_vm2 = vmor %vm606_vm1, %vm607_vm0  ;;  %v629_v30 = vadd.f32 1.1283791, %v628_v11 }
  0xd0   : > { %v603_v57 = vsub.f32 1.0, %v602_v51  ;;  %2547 = vrcp.f32 %v2839_v54  ;;  %v713_v27 = vmul.f32 %v712_v20, %v2825_v29  ;;  %v664_v31 = vmul.f32 %v663_v12, %v2803_v8 }
  0xd1   : > { %v2852_v5 = vmin.f32 %v738_v56, 16.0  ;;  %v678_v15 = vadd.f32 0.4994258, %v677_v3  ;;  %v703_v17 = vadd.f32 0.0036580483, %v702_v2  ;;  %v652_v46 = vand.u32 2147483648, %v2839_v54 }
  0xd2   : > { %v469_v60 = vpop.f32.mrf.mxu0  ;;  %v604_v1 = vmul.f32 %v2546_v43, %v603_v57  ;;  %v650_v39 = vand.u32 2147483647, %v2839_v54  ;;  %v714_v48 = vadd.f32 0.014752088, %v713_v27  ;;  %v665_v37 = vadd.f32 0.05243302, %v664_v31 }
  0xd3   : > { %v2847_v0 = vadd.f32 %v469_v60, %v2744_v33  ;;  %v740_v22 = vmul.f32 2.1237322e-06, %v2852_v5  ;;  %v679_v26 = vmul.f32 %v678_v15, %v2803_v8  ;;  %v704_v34 = vmul.f32 %v703_v17, %v2825_v29 }
  0xd4   : > { %v605_v6 = vadd.f32 %v2546_v43, %v604_v1  ;;  %v630_v51 = vmul.f32 %v629_v30, %v2771_v47  ;;  %vm646_vm5 = vweird.f32 %v2839_v54  ;;  %v653_v59 = vor.u32 1.1754944e-38, %v652_v46  ;;  %v2517_v46 = vld [vmem:[%s4185_s1 + $0x74] sm:$0xf] }
  0xd5   : > { %v2855_v40 = vmul.f32 0.70710677, %v2847_v0  ;;  %v2874_v41 = vadd.f32 1.0, %v679_v26  ;;  %v705_v52 = vadd.f32 0.05243302, %v704_v34  ;;  %v715_v60 = vmul.f32 %v714_v48, %v2825_v29 }
  0xd6   : > { %v2548_v16 = vpop.eup %2547  ;;  %v609_v18 = vsel %vm2858_vm2, %v2546_v43, %v605_v6  ;;  %v741_v43 = vadd.f32 0.00028619796, %v740_v22  ;;  %vm651_vm7 = vcmp.eq.f32.partialorder %v650_v39, 8.507059e+37  ;;  %v666_v47 = vmul.f32 %v665_v37, %v2803_v8  ;;  %v2393_v48 = vld [vmem:[%s4185_s1 + $0x78] sm:$0xf0] }
  0xd7   : > { %v778_v21 = vmul.f32 %v2855_v40, %v2855_v40  ;;  %v642_v53 = vmul.f32 %v2548_v16, %v2839_v54  ;;  %v614_v32 = vsel %vm611_vm3, %v613_v23, %v609_v18  ;;  %vm647_vm4 = vweird.f32 %v2548_v16 }
  0xd8   : > { %v615_v49 = vmul.f32 %v614_v32, %v590_v28  ;;  %2549 = vrcp.f32 %v2874_v41  ;;  %v742_v56 = vmul.f32 %v741_v43, %v2852_v5  ;;  %vm648_vm6 = vmor %vm646_vm5, %vm647_vm4  ;;  %v716_v7 = vadd.f32 0.112945676, %v715_v60 }
  0xd9   : > { %v643_v38 = vsub.f32 1.0, %v642_v53  ;;  %v2876_v45 = vmin.f32 %v778_v21, 16.0  ;;  %v751_v9 = vmul.f32 3.8918573e-05, %v2852_v5  ;;  %v706_v10 = vmul.f32 %v705_v52, %v2825_v29 }
  0xda   : > { %v472_v25 = vpop.f32.mrf.mxu0  ;;  %v2397_v1 = vclamps-f32 %v615_v49, 1.0  ;;  %v743_v11 = vadd.f32 0.0036580483, %v742_v56  ;;  %v546_v18 = vmul.f32 0.5, %v2750_v36  ;;  %v667_v20 = vadd.f32 0.18741608, %v666_v47 }
  0xdb   : > { %v644_v50 = vmul.f32 %v2548_v16, %v643_v38  ;;  %v780_v57 = vmul.f32 2.1237322e-06, %v2876_v45  ;;  %v2886_v61 = vadd.f32 %v472_v25, %v2744_v33  ;;  %v717_v21 = vmul.f32 %v716_v7, %v2825_v29 }
  0xdc   : > { %v1218_v17 = vadd.f32 1.0, %v2397_v1  ;;  %v547_v23 = vmul.f32 0.5, %v2767_v44  ;;  %v752_v26 = vadd.f32 0.001143296, %v751_v9  ;;  %v707_v27 = vadd.f32 0.18741608, %v706_v10 }
  0xdd   : > { %v645_v55 = vadd.f32 %v2548_v16, %v644_v50  ;;  %v781_v12 = vadd.f32 0.00028619796, %v780_v57  ;;  %v2899_v15 = vmul.f32 0.70710677, %v2886_v61  ;;  %v744_v28 = vmul.f32 %v743_v11, %v2852_v5 }
  0xde   : > { %v2889_v4 = vpop.eup %2549  ;;  %v718_v31 = vadd.f32 0.4994258, %v717_v21  ;;  %v1234_v34 = vmul.f32 %v1218_v17, %v546_v18  ;;  %v753_v49 = vmul.f32 %v752_v26, %v2852_v5  ;;  %v668_v52 = vmul.f32 %v667_v20, %v2803_v8  ;;  %v2515_v8 = vld [vmem:[%s4185_s1 + $0x64] sm:$0xf]  ;;  %v2513_v21 = vld [vmem:[%s4185_s1 + $0x54] sm:$0xf] }
  0xdf   : > { %v649_v2 = vsel %vm648_vm6, %v2548_v16, %v645_v55  ;;  %v682_v14 = vmul.f32 %v2889_v4, %v2874_v41  ;;  %v782_v30 = vmul.f32 %v781_v12, %v2876_v45  ;;  %v818_v36 = vmul.f32 %v2899_v15, %v2899_v15 }
  0xe0   : > { %v654_v3 = vsel %vm651_vm7, %v653_v59, %v649_v2  ;;  %v719_v43 = vmul.f32 %v718_v31, %v2825_v29  ;;  %v708_v55 = vmul.f32 %v707_v27, %v2825_v29  ;;  %v745_v56 = vadd.f32 0.05243302, %v744_v28  ;;  %v2385_v29 = vld [vmem:[%s4185_s1 + $0x68] sm:$0xf0] }
  0xe1   : > { %v655_v6 = vmul.f32 %v654_v3, %v630_v51  ;;  %v683_v22 = vsub.f32 1.0, %v682_v14  ;;  %v2396_v51 = vor.u32 %v2517_v46, %v2393_v48  ;;  %v783_v57 = vadd.f32 0.0036580483, %v782_v30  ;;  %v2511_v48 = vld [vmem:[%s4185_s1 + $0x44] sm:$0xf] }
  0xe2   : > { %v474_v62 = vpop.f32.mrf.mxu0  ;;  %v2927_v59 = vmin.f32 %v818_v36, 16.0  ;;  %v2933_v1 = vadd.f32 1.0, %v719_v43  ;;  %vm687_vm8 = vweird.f32 %v2889_v4  ;;  %v754_v47 = vadd.f32 0.014752088, %v753_v49  ;;  %v2369_v49 = vld [vmem:[%s4185_s1 + $0x48] sm:$0xf0] }
  0xe3   : > { %v2892_v54 = vadd.f32 %v474_v62, %v2744_v33  ;;  %v2398_v16 = vclamps-f32 %v655_v6, 1.0  ;;  %v684_v44 = vmul.f32 %v2889_v4, %v683_v22  ;;  %v692_v62 = vand.u32 2147483648, %v2874_v41  ;;  %497 = vmatpush.bf16.msra.mxu1 %v2396_v51 }
  0xe4   : > { %v2944_v3 = vmul.f32 0.5, %v2787_v58  ;;  %v2947_v6 = vmul.f32 0.5, %v2809_v13  ;;  %2551 = vrcp.f32 %v2933_v1  ;;  %v669_v9 = vadd.f32 1.1283791, %v668_v52 }
  0xe5   : > { %v2905_v53 = vmul.f32 0.70710677, %v2892_v54  ;;  %v1219_v25 = vadd.f32 1.0, %v2398_v16  ;;  %v685_v2 = vadd.f32 %v2889_v4, %v684_v44  ;;  %v746_v10 = vmul.f32 %v745_v56, %v2852_v5 }
  0xe6   : > { %vm686_vm9 = vweird.f32 %v2874_v41  ;;  %v690_v11 = vand.u32 2147483647, %v2874_v41  ;;  %v709_v12 = vadd.f32 1.1283791, %v708_v55  ;;  %v784_v14 = vmul.f32 %v783_v57, %v2876_v45 }
  0xe7   : > { %v1235_v38 = vmul.f32 %v1219_v25, %v547_v23  ;;  %v858_v50 = vmul.f32 %v2905_v53, %v2905_v53  ;;  %vm2958_vm10 = vmor %vm686_vm9, %vm687_vm8  ;;  %v2388_v13 = vor.u32 %v2515_v8, %v2385_v29  ;;  %v755_v17 = vmul.f32 %v754_v47, %v2852_v5  ;;  %v2377_v25 = vld [vmem:[%s4185_s1 + $0x58] sm:$0xf0] }
  0xe8   : > { %v820_v18 = vmul.f32 2.1237322e-06, %v2927_v59  ;;  %v689_v41 = vsel %vm2958_vm10, %v2889_v4, %v685_v2  ;;  %v693_v22 = vor.u32 1.1754944e-38, %v692_v62  ;;  %v747_v27 = vadd.f32 0.18741608, %v746_v10 }
  0xe9   : > { %v1250_v37 = vpack.c.bf16 %v1235_v38, %v1234_v34  ;;  %v2949_v7 = vmin.f32 %v858_v50, 16.0  ;;  %498 = vmatpush.bf16.msra.mxu1 %v2388_v13  ;;  %v756_v26 = vadd.f32 0.112945676, %v755_v17  ;;  %vm691_vm11 = vcmp.eq.f32.partialorder %v690_v11, 8.507059e+37 }
  0xea   : > { %v477_v32 = vpop.f32.mrf.mxu0  ;;  %v2380_v30 = vor.u32 %v2513_v21, %v2377_v25  ;;  %v2552_v4 = vpop.eup %2551  ;;  %v785_v31 = vadd.f32 0.05243302, %v784_v14  ;;  %v694_v36 = vsel %vm691_vm11, %v693_v22, %v689_v41  ;;  %v791_v34 = vmul.f32 3.8918573e-05, %v2876_v45 }
  0xeb   : > { %v2912_v39 = vadd.f32 %v477_v32, %v2744_v33  ;;  %1334 = vmatmul.bf16.vlgmr.msra.gmra.mxu2 %v1250_v37  ;;  %v860_v23 = vmul.f32 2.1237322e-06, %v2949_v7  ;;  %v757_v32 = vmul.f32 %v756_v26, %v2852_v5  ;;  %v670_v38 = vmul.f32 %v669_v9, %v2792_v63 }
  0xec   : > { %v2983_v44 = vmul.f32 0.5, %v2830_v35  ;;  %v722_v46 = vmul.f32 %v2552_v4, %v2933_v1  ;;  %v821_v50 = vadd.f32 0.00028619796, %v820_v18  ;;  %v2372_v51 = vor.u32 %v2511_v48, %v2369_v49 }
  0xed   : > { %v2930_v60 = vmul.f32 0.70710677, %v2912_v39  ;;  %v861_v37 = vadd.f32 0.00028619796, %v860_v23  ;;  %499 = vmatpush.bf16.msra.mxu1 %v2380_v30  ;;  %v758_v63 = vadd.f32 0.4994258, %v757_v32  ;;  %v695_v52 = vmul.f32 %v694_v36, %v670_v38 }
  0xee   : > { %v723_v55 = vsub.f32 1.0, %v722_v46  ;;  %v732_v56 = vand.u32 2147483648, %v2933_v1  ;;  %v730_v62 = vand.u32 2147483647, %v2933_v1  ;;  %v792_v8 = vadd.f32 0.001143296, %v791_v34 }
  0xef   : > { %v898_v20 = vmul.f32 %v2930_v60, %v2930_v60  ;;  %v759_v2 = vmul.f32 %v758_v63, %v2852_v5  ;;  %v831_v29 = vmul.f32 3.8918573e-05, %v2927_v59  ;;  %vm727_vm12 = vweird.f32 %v2552_v4 }
  0xf0   : > { %v724_v10 = vmul.f32 %v2552_v4, %v723_v55  ;;  %v822_v11 = vmul.f32 %v821_v50, %v2927_v59  ;;  %v862_v14 = vmul.f32 %v861_v37, %v2949_v7  ;;  %vm726_vm13 = vweird.f32 %v2933_v1 }
  0xf1   : > { %v2985_v43 = vmin.f32 %v898_v20, 16.0  ;;  %500 = vmatpush.bf16.msra.mxu1 %v2372_v51  ;;  %v2399_v13 = vclamps-f32 %v695_v52, 1.0  ;;  %v733_v18 = vor.u32 1.1754944e-38, %v732_v56  ;;  %vm728_vm14 = vmor %vm726_vm13, %vm727_vm12  ;;  %v793_v41 = vmul.f32 %v792_v8, %v2876_v45 }
  0xf2   : > { %v479_v16 = vpop.f32.mrf.mxu0  ;;  %v725_v17 = vadd.f32 %v2552_v4, %v724_v10  ;;  %v832_v22 = vadd.f32 0.001143296, %v831_v29  ;;  %v710_v1 = vmul.f32 %v709_v12, %v2815_v19  ;;  %vm731_vm15 = vcmp.eq.f32.partialorder %v730_v62, 8.507059e+37 }
  0xf3   : > { %v2977_v28 = vadd.f32 %v479_v16, %v2744_v33  ;;  %v900_v47 = vmul.f32 2.1237322e-06, %v2985_v43  ;;  %v3008_v16 = vadd.f32 1.0, %v759_v2  ;;  %v748_v25 = vmul.f32 %v747_v27, %v2852_v5 }
  0xf4   : > { %v729_v23 = vsel %vm728_vm14, %v2552_v4, %v725_v17  ;;  %v786_v26 = vmul.f32 %v785_v31, %v2876_v45  ;;  %v823_v32 = vadd.f32 0.0036580483, %v822_v11  ;;  %v863_v34 = vadd.f32 0.0036580483, %v862_v14 }
  0xf5   : > { %v2995_v35 = vmul.f32 0.70710677, %v2977_v28  ;;  %2553 = vrcp.f32 %v3008_v16  ;;  %v901_v21 = vadd.f32 0.00028619796, %v900_v47  ;;  %v734_v36 = vsel %vm731_vm15, %v733_v18, %v729_v23 }
  0xf6   : > { %v735_v38 = vmul.f32 %v734_v36, %v710_v1  ;;  %v1220_v46 = vadd.f32 1.0, %v2399_v13  ;;  %v3023_v48 = vmul.f32 0.5, %v2847_v0  ;;  %v794_v12 = vadd.f32 0.014752088, %v793_v41 }
  0xf7   : > { %v938_v58 = vmul.f32 %v2995_v35, %v2995_v35  ;;  %v833_v4 = vmul.f32 %v832_v22, %v2927_v59  ;;  %v3029_v5 = vmul.f32 0.5, %v2886_v61  ;;  %v902_v27 = vmul.f32 %v901_v21, %v2985_v43 }
  0xf8   : > { %v2400_v31 = vclamps-f32 %v735_v38, 1.0  ;;  %v749_v51 = vadd.f32 1.1283791, %v748_v25  ;;  %v787_v0 = vadd.f32 0.18741608, %v786_v26  ;;  %v795_v52 = vmul.f32 %v794_v12, %v2876_v45 }
  0xf9   : > { %v3025_v49 = vmin.f32 %v938_v58, 16.0  ;;  %v824_v55 = vmul.f32 %v823_v32, %v2927_v59  ;;  %v864_v56 = vmul.f32 %v863_v34, %v2949_v7  ;;  %v834_v29 = vadd.f32 0.014752088, %v833_v4 }
  0xfa   : > { %v482_v57 = vpop.f32.mrf.mxu0  ;;  %v1221_v61 = vadd.f32 1.0, %v2400_v31  ;;  %v903_v47 = vadd.f32 0.0036580483, %v902_v27  ;;  %v796_v11 = vadd.f32 0.112945676, %v795_v52  ;;  %v788_v58 = vmul.f32 %v787_v0, %v2876_v45 }
  0xfb   : > { %v3003_v9 = vadd.f32 %v482_v57, %v2744_v33  ;;  %v3035_v37 = vpop.eup %2553  ;;  %v1236_v57 = vmul.f32 %v1220_v46, %v2944_v3  ;;  %v940_v62 = vmul.f32 2.1237322e-06, %v3025_v49  ;;  %v871_v14 = vmul.f32 3.8918573e-05, %v2949_v7  ;;  %v2509_v46 = vld [vmem:[%s4185_s1 + $0x34] sm:$0xf] }
  0xfc   : > { %v762_v8 = vmul.f32 %v3035_v37, %v3008_v16  ;;  %v1237_v10 = vmul.f32 %v1221_v61, %v2947_v6  ;;  %v3053_v13 = vmul.f32 0.5, %v2892_v54  ;;  %v825_v18 = vadd.f32 0.05243302, %v824_v55  ;;  %v2507_v52 = vld [vmem:[%s4185_s1 + $0x24] sm:$0xf] }
  0xfd   : > { %v3013_v20 = vmul.f32 0.70710677, %v3003_v9  ;;  %v797_v1 = vmul.f32 %v796_v11, %v2876_v45  ;;  %v865_v21 = vadd.f32 0.05243302, %v864_v56  ;;  %v941_v6 = vadd.f32 0.00028619796, %v940_v62 }
  0xfe   : > { %v1251_v41 = vpack.c.bf16 %v1237_v10, %v1236_v57  ;;  %v763_v22 = vsub.f32 1.0, %v762_v8  ;;  %v835_v26 = vmul.f32 %v834_v29, %v2927_v59  ;;  %v904_v54 = vmul.f32 %v903_v47, %v2985_v43  ;;  %v2353_v62 = vld [vmem:[%s4185_s1 + $0x28] sm:$0xf0] }
  0xff   : > { %v978_v30 = vmul.f32 %v3013_v20, %v3013_v20  ;;  %v798_v36 = vadd.f32 0.4994258, %v797_v1  ;;  %v872_v32 = vadd.f32 0.001143296, %v871_v14  ;;  %v3067_v34 = vmul.f32 %v749_v51, %v2834_v42 }
 0x100   : > { %1339 = vmatmul.bf16.gmra.mxu2 %v1251_v41  ;;  %v764_v27 = vmul.f32 %v3035_v37, %v763_v22  ;;  %v789_v42 = vadd.f32 1.1283791, %v788_v58  ;;  %v942_v51 = vmul.f32 %v941_v6, %v3025_v49  ;;  %v836_v55 = vadd.f32 0.112945676, %v835_v26  ;;  %v2505_v58 = vld [vmem:[%s4185_s1 + $0x14] sm:$0xf] }
 0x101   : > { %v3037_v63 = vmin.f32 %v978_v30, 16.0  ;;  %v799_v31 = vmul.f32 %v798_v36, %v2876_v45  ;;  %v905_v56 = vadd.f32 0.05243302, %v904_v54  ;;  %v873_v45 = vmul.f32 %v872_v32, %v2949_v7 }
 0x102   : > { %v484_v19 = vpop.f32.mrf.mxu0  ;;  %v826_v8 = vmul.f32 %v825_v18, %v2927_v59  ;;  %v866_v29 = vmul.f32 %v865_v21, %v2949_v7  ;;  %v2356_v10 = vor.u32 %v2507_v52, %v2353_v62  ;;  %v765_v14 = vadd.f32 %v3035_v37, %v764_v27  ;;  %v2337_v27 = vld [vmem:[%s4185_s1 + $0x8] sm:$0xf0] }
 0x103   : > { %v3033_v50 = vadd.f32 %v484_v19, %v2744_v33  ;;  %v980_v3 = vmul.f32 2.1237322e-06, %v3037_v63  ;;  %v2361_v19 = vld [vmem:[%s4185_s1 + $0x38] sm:$0xf0]  ;;  %v3087_v57 = vadd.f32 1.0, %v799_v31  ;;  %vm767_vm0 = vweird.f32 %v3035_v37 }
 0x104   : > { %v2364_v0 = vor.u32 %v2509_v46, %v2361_v19  ;;  %v772_v41 = vand.u32 2147483648, %v3008_v16  ;;  %v837_v22 = vmul.f32 %v836_v55, %v2927_v59  ;;  %v906_v1 = vmul.f32 %v905_v56, %v2985_v43 }
 0x105   : > { %v3045_v2 = vmul.f32 0.70710677, %v3033_v50  ;;  %v981_v38 = vadd.f32 0.00028619796, %v980_v3  ;;  %2555 = vrcp.f32 %v3087_v57  ;;  %v2345_v3 = vld [vmem:[%s4185_s1 + $0x18] sm:$0xf0]  ;;  %vm766_vm1 = vweird.f32 %v3008_v16 }
 0x106   : > { %501 = vmatpush.bf16.msra.mxu1 %v2364_v0  ;;  %v770_v21 = vand.u32 2147483647, %v3008_v16  ;;  %v874_v6 = vadd.f32 0.014752088, %v873_v45  ;;  %v3113_v26 = vmul.f32 0.5, %v2912_v39  ;;  %vm3117_vm2 = vmor %vm766_vm1, %vm767_vm0  ;;  %v790_v46 = vmul.f32 %v789_v42, %v2855_v40 }
 0x107   : > { %v1018_v17 = vmul.f32 %v3045_v2, %v3045_v2  ;;  %v982_v47 = vmul.f32 %v981_v38, %v3037_v63  ;;  %v2348_v38 = vor.u32 %v2505_v58, %v2345_v3  ;;  %v867_v19 = vadd.f32 0.18741608, %v866_v29 }
 0x108   : > { %v769_v39 = vsel %vm3117_vm2, %v3035_v37, %v765_v14  ;;  %v773_v40 = vor.u32 1.1754944e-38, %v772_v41  ;;  %v838_v42 = vadd.f32 0.4994258, %v837_v22  ;;  %v907_v52 = vadd.f32 0.18741608, %v906_v1 }
 0x109   : > { %v3059_v23 = vmin.f32 %v1018_v17, 16.0  ;;  %v943_v17 = vadd.f32 0.0036580483, %v942_v51  ;;  %v983_v54 = vadd.f32 0.0036580483, %v982_v47  ;;  %vm771_vm3 = vcmp.eq.f32.partialorder %v770_v21, 8.507059e+37 }
 0x10a   : > { %v487_v25 = vpop.f32.mrf.mxu0  ;;  %502 = vmatpush.bf16.msra.mxu1 %v2356_v10  ;;  %v875_v37 = vmul.f32 %v874_v6, %v2949_v7  ;;  %v839_v29 = vmul.f32 %v838_v42, %v2927_v59  ;;  %v911_v10 = vmul.f32 3.8918573e-05, %v2985_v43  ;;  %v812_v41 = vand.u32 2147483648, %v3087_v57 }
 0x10b   : > { %v3064_v30 = vadd.f32 %v487_v25, %v2744_v33  ;;  %v1020_v12 = vmul.f32 2.1237322e-06, %v3059_v23  ;;  %v827_v25 = vadd.f32 0.18741608, %v826_v8  ;;  %v944_v31 = vmul.f32 %v943_v17, %v3025_v49  ;;  %v2556_v0 = vpop.eup %2555 }
 0x10c   : > { %v984_v56 = vmul.f32 %v983_v54, %v3037_v63  ;;  %v802_v62 = vmul.f32 %v2556_v0, %v3087_v57  ;;  %v876_v47 = vadd.f32 0.112945676, %v875_v37  ;;  %v3148_v1 = vadd.f32 1.0, %v839_v29 }
 0x10d   : > { %v3077_v4 = vmul.f32 0.70710677, %v3064_v30  ;;  %v1021_v11 = vadd.f32 0.00028619796, %v1020_v12  ;;  %v2503_v12 = vld [vmem:[%s4185_s1 + $0x4] sm:$0xf]  ;;  %vm807_vm4 = vweird.f32 %v2556_v0  ;;  %vm806_vm5 = vweird.f32 %v3087_v57 }
 0x10e   : > { %503 = vmatpush.bf16.msra.mxu1 %v2348_v38  ;;  %v2340_v45 = vor.u32 %v2503_v12, %v2337_v27  ;;  %v945_v14 = vadd.f32 0.05243302, %v944_v31  ;;  %v803_v3 = vsub.f32 1.0, %v802_v62  ;;  %v810_v6 = vand.u32 2147483647, %v3087_v57  ;;  %vm808_vm6 = vmor %vm806_vm5, %vm807_vm4 }
 0x10f   : > { %v1058_v61 = vmul.f32 %v3077_v4, %v3077_v4  ;;  %v1022_v16 = vmul.f32 %v1021_v11, %v3059_v23  ;;  %v828_v11 = vmul.f32 %v827_v25, %v2927_v59  ;;  %v877_v54 = vmul.f32 %v876_v47, %v2949_v7 }
 0x110   : > { %v804_v21 = vmul.f32 %v2556_v0, %v803_v3  ;;  %v985_v59 = vadd.f32 0.05243302, %v984_v56  ;;  %2557 = vrcp.f32 %v3148_v1  ;;  %v946_v36 = vmul.f32 %v945_v14, %v3025_v49 }
 0x111   : > { %v3105_v18 = vmin.f32 %v1058_v61, 16.0  ;;  %v774_v61 = vsel %vm771_vm3, %v773_v40, %v769_v39  ;;  %v1023_v8 = vadd.f32 0.0036580483, %v1022_v16  ;;  %v868_v16 = vmul.f32 %v867_v19, %v2949_v7 }
 0x112   : > { %v489_v32 = vpop.f32.mrf.mxu0  ;;  %v775_v17 = vmul.f32 %v774_v61, %v3067_v34  ;;  %504 = vmatpush.bf16.msra.mxu1 %v2340_v45  ;;  %v912_v34 = vadd.f32 0.001143296, %v911_v10  ;;  %v805_v38 = vadd.f32 %v2556_v0, %v804_v21  ;;  %v813_v12 = vor.u32 1.1754944e-38, %v812_v41 }
 0x113   : > { %v1060_v51 = vmul.f32 2.1237322e-06, %v3105_v18  ;;  %v3135_v55 = vadd.f32 %v489_v32, %v2744_v33  ;;  %v1024_v25 = vmul.f32 %v1023_v8, %v3059_v23  ;;  %v908_v31 = vmul.f32 %v907_v52, %v2985_v43 }
 0x114   : > { %v2401_v39 = vclamps-f32 %v775_v17, 1.0  ;;  %vm811_vm7 = vcmp.eq.f32.partialorder %v810_v6, 8.507059e+37  ;;  %v878_v40 = vadd.f32 0.4994258, %v877_v54  ;;  %v986_v42 = vmul.f32 %v985_v59, %v3037_v63 }
 0x115   : > { %v1061_v58 = vadd.f32 0.00028619796, %v1060_v51  ;;  %v3146_v22 = vmul.f32 0.70710677, %v3135_v55  ;;  %505 = vmatmul.bf16.vlgmr.msra.gmra.mxu1 %v2731_v24  ;;  %v809_v51 = vsel %vm808_vm6, %v2556_v0, %v805_v38  ;;  %v1025_v37 = vadd.f32 0.05243302, %v1024_v25 }
 0x116   : > { %v814_v56 = vsel %vm811_vm7, %v813_v12, %v809_v51  ;;  %v913_v57 = vmul.f32 %v912_v34, %v2985_v43  ;;  %v947_v19 = vadd.f32 0.18741608, %v946_v36  ;;  %v879_v45 = vmul.f32 %v878_v40, %v2949_v7  ;;  %v2558_v8 = vpop.eup %2557 }
 0x117   : > { %v1062_v32 = vmul.f32 %v1061_v58, %v3105_v18  ;;  %v1098_v27 = vmul.f32 %v3146_v22, %v3146_v22  ;;  %v815_v62 = vmul.f32 %v814_v56, %v790_v46  ;;  %v829_v29 = vadd.f32 1.1283791, %v828_v11 }
 0x118   : > { %v3166_v24 = vmul.f32 0.5, %v2977_v28  ;;  %v1222_v52 = vadd.f32 1.0, %v2401_v39  ;;  %v869_v47 = vadd.f32 1.1283791, %v868_v16  ;;  %v909_v10 = vadd.f32 1.1283791, %v908_v31 }
 0x119   : > { %v1063_v61 = vadd.f32 0.0036580483, %v1062_v32  ;;  %v3168_v0 = vmin.f32 %v1098_v27, 16.0  ;;  %v2402_v14 = vclamps-f32 %v815_v62, 1.0  ;;  %v842_v58 = vmul.f32 %v2558_v8, %v3148_v1 }
 0x11a   : > { %v987_v3 = vadd.f32 0.18741608, %v986_v42  ;;  %v1026_v17 = vmul.f32 %v1025_v37, %v3059_v23  ;;  %v3172_v41 = vadd.f32 1.0, %v879_v45  ;;  %v914_v46 = vadd.f32 0.014752088, %v913_v57  ;;  %v492_v21 = vpop.f32.mrf.mxu0 }
 0x11b   : > { %v948_v7 = vmul.f32 %v947_v19, %v3025_v49  ;;  %v1064_v11 = vmul.f32 %v1063_v61, %v3105_v18  ;;  %v1223_v28 = vadd.f32 1.0, %v2402_v14  ;;  %v843_v6 = vsub.f32 1.0, %v842_v58 }
 0x11c   : > { %v1238_v54 = vmul.f32 %v1222_v52, %v2983_v44  ;;  %v1100_v59 = vmul.f32 2.1237322e-06, %v3168_v0  ;;  %v852_v25 = vand.u32 2147483648, %v3148_v1  ;;  %2559 = vrcp.f32 %v3172_v41 }
 0x11d   : > { %v1239_v34 = vmul.f32 %v1223_v28, %v3023_v48  ;;  %v844_v36 = vmul.f32 %v2558_v8, %v843_v6  ;;  %vm847_vm8 = vweird.f32 %v2558_v8  ;;  %v850_v32 = vand.u32 2147483647, %v3148_v1 }
 0x11e   : > { %v988_v38 = vmul.f32 %v987_v3, %v3037_v63  ;;  %v1027_v16 = vadd.f32 0.18741608, %v1026_v17  ;;  %v3184_v39 = vadd.f32 %v492_v21, %v2744_v33  ;;  %v915_v44 = vmul.f32 %v914_v46, %v2985_v43 }
 0x11f   : > { %v1065_v12 = vadd.f32 0.05243302, %v1064_v11  ;;  %v1252_v27 = vpack.c.bf16 %v1239_v34, %v1238_v54  ;;  %v845_v31 = vadd.f32 %v2558_v8, %v844_v36  ;;  %vm846_vm9 = vweird.f32 %v3148_v1 }
 0x120   : > { %v830_v51 = vmul.f32 %v829_v29, %v2899_v15  ;;  %v1101_v48 = vadd.f32 0.00028619796, %v1100_v59  ;;  %vm848_vm10 = vmor %vm846_vm9, %vm847_vm8  ;;  %v853_v40 = vor.u32 1.1754944e-38, %v852_v25  ;;  %v916_v42 = vadd.f32 0.112945676, %v915_v44 }
 0x121   : > { %1344 = vmatmul.bf16.gmra.mxu2 %v1252_v27  ;;  %v849_v37 = vsel %vm848_vm10, %v2558_v8, %v845_v31  ;;  %vm851_vm11 = vcmp.eq.f32.partialorder %v850_v32, 8.507059e+37  ;;  %v951_v56 = vmul.f32 3.8918573e-05, %v3025_v49  ;;  %v991_v57 = vmul.f32 3.8918573e-05, %v3037_v63 }
 0x122   : > { %v2560_v19 = vpop.eup %2559  ;;  %v870_v61 = vmul.f32 %v869_v47, %v2905_v53  ;;  %v3193_v62 = vmul.f32 0.70710677, %v3184_v39  ;;  %v854_v1 = vsel %vm851_vm11, %v853_v40, %v849_v37  ;;  %v917_v15 = vmul.f32 %v916_v42, %v2985_v43  ;;  %v2609_v47 = vld [vmem:[%s2728_s17 + $0x8] sm:$0xff]  ;;  %v494_v28 = vpop.f32.mrf.mxu0 }
 0x123   : > { %v3197_v45 = vmul.f32 %v909_v10, %v2930_v60  ;;  %v949_v29 = vadd.f32 1.1283791, %v948_v7  ;;  %v3199_v8 = vadd.f32 1.1283791, %v988_v38  ;;  %v882_v52 = vmul.f32 %v2560_v19, %v3172_v41 }
 0x124   : > { %v1028_v14 = vmul.f32 %v1027_v16, %v3059_v23  ;;  %v1102_v58 = vmul.f32 %v1101_v48, %v3168_v0  ;;  %v918_v3 = vadd.f32 0.4994258, %v917_v15  ;;  %v952_v53 = vadd.f32 0.001143296, %v951_v56 }
 0x125   : > { %510 = vmatmul.bf16.gmra.mxu1 %v2609_v47  ;;  %v1066_v17 = vmul.f32 %v1065_v12, %v3105_v18  ;;  %v855_v46 = vmul.f32 %v854_v1, %v830_v51  ;;  %v883_v11 = vsub.f32 1.0, %v882_v52  ;;  %v992_v60 = vadd.f32 0.001143296, %v991_v57 }
 0x126   : > { %v1138_v10 = vmul.f32 %v3193_v62, %v3193_v62  ;;  %v892_v7 = vand.u32 2147483648, %v3172_v41  ;;  %v919_v21 = vmul.f32 %v918_v3, %v2985_v43  ;;  %v953_v6 = vmul.f32 %v952_v53, %v3025_v49 }
 0x127   : > { %v884_v54 = vmul.f32 %v2560_v19, %v883_v11  ;;  %vm887_vm12 = vweird.f32 %v2560_v19  ;;  %v890_v59 = vand.u32 2147483647, %v3172_v41  ;;  %v993_v25 = vmul.f32 %v992_v60, %v3037_v63 }
 0x128   : > { %v1103_v34 = vadd.f32 0.0036580483, %v1102_v58  ;;  %v3214_v36 = vadd.f32 %v494_v28, %v2744_v33  ;;  %v3216_v32 = vadd.f32 1.0, %v919_v21  ;;  %v954_v38 = vadd.f32 0.014752088, %v953_v6 }
 0x129   : > { %v2403_v16 = vclamps-f32 %v855_v46, 1.0  ;;  %v885_v44 = vadd.f32 %v2560_v19, %v884_v54  ;;  %vm886_vm13 = vweird.f32 %v3172_v41  ;;  %v994_v43 = vadd.f32 0.014752088, %v993_v25 }
 0x12a   : > { %v3219_v12 = vadd.f32 1.1283791, %v1028_v14  ;;  %vm888_vm14 = vmor %vm886_vm13, %vm887_vm12  ;;  %v893_v27 = vor.u32 1.1754944e-38, %v892_v7  ;;  %2561 = vrcp.f32 %v3216_v32  ;;  %v1031_v31 = vmul.f32 3.8918573e-05, %v3059_v23 }
 0x12b   : > { %v3223_v51 = vmin.f32 %v1138_v10, 16.0  ;;  %v889_v33 = vsel %vm888_vm14, %v2560_v19, %v885_v44  ;;  %vm891_vm15 = vcmp.eq.f32.partialorder %v890_v59, 8.507059e+37  ;;  %v955_v48 = vmul.f32 %v954_v38, %v3025_v49 }
 0x12c   : > { %v1067_v40 = vadd.f32 0.18741608, %v1066_v17  ;;  %v894_v42 = vsel %vm891_vm15, %v893_v27, %v889_v33  ;;  %v3227_v37 = vmul.f32 0.70710677, %v3214_v36  ;;  %v995_v41 = vmul.f32 %v994_v43, %v3037_v63 }
 0x12d   : > { %v1104_v56 = vmul.f32 %v1103_v34, %v3168_v0  ;;  %v895_v57 = vmul.f32 %v894_v42, %v870_v61  ;;  %v1224_v1 = vadd.f32 1.0, %v2403_v16  ;;  %v956_v15 = vadd.f32 0.112945676, %v955_v48 }
 0x12e   : > { %v3232_v52 = vmul.f32 %v949_v29, %v2995_v35  ;;  %v996_v14 = vadd.f32 0.112945676, %v995_v41  ;;  %v1032_v19 = vadd.f32 0.001143296, %v1031_v31  ;;  %v1071_v58 = vmul.f32 3.8918573e-05, %v3105_v18 }
 0x12f   : > { %v1140_v3 = vmul.f32 2.1237322e-06, %v3223_v51  ;;  %v2404_v53 = vclamps-f32 %v895_v57, 1.0  ;;  %v957_v47 = vmul.f32 %v956_v15, %v3025_v49  ;;  %v1111_v17 = vmul.f32 3.8918573e-05, %v3168_v0  ;;  %v2610_v31 = vld [vmem:[%s2728_s17 + $0x10] sm:$0xff] }
 0x130   : > { %v3238_v46 = vpop.eup %2561  ;;  %v1178_v61 = vmul.f32 %v3227_v37, %v3227_v37  ;;  %v997_v11 = vmul.f32 %v996_v14, %v3037_v63  ;;  %v1033_v35 = vmul.f32 %v1032_v19, %v3059_v23  ;;  %v1072_v29 = vadd.f32 0.001143296, %v1071_v58 }
 0x131   : > { %v1105_v28 = vadd.f32 0.05243302, %v1104_v56  ;;  %v1225_v60 = vadd.f32 1.0, %v2404_v53  ;;  %v922_v10 = vmul.f32 %v3238_v46, %v3216_v32  ;;  %v958_v7 = vadd.f32 0.4994258, %v957_v47 }
 0x132   : > { %v1240_v21 = vmul.f32 %v1224_v1, %v3029_v5  ;;  %v998_v6 = vadd.f32 0.4994258, %v997_v11  ;;  %v1034_v54 = vadd.f32 0.014752088, %v1033_v35  ;;  %v1073_v59 = vmul.f32 %v1072_v29, %v3105_v18 }
 0x133   : > { %v1241_v25 = vmul.f32 %v1225_v60, %v3053_v13  ;;  %v923_v34 = vsub.f32 1.0, %v922_v10  ;;  %v959_v38 = vmul.f32 %v958_v7, %v3025_v49  ;;  %v1112_v16 = vadd.f32 0.001143296, %v1111_v17 }
 0x134   : > { %v3250_v44 = vmin.f32 %v1178_v61, 16.0  ;;  %v999_v43 = vmul.f32 %v998_v6, %v3037_v63  ;;  %v1035_v27 = vmul.f32 %v1034_v54, %v3059_v23  ;;  %v1074_v33 = vadd.f32 0.014752088, %v1073_v59 }
 0x135   : > { %515 = vmatmul.bf16.gmra.mxu1 %v2610_v31  ;;  %v1141_v5 = vadd.f32 0.00028619796, %v1140_v3  ;;  %v1253_v48 = vpack.c.bf16 %v1241_v25, %v1240_v21  ;;  %v924_v42 = vmul.f32 %v3238_v46, %v923_v34  ;;  %v3256_v41 = vadd.f32 1.0, %v959_v38 }
 0x136   : > { %v1106_v13 = vmul.f32 %v1105_v28, %v3168_v0  ;;  %v3259_v56 = vadd.f32 1.0, %v999_v43  ;;  %v1036_v49 = vadd.f32 0.112945676, %v1035_v27  ;;  %v1075_v57 = vmul.f32 %v1074_v33, %v3105_v18 }
 0x137   : > { %1349 = vmatmul.bf16.gmra.mxu2 %v1253_v48  ;;  %v925_v63 = vadd.f32 %v3238_v46, %v924_v42  ;;  %vm927_vm0 = vweird.f32 %v3238_v46  ;;  %2563 = vrcp.f32 %v3256_v41  ;;  %v1113_v1 = vmul.f32 %v1112_v16, %v3168_v0 }
 0x138   : > { %v1180_v15 = vmul.f32 2.1237322e-06, %v3250_v44  ;;  %v932_v14 = vand.u32 2147483648, %v3216_v32  ;;  %2565 = vrcp.f32 %v3259_v56  ;;  %v1151_v19 = vmul.f32 3.8918573e-05, %v3223_v51 }
 0x139   : > { %v3272_v58 = vmul.f32 %v3199_v8, %v3013_v20  ;;  %vm926_vm1 = vweird.f32 %v3216_v32  ;;  %v930_v3 = vand.u32 2147483647, %v3216_v32  ;;  %v1037_v53 = vmul.f32 %v1036_v49, %v3059_v23 }
 0x13a   : > { %v3279_v47 = vmul.f32 %v3219_v12, %v3045_v2  ;;  %v3282_v17 = vmul.f32 %v1067_v40, %v3105_v18  ;;  %v1142_v61 = vmul.f32 %v1141_v5, %v3223_v51  ;;  %vm3285_vm2 = vmor %vm926_vm1, %vm927_vm0  ;;  %v1076_v20 = vadd.f32 0.112945676, %v1075_v57 }
 0x13b   : > { %v3289_v8 = vadd.f32 0.18741608, %v1106_v13  ;;  %v929_v32 = vsel %vm3285_vm2, %v3238_v46, %v925_v63  ;;  %v1038_v35 = vadd.f32 0.4994258, %v1037_v53  ;;  %v1114_v29 = vadd.f32 0.014752088, %v1113_v1 }
 0x13c   : > { %v1181_v2 = vadd.f32 0.00028619796, %v1180_v15  ;;  %v933_v12 = vor.u32 1.1754944e-38, %v932_v14  ;;  %v1077_v40 = vmul.f32 %v1076_v20, %v3105_v18  ;;  %v1152_v28 = vadd.f32 0.001143296, %v1151_v19  ;;  %v2611_v19 = vld [vmem:[%s2728_s17 + $0x18] sm:$0xff] }
 0x13d   : > { %v2564_v60 = vpop.eup %2563  ;;  %vm931_vm3 = vcmp.eq.f32.partialorder %v930_v3, 8.507059e+37  ;;  %vm966_vm4 = vweird.f32 %v3256_v41  ;;  %v1039_v10 = vmul.f32 %v1038_v35, %v3059_v23  ;;  %v1115_v7 = vmul.f32 %v1114_v29, %v3168_v0 }
 0x13e   : > { %v3298_v21 = vpop.eup %2565  ;;  %v934_v6 = vsel %vm931_vm3, %v933_v12, %v929_v32  ;;  %v962_v46 = vmul.f32 %v2564_v60, %v3256_v41  ;;  %v1078_v54 = vadd.f32 0.4994258, %v1077_v40  ;;  %v1153_v59 = vmul.f32 %v1152_v28, %v3223_v51 }
 0x13f   : > { %v970_v25 = vand.u32 2147483647, %v3256_v41  ;;  %v1002_v34 = vmul.f32 %v3298_v21, %v3259_v56  ;;  %v3305_v38 = vadd.f32 1.0, %v1039_v10  ;;  %v1191_v16 = vmul.f32 3.8918573e-05, %v3250_v44 }
 0x140   : > { %v963_v23 = vsub.f32 1.0, %v962_v46  ;;  %v1079_v43 = vmul.f32 %v1078_v54, %v3105_v18  ;;  %v1116_v27 = vadd.f32 0.112945676, %v1115_v7  ;;  %v1154_v31 = vadd.f32 0.014752088, %v1153_v59 }
 0x141   : > { %v935_v33 = vmul.f32 %v934_v6, %v3197_v45  ;;  %v972_v5 = vand.u32 2147483648, %v3256_v41  ;;  %v1003_v48 = vsub.f32 1.0, %v1002_v34  ;;  %2567 = vrcp.f32 %v3305_v38 }
 0x142   : > { %v964_v42 = vmul.f32 %v2564_v60, %v963_v23  ;;  %vm967_vm5 = vweird.f32 %v2564_v60  ;;  %v1010_v13 = vand.u32 2147483647, %v3259_v56  ;;  %v3313_v49 = vadd.f32 1.0, %v1079_v43 }
 0x143   : > { %v1004_v57 = vmul.f32 %v3298_v21, %v1003_v48  ;;  %v1117_v18 = vmul.f32 %v1116_v27, %v3168_v0  ;;  %v1155_v63 = vmul.f32 %v1154_v31, %v3223_v51  ;;  %v1192_v1 = vadd.f32 0.001143296, %v1191_v16  ;;  %vm968_vm7 = vmor %vm966_vm4, %vm967_vm5 }
 0x144   : > { %v965_v45 = vadd.f32 %v2564_v60, %v964_v42  ;;  %vm3318_vm6 = vcmp.eq.f32.partialorder %v970_v25, 8.507059e+37  ;;  %v1012_v14 = vand.u32 2147483648, %v3259_v56  ;;  %2569 = vrcp.f32 %v3313_v49 }
 0x145   : > { %520 = vmatmul.bf16.gmra.mxu1 %v2611_v19  ;;  %v2405_v3 = vclamps-f32 %v935_v33, 1.0  ;;  %v973_v53 = vor.u32 1.1754944e-38, %v972_v5  ;;  %v1005_v11 = vadd.f32 %v3298_v21, %v1004_v57  ;;  %vm1007_vm8 = vweird.f32 %v3298_v21 }
 0x146   : > { %v969_v20 = vsel %vm968_vm7, %v2564_v60, %v965_v45  ;;  %v1118_v32 = vadd.f32 0.4994258, %v1117_v18  ;;  %v1156_v35 = vadd.f32 0.112945676, %v1155_v63  ;;  %v1193_v29 = vmul.f32 %v1192_v1, %v3250_v44 }
 0x147   : > { %v2568_v12 = vpop.eup %2567  ;;  %v1143_v40 = vadd.f32 0.0036580483, %v1142_v61  ;;  %v1182_v28 = vmul.f32 %v1181_v2, %v3250_v44  ;;  %v974_v10 = vsel %vm3318_vm6, %v973_v53, %v969_v20  ;;  %vm1006_vm9 = vweird.f32 %v3259_v56 }
 0x148   : > { %v975_v41 = vmul.f32 %v974_v10, %v3232_v52  ;;  %vm3335_vm10 = vcmp.eq.f32.partialorder %v1010_v13, 8.507059e+37  ;;  %v1013_v60 = vor.u32 1.1754944e-38, %v1012_v14  ;;  %v1042_v6 = vmul.f32 %v2568_v12, %v3305_v38  ;;  %vm3342_vm11 = vmor %vm1006_vm9, %vm1007_vm8 }
 0x149   : > { %v1226_v46 = vadd.f32 1.0, %v2405_v3  ;;  %v1119_v2 = vmul.f32 %v1118_v32, %v3168_v0  ;;  %v1157_v56 = vmul.f32 %v1156_v35, %v3223_v51  ;;  %v1194_v54 = vadd.f32 0.014752088, %v1193_v29 }
 0x14a   : > { %v3348_v52 = vpop.eup %2569  ;;  %v2406_v59 = vclamps-f32 %v975_v41, 1.0  ;;  %v1009_v25 = vsel %vm3342_vm11, %v3298_v21, %v1005_v11  ;;  %v1043_v34 = vsub.f32 1.0, %v1042_v6  ;;  %v1050_v16 = vand.u32 2147483647, %v3305_v38  ;;  %v2612_v41 = vld [vmem:[%s2728_s17 + $0x20] sm:$0xff] }
 0x14b   : > { %vm1047_vm12 = vweird.f32 %v2568_v12  ;;  %v1052_v23 = vand.u32 2147483648, %v3305_v38  ;;  %v1082_v43 = vmul.f32 %v3348_v52, %v3313_v49  ;;  %v3357_v27 = vadd.f32 1.0, %v1119_v2 }
 0x14c   : > { %v1227_v31 = vadd.f32 1.0, %v2406_v59  ;;  %v1044_v33 = vmul.f32 %v2568_v12, %v1043_v34  ;;  %v1158_v5 = vadd.f32 0.4994258, %v1157_v56  ;;  %v1195_v48 = vmul.f32 %v1194_v54, %v3250_v44 }
 0x14d   : > { %v1183_v42 = vadd.f32 0.0036580483, %v1182_v28  ;;  %v1242_v13 = vmul.f32 %v1226_v46, %v3113_v26  ;;  %v1014_v21 = vsel %vm3335_vm10, %v1013_v60, %v1009_v25  ;;  %2571 = vrcp.f32 %v3357_v27 }
 0x14e   : > { %v1243_v57 = vmul.f32 %v1227_v31, %v3166_v24  ;;  %v1045_v18 = vadd.f32 %v2568_v12, %v1044_v33  ;;  %vm1046_vm13 = vweird.f32 %v3305_v38  ;;  %v1083_v63 = vsub.f32 1.0, %v1082_v43 }
 0x14f   : > { %v1108_v1 = vmul.f32 %v3289_v8, %v3168_v0  ;;  %vm1048_vm14 = vmor %vm1046_vm13, %vm1047_vm12  ;;  %v1053_v45 = vor.u32 1.1754944e-38, %v1052_v23  ;;  %v1159_v15 = vmul.f32 %v1158_v5, %v3223_v51  ;;  %v1196_v26 = vadd.f32 0.112945676, %v1195_v48 }
 0x150   : > { %v1254_v14 = vpack.c.bf16 %v1243_v57, %v1242_v13  ;;  %v1015_v19 = vmul.f32 %v1014_v21, %v3272_v58  ;;  %v1049_v3 = vsel %vm1048_vm14, %v2568_v12, %v1045_v18  ;;  %vm1051_vm15 = vcmp.eq.f32.partialorder %v1050_v16, 8.507059e+37 }
 0x151   : > { %v1184_v24 = vmul.f32 %v1183_v42, %v3250_v44  ;;  %v1054_v53 = vsel %vm1051_vm15, %v1053_v45, %v1049_v3  ;;  %v3372_v38 = vadd.f32 1.0, %v1159_v15  ;;  %v1197_v11 = vmul.f32 %v1196_v26, %v3250_v44 }
 0x152   : > { %1354 = vmatmul.bf16.gmra.mxu2 %v1254_v14  ;;  %v1055_v0 = vmul.f32 %v1054_v53, %v3279_v47  ;;  %v1084_v8 = vmul.f32 %v3348_v52, %v1083_v63  ;;  %v556_v32 = vmul.f32 0.5, %v3003_v9  ;;  %v557_v58 = vmul.f32 0.5, %v3033_v50 }
 0x153   : > { %v2572_v20 = vpop.eup %2571  ;;  %v1069_v35 = vadd.f32 1.1283791, %v3282_v17  ;;  %2573 = vrcp.f32 %v3372_v38  ;;  %v1144_v29 = vmul.f32 %v1143_v40, %v3223_v51  ;;  %v2407_v12 = vclamps-f32 %v1015_v19, 1.0 }
 0x154   : > { %v2408_v28 = vclamps-f32 %v1055_v0, 1.0  ;;  %v1122_v10 = vmul.f32 %v2572_v20, %v3357_v27  ;;  %v1109_v47 = vadd.f32 1.1283791, %v1108_v1  ;;  %v1185_v7 = vadd.f32 0.05243302, %v1184_v24 }
 0x155   : > { %525 = vmatmul.bf16.gmra.mxu1 %v2612_v41  ;;  %vm1086_vm0 = vweird.f32 %v3313_v49  ;;  %v1198_v60 = vadd.f32 0.4994258, %v1197_v11  ;;  %v1085_v50 = vadd.f32 %v3348_v52, %v1084_v8  ;;  %vm1087_vm1 = vweird.f32 %v3348_v52 }
 0x156   : > { %v1229_v9 = vadd.f32 1.0, %v2408_v28  ;;  %v1123_v17 = vsub.f32 1.0, %v1122_v10  ;;  %v1090_v6 = vand.u32 2147483647, %v3313_v49  ;;  %v1092_v40 = vand.u32 2147483648, %v3313_v49  ;;  %vm3397_vm3 = vmor %vm1086_vm0, %vm1087_vm1 }
 0x157   : > { %v1132_v46 = vand.u32 2147483648, %v3357_v27  ;;  %v1199_v61 = vmul.f32 %v1198_v60, %v3250_v44  ;;  %v1228_v2 = vadd.f32 1.0, %v2407_v12  ;;  %vm1127_vm2 = vweird.f32 %v2572_v20 }
 0x158   : > { %v1124_v56 = vmul.f32 %v2572_v20, %v1123_v17  ;;  %v1130_v54 = vand.u32 2147483647, %v3357_v27  ;;  %v1110_v25 = vmul.f32 %v1109_v47, %v3146_v22  ;;  %v1145_v34 = vadd.f32 0.05243302, %v1144_v29 }
 0x159   : > { %v3392_v59 = vpop.eup %2573  ;;  %vm1126_vm4 = vweird.f32 %v3357_v27  ;;  %v3402_v23 = vadd.f32 1.0, %v1199_v61  ;;  %v1245_v43 = vmul.f32 %v1229_v9, %v557_v58  ;;  %v1089_v31 = vsel %vm3397_vm3, %v3348_v52, %v1085_v50 }
 0x15a   : > { %v1125_v33 = vadd.f32 %v2572_v20, %v1124_v56  ;;  %v1162_v22 = vmul.f32 %v3392_v59, %v3372_v38  ;;  %v1186_v5 = vmul.f32 %v1185_v7, %v3250_v44  ;;  %v1093_v49 = vor.u32 1.1754944e-38, %v1092_v40  ;;  %vm1128_vm5 = vmor %vm1126_vm4, %vm1127_vm2 }
 0x15b   : > { %v1133_v48 = vor.u32 1.1754944e-38, %v1132_v46  ;;  %2575 = vrcp.f32 %v3402_v23  ;;  %v1244_v42 = vmul.f32 %v1228_v2, %v556_v32  ;;  %vm1091_vm6 = vcmp.eq.f32.partialorder %v1090_v6, 8.507059e+37 }
 0x15c   : > { %v1129_v27 = vsel %vm1128_vm5, %v2572_v20, %v1125_v33  ;;  %vm1131_vm7 = vcmp.eq.f32.partialorder %v1130_v54, 8.507059e+37  ;;  %v1146_v13 = vmul.f32 %v1145_v34, %v3223_v51  ;;  %v1094_v21 = vsel %vm1091_vm6, %v1093_v49, %v1089_v31  ;;  %v2613_v20 = vld [vmem:[%s2728_s17 + $0x28] sm:$0xff] }
 0x15d   : > { %v1134_v57 = vsel %vm1131_vm7, %v1133_v48, %v1129_v27  ;;  %v1070_v52 = vmul.f32 %v1069_v35, %v3077_v4  ;;  %v1255_v18 = vpack.c.bf16 %v1245_v43, %v1244_v42  ;;  %v1163_v1 = vsub.f32 1.0, %v1162_v22  ;;  %v3419_v4 = vld [vmem:[%s4188_s4] ss:$0 sm:$0xff]  ;;  %v2614_v48 = vld [vmem:[%s2728_s17 + $0x30] sm:$0xff] }
 0x15e   : > { %v1135_v63 = vmul.f32 %v1134_v57, %v1110_v25  ;;  %v1187_v45 = vadd.f32 0.18741608, %v1186_v5  ;;  %v1147_v14 = vadd.f32 0.18741608, %v1146_v13  ;;  %v559_v11 = vmul.f32 0.5, %v3135_v55 }
 0x15f   : > { %v1095_v15 = vmul.f32 %v1094_v21, %v1070_v52  ;;  %v1164_v3 = vmul.f32 %v3392_v59, %v1163_v1  ;;  %vm1167_vm8 = vweird.f32 %v3392_v59  ;;  %v1210_v58 = vand.u32 2147483647, %v3402_v23 }
 0x160   : > { %v2410_v19 = vclamps-f32 %v1135_v63, 1.0  ;;  %v1188_v53 = vmul.f32 %v1187_v45, %v3250_v44  ;;  %v1148_v32 = vmul.f32 %v1147_v14, %v3223_v51  ;;  %v1212_v35 = vand.u32 2147483648, %v3402_v23 }
 0x161   : > { %v2576_v26 = vpop.eup %2575  ;;  %v2409_v0 = vclamps-f32 %v1095_v15, 1.0  ;;  %v1165_v29 = vadd.f32 %v3392_v59, %v1164_v3  ;;  %vm1166_vm10 = vweird.f32 %v3372_v38  ;;  %v1172_v55 = vand.u32 2147483648, %v3372_v38 }
 0x162   : > { %1359 = vmatmul.bf16.gmra.mxu2 %v1255_v18  ;;  %v1202_v24 = vmul.f32 %v2576_v26, %v3402_v23  ;;  %v1231_v44 = vadd.f32 1.0, %v2410_v19  ;;  %vm1207_vm9 = vweird.f32 %v2576_v26  ;;  %v1189_v10 = vadd.f32 1.1283791, %v1188_v53  ;;  %vm3433_vm11 = vmor %vm1166_vm10, %vm1167_vm8 }
 0x163   : > { %v1230_v51 = vadd.f32 1.0, %v2409_v0  ;;  %v1170_v7 = vand.u32 2147483647, %v3372_v38  ;;  %vm1206_vm12 = vweird.f32 %v3402_v23  ;;  %v558_v9 = vmul.f32 0.5, %v3064_v30 }
 0x164   : > { %v1203_v8 = vsub.f32 1.0, %v1202_v24  ;;  %v1149_v50 = vadd.f32 1.1283791, %v1148_v32  ;;  %vm1208_vm13 = vmor %vm1206_vm12, %vm1207_vm9  ;;  %v1213_v17 = vor.u32 1.1754944e-38, %v1212_v35  ;;  %v1247_v40 = vmul.f32 %v1231_v44, %v559_v11 }
 0x165   : > { %530 = vmatmul.bf16.gmra.mxu1 %v2613_v20  ;;  %v1169_v46 = vsel %vm3433_vm11, %v3392_v59, %v1165_v29  ;;  %vm1211_vm14 = vcmp.eq.f32.partialorder %v1210_v58, 8.507059e+37  ;;  %v1173_v2 = vor.u32 1.1754944e-38, %v1172_v55  ;;  %v1190_v30 = vmul.f32 %v1189_v10, %v3227_v37  ;;  %v2615_v29 = vld [vmem:[%s2728_s17 + $0x38] sm:$0xff] }
 0x166   : > { %v1204_v12 = vmul.f32 %v2576_v26, %v1203_v8  ;;  %v1246_v54 = vmul.f32 %v1230_v51, %v558_v9  ;;  %vm1171_vm15 = vcmp.eq.f32.partialorder %v1170_v7, 8.507059e+37  ;;  %v1150_v16 = vmul.f32 %v1149_v50, %v3193_v62 }
 0x167   : > { %v1174_v25 = vsel %vm1171_vm15, %v1173_v2, %v1169_v46  ;;  %v561_v57 = vmul.f32 0.5, %v3214_v36  ;;  %v560_v1 = vmul.f32 0.5, %v3184_v39 }
 0x168   : > { %v1205_v60 = vadd.f32 %v2576_v26, %v1204_v12  ;;  %v1256_v23 = vpack.c.bf16 %v1247_v40, %v1246_v54  ;;  %v1175_v31 = vmul.f32 %v1174_v25, %v1150_v16 }
 0x16a   : > { %v1209_v61 = vsel %vm1208_vm13, %v2576_v26, %v1205_v60  ;;  %v2411_v49 = vclamps-f32 %v1175_v31, 1.0 }
 0x16b   : > { %v1214_v38 = vsel %vm1211_vm14, %v1213_v17, %v1209_v61 }
 0x16c   : > { %v1215_v43 = vmul.f32 %v1214_v38, %v1190_v30  ;;  %v1232_v52 = vadd.f32 1.0, %v2411_v49 }
 0x16e   : > { %v1335_v28 = vpop.f32.mrf.mxu2  ;;  %v2412_v22 = vclamps-f32 %v1215_v43, 1.0  ;;  %v1248_v19 = vmul.f32 %v1232_v52, %v560_v1 }
 0x16f   : > { %v3431_v41 = vadd.f32 %v3419_v4, %v1335_v28 }
 0x170   : > { %v1233_v13 = vadd.f32 1.0, %v2412_v22 }
 0x171   : > { %v3441_v6 = vmul.f32 0.70710677, %v3431_v41 }
 0x172   : > { %1364 = vmatmul.bf16.gmra.mxu2 %v1256_v23  ;;  %v1249_v45 = vmul.f32 %v1233_v13, %v561_v57 }
 0x173   : > { %v1407_v56 = vmul.f32 %v3441_v6, %v3441_v6 }
 0x174   : > { %v1257_v24 = vpack.c.bf16 %v1249_v45, %v1248_v19 }
 0x175   : > { %v3449_v34 = vmin.f32 %v1407_v56, 16.0  ;;  %535 = vmatmul.bf16.gmra.mxu1 %v2614_v48 }
 0x176   : > { %v1337_v37 = vpop.f32.mrf.mxu2 }
 0x177   : > { %v1420_v59 = vmul.f32 3.8918573e-05, %v3449_v34  ;;  %v3456_v27 = vadd.f32 %v3419_v4, %v1337_v37  ;;  %v1409_v15 = vmul.f32 2.1237322e-06, %v3449_v34 }
 0x179   : > { %v1421_v33 = vadd.f32 0.001143296, %v1420_v59  ;;  %v3460_v21 = vmul.f32 0.70710677, %v3456_v27  ;;  %v1410_v53 = vadd.f32 0.00028619796, %v1409_v15 }
 0x17b   : > { %v1422_v5 = vmul.f32 %v1421_v33, %v3449_v34  ;;  %v1447_v63 = vmul.f32 %v3460_v21, %v3460_v21  ;;  %v1411_v39 = vmul.f32 %v1410_v53, %v3449_v34 }
 0x17d   : > { %v1423_v42 = vadd.f32 0.014752088, %v1422_v5  ;;  %v3468_v14 = vmin.f32 %v1447_v63, 16.0  ;;  %v1412_v28 = vadd.f32 0.0036580483, %v1411_v39  ;;  %v2534_v63 = vld [vmem:[%s4189_s5 + $0x38] sm:$0xff] }
 0x17e   : > { %2171 = vmatpush.bf16.msra.mxu3 %v2534_v63  ;;  %v2533_v39 = vld [vmem:[%s4189_s5 + $0x30] sm:$0xff]  ;;  %v2530_v63 = vld [vmem:[%s4189_s5 + $0x18] sm:$0xff] }
 0x17f   : > { %v1424_v62 = vmul.f32 %v1423_v42, %v3449_v34  ;;  %v1460_v36 = vmul.f32 3.8918573e-05, %v3468_v14  ;;  %v1449_v8 = vmul.f32 2.1237322e-06, %v3468_v14  ;;  %v1413_v60 = vmul.f32 %v1412_v28, %v3449_v34 }
 0x181   : > { %v1425_v18 = vadd.f32 0.112945676, %v1424_v62  ;;  %v1461_v0 = vadd.f32 0.001143296, %v1460_v36  ;;  %v1450_v12 = vadd.f32 0.00028619796, %v1449_v8 }
 0x182   : > { %1369 = vmatmul.bf16.gmra.mxu2 %v1257_v24  ;;  %v1414_v38 = vadd.f32 0.05243302, %v1413_v60  ;;  %2172 = vmatpush.bf16.msra.mxu3 %v2533_v39 }
 0x183   : > { %v1426_v26 = vmul.f32 %v1425_v18, %v3449_v34  ;;  %v1462_v32 = vmul.f32 %v1461_v0, %v3468_v14  ;;  %v1340_v58 = vpop.f32.mrf.mxu2  ;;  %v1451_v47 = vmul.f32 %v1450_v12, %v3468_v14 }
 0x184   : > { %v3478_v44 = vadd.f32 %v3419_v4, %v1340_v58  ;;  %v1415_v22 = vmul.f32 %v1414_v38, %v3449_v34 }
 0x185   : > { %v1427_v3 = vadd.f32 0.4994258, %v1426_v26  ;;  %v1463_v35 = vadd.f32 0.014752088, %v1462_v32  ;;  %540 = vmatmul.bf16.gmra.mxu1 %v2615_v29  ;;  %v1452_v46 = vadd.f32 0.0036580483, %v1451_v47 }
 0x186   : > { %v3484_v55 = vmul.f32 0.70710677, %v3478_v44  ;;  %v1416_v57 = vadd.f32 0.18741608, %v1415_v22 }
 0x187   : > { %v1428_v11 = vmul.f32 %v1427_v3, %v3449_v34  ;;  %v1464_v10 = vmul.f32 %v1463_v35, %v3468_v14  ;;  %v1453_v59 = vmul.f32 %v1452_v46, %v3468_v14  ;;  %v2532_v46 = vld [vmem:[%s4189_s5 + $0x28] sm:$0xff] }
 0x188   : > { %v1487_v7 = vmul.f32 %v3484_v55, %v3484_v55  ;;  %2173 = vmatpush.bf16.msra.mxu3 %v2532_v46 }
 0x189   : > { %v3474_v20 = vadd.f32 1.0, %v1428_v11  ;;  %v1465_v51 = vadd.f32 0.112945676, %v1464_v10  ;;  %v1454_v42 = vadd.f32 0.05243302, %v1453_v59  ;;  %v1417_v11 = vmul.f32 %v1416_v57, %v3449_v34 }
 0x18a   : > { %v3491_v50 = vmin.f32 %v1487_v7, 16.0  ;;  %v2616_v10 = vld [vmem:[%s4186_s2] sm:$0x3] }
 0x18b   : > { %2577 = vrcp.f32 %v3474_v20  ;;  %v1466_v9 = vmul.f32 %v1465_v51, %v3468_v14  ;;  %v1342_v30 = vpop.f32.mrf.mxu2  ;;  %v1455_v19 = vmul.f32 %v1454_v42, %v3468_v14  ;;  %vm1435_vm1 = vweird.f32 %v3474_v20 }
 0x18c   : > { %v1489_v61 = vmul.f32 2.1237322e-06, %v3491_v50  ;;  %v1500_v2 = vmul.f32 3.8918573e-05, %v3491_v50  ;;  %v3501_v23 = vadd.f32 %v3419_v4, %v1342_v30  ;;  %v1441_v34 = vand.u32 2147483648, %v3474_v20 }
 0x18d   : > { %v1467_v40 = vadd.f32 0.4994258, %v1466_v9  ;;  %v1456_v12 = vadd.f32 0.18741608, %v1455_v19  ;;  %v1439_v51 = vand.u32 2147483647, %v3474_v20 }
 0x18e   : > { %v1490_v25 = vadd.f32 0.00028619796, %v1489_v61  ;;  %v1501_v16 = vadd.f32 0.001143296, %v1500_v2  ;;  %v3508_v33 = vmul.f32 0.70710677, %v3501_v23 }
 0x18f   : > { %v1468_v56 = vmul.f32 %v1467_v40, %v3468_v14  ;;  %v1418_v9 = vadd.f32 1.1283791, %v1417_v11  ;;  %v1457_v30 = vmul.f32 %v1456_v12, %v3468_v14  ;;  %vm1440_vm4 = vcmp.eq.f32.partialorder %v1439_v51, 8.507059e+37  ;;  %v2531_v14 = vld [vmem:[%s4189_s5 + $0x20] sm:$0xff] }
 0x190   : > { %v1502_v31 = vmul.f32 %v1501_v16, %v3491_v50  ;;  %v1491_v49 = vmul.f32 %v1490_v25, %v3491_v50  ;;  %v1527_v48 = vmul.f32 %v3508_v33, %v3508_v33  ;;  %2174 = vmatpush.bf16.msra.mxu3 %v2531_v14  ;;  %v3607_v51 = vperm.slane %v2616_v10, 1 }
 0x191   : > { %v3493_v17 = vpop.eup %2577  ;;  %v3503_v43 = vadd.f32 1.0, %v1468_v56  ;;  %v1442_v56 = vor.u32 1.1754944e-38, %v1441_v34  ;;  %v1458_v42 = vadd.f32 1.1283791, %v1457_v30 }
 0x192   : > { %v1431_v54 = vmul.f32 %v3493_v17, %v3474_v20  ;;  %v1503_v37 = vadd.f32 0.014752088, %v1502_v31  ;;  %v3516_v62 = vmin.f32 %v1527_v48, 16.0  ;;  %v1492_v18 = vadd.f32 0.0036580483, %v1491_v49  ;;  %v506_v48 = vpop.f32.mrf.mxu1 }
 0x193   : > { %2579 = vrcp.f32 %v3503_v43  ;;  %vm1436_vm0 = vweird.f32 %v3493_v17  ;;  %vm1475_vm5 = vweird.f32 %v3503_v43  ;;  %v1479_v16 = vand.u32 2147483647, %v3503_v43 }
 0x194   : > { %v1432_v5 = vsub.f32 1.0, %v1431_v54  ;;  %v1504_v13 = vmul.f32 %v1503_v37, %v3491_v50  ;;  %v1529_v15 = vmul.f32 2.1237322e-06, %v3516_v62  ;;  %v1540_v26 = vmul.f32 3.8918573e-05, %v3516_v62  ;;  %vm3542_vm2 = vmor %vm1435_vm1, %vm1436_vm0  ;;  %2175 = vmatpush.bf16.msra.mxu3 %v2530_v63 }
 0x195   : > { %v1493_v32 = vmul.f32 %v1492_v18, %v3491_v50  ;;  %v1419_v31 = vmul.f32 %v1418_v9, %v3441_v6  ;;  %vm1480_vm7 = vcmp.eq.f32.partialorder %v1479_v16, 8.507059e+37  ;;  %v507_v14 = vadd.f32 %v506_v48, %v3607_v51 }
 0x196   : > { %v1433_v52 = vmul.f32 %v3493_v17, %v1432_v5  ;;  %v1505_v45 = vadd.f32 0.112945676, %v1504_v13  ;;  %v1530_v53 = vadd.f32 0.00028619796, %v1529_v15  ;;  %v1541_v36 = vadd.f32 0.001143296, %v1540_v26 }
 0x197   : > { %v1494_v61 = vadd.f32 0.05243302, %v1493_v32  ;;  %v2529_v32 = vld [vmem:[%s4189_s5 + $0x10] sm:$0xff] }
 0x198   : > { %v1506_v24 = vmul.f32 %v1505_v45, %v3491_v50  ;;  %v1434_v0 = vadd.f32 %v3493_v17, %v1433_v52  ;;  %v1531_v35 = vmul.f32 %v1530_v53, %v3516_v62  ;;  %v1542_v29 = vmul.f32 %v1541_v36, %v3516_v62  ;;  %2176 = vmatpush.bf16.msra.mxu3 %v2529_v32 }
 0x199   : > { %v3522_v1 = vpop.eup %2579  ;;  %v1495_v5 = vmul.f32 %v1494_v61, %v3491_v50  ;;  %v2528_v61 = vld [vmem:[%s4189_s5 + $0x8] sm:$0xff] }
 0x19a   : > { %v1471_v3 = vmul.f32 %v3522_v1, %v3503_v43  ;;  %v1507_v58 = vadd.f32 0.4994258, %v1506_v24  ;;  %v1532_v7 = vadd.f32 0.0036580483, %v1531_v35  ;;  %v1543_v60 = vadd.f32 0.014752088, %v1542_v29 }
 0x19b   : > { %v1438_v40 = vsel %vm3542_vm2, %v3493_v17, %v1434_v0  ;;  %vm1476_vm3 = vweird.f32 %v3522_v1  ;;  %v1481_v17 = vand.u32 2147483648, %v3503_v43  ;;  %v1496_v26 = vadd.f32 0.18741608, %v1495_v5 }
 0x19c   : > { %v1472_v8 = vsub.f32 1.0, %v1471_v3  ;;  %v1508_v47 = vmul.f32 %v1507_v58, %v3491_v50  ;;  %v1533_v38 = vmul.f32 %v1532_v7, %v3516_v62  ;;  %v1544_v20 = vmul.f32 %v1543_v60, %v3516_v62  ;;  %vm3569_vm6 = vmor %vm1475_vm5, %vm1476_vm3  ;;  %v508_v7 = vpop.f32.mrf.mxu1  ;;  %2177 = vmatpush.bf16.msra.mxu3 %v2528_v61 }
 0x19d   : > { %v1443_v25 = vsel %vm1440_vm4, %v1442_v56, %v1438_v40  ;;  %v1482_v52 = vor.u32 1.1754944e-38, %v1481_v17  ;;  %v1459_v3 = vmul.f32 %v1458_v42, %v3460_v21  ;;  %v1375_v58 = vmul.f32 0.5, %v3431_v41 }
 0x19e   : > { %v1473_v28 = vmul.f32 %v3522_v1, %v1472_v8  ;;  %v3554_v2 = vadd.f32 1.0, %v1508_v47  ;;  %v1545_v59 = vadd.f32 0.112945676, %v1544_v20  ;;  %v1534_v49 = vadd.f32 0.05243302, %v1533_v38 }
 0x19f   : > { %v1444_v6 = vmul.f32 %v1443_v25, %v1419_v31  ;;  %v1497_v21 = vmul.f32 %v1496_v26, %v3491_v50  ;;  %v1376_v60 = vmul.f32 0.5, %v3456_v27  ;;  %v509_v5 = vadd.f32 %v508_v7, %v3607_v51 }
 0x1a0   : > { %v1474_v54 = vadd.f32 %v3522_v1, %v1473_v28  ;;  %2581 = vrcp.f32 %v3554_v2  ;;  %v1546_v13 = vmul.f32 %v1545_v59, %v3516_v62  ;;  %v1535_v19 = vmul.f32 %v1534_v49, %v3516_v62 }
 0x1a1   : > { %v2445_v11 = vclamps-f32 %v1444_v6, 1.0  ;;  %v1521_v28 = vand.u32 2147483648, %v3554_v2  ;;  %v1498_v38 = vadd.f32 1.1283791, %v1497_v21  ;;  %vm1515_vm9 = vweird.f32 %v3554_v2 }
 0x1a2   : > { %v1478_v43 = vsel %vm3569_vm6, %v3522_v1, %v1474_v54  ;;  %v1547_v18 = vadd.f32 0.4994258, %v1546_v13  ;;  %v1536_v35 = vadd.f32 0.18741608, %v1535_v19  ;;  %v1519_v20 = vand.u32 2147483647, %v3554_v2 }
 0x1a3   : > { %v1483_v15 = vsel %vm1480_vm7, %v1482_v52, %v1478_v43  ;;  %v2047_v47 = vadd.f32 1.0, %v2445_v11  ;;  %v1522_v27 = vor.u32 1.1754944e-38, %v1521_v28  ;;  %v1499_v42 = vmul.f32 %v1498_v38, %v3484_v55 }
 0x1a4   : > { %v1345_v37 = vpop.f32.mrf.mxu2  ;;  %v1548_v53 = vmul.f32 %v1547_v18, %v3516_v62  ;;  %v1484_v0 = vmul.f32 %v1483_v15, %v1459_v3  ;;  %v1537_v56 = vmul.f32 %v1536_v35, %v3516_v62  ;;  %vm1520_vm11 = vcmp.eq.f32.partialorder %v1519_v20, 8.507059e+37  ;;  %v511_v11 = vpop.f32.mrf.mxu1 }
 0x1a5   : > { %v3579_v57 = vadd.f32 %v3419_v4, %v1345_v37  ;;  %v2527_v37 = vld [vmem:[%s4189_s5] sm:$0xff] }
 0x1a6   : > { %v2582_v45 = vpop.eup %2581  ;;  %v3593_v39 = vadd.f32 1.0, %v1548_v53  ;;  %v2446_v46 = vclamps-f32 %v1484_v0, 1.0  ;;  %v1538_v43 = vadd.f32 1.1283791, %v1537_v56  ;;  %2178 = vmatpush.bf16.msra.mxu3 %v2527_v37  ;;  %v1378_v37 = vmul.f32 0.5, %v3501_v23 }
 0x1a7   : > { %v3586_v1 = vmul.f32 0.70710677, %v3579_v57  ;;  %v1511_v24 = vmul.f32 %v2582_v45, %v3554_v2  ;;  %vm1516_vm8 = vweird.f32 %v2582_v45  ;;  %v2063_v2 = vmul.f32 %v2047_v47, %v1375_v58 }
 0x1a8   : > { %2583 = vrcp.f32 %v3593_v39  ;;  %vm3621_vm10 = vmor %vm1515_vm9, %vm1516_vm8  ;;  %v2048_v25 = vadd.f32 1.0, %v2446_v46  ;;  %v1559_v19 = vand.u32 2147483647, %v3593_v39  ;;  %vm1555_vm13 = vweird.f32 %v3593_v39 }
 0x1a9   : > { %v1567_v36 = vmul.f32 %v3586_v1, %v3586_v1  ;;  %v1512_v8 = vsub.f32 1.0, %v1511_v24  ;;  %v2079_v26 = vadd.f32 %v2063_v2, %v507_v14  ;;  %v1539_v7 = vmul.f32 %v1538_v43, %v3508_v33 }
 0x1aa   : > { %v2064_v49 = vmul.f32 %v2048_v25, %v1376_v60  ;;  %vm1560_vm15 = vcmp.eq.f32.partialorder %v1559_v19, 8.507059e+37  ;;  %v1377_v2 = vmul.f32 0.5, %v3478_v44 }
 0x1ab   : > { %v3600_v29 = vmin.f32 %v1567_v36, 16.0  ;;  %v1513_v12 = vmul.f32 %v2582_v45, %v1512_v8 }
 0x1ac   : > { %v1347_v34 = vpop.f32.mrf.mxu2  ;;  %v2080_v18 = vadd.f32 %v2064_v49, %v509_v5  ;;  %v513_v5 = vpop.f32.mrf.mxu1 }
 0x1ad   : > { %v1569_v41 = vmul.f32 2.1237322e-06, %v3600_v29  ;;  %v3611_v50 = vadd.f32 %v3419_v4, %v1347_v34  ;;  %v1514_v9 = vadd.f32 %v2582_v45, %v1513_v12  ;;  %v1580_v40 = vmul.f32 3.8918573e-05, %v3600_v29 }
 0x1ae   : > { %v2584_v31 = vpop.eup %2583  ;;  %v2095_v0 = vpack.c.bf16 %v2080_v18, %v2079_v26 }
 0x1af   : > { %v1581_v54 = vadd.f32 0.001143296, %v1580_v40  ;;  %v3626_v17 = vmul.f32 0.70710677, %v3611_v50  ;;  %v1518_v16 = vsel %vm3621_vm10, %v2582_v45, %v1514_v9  ;;  %v1570_v59 = vadd.f32 0.00028619796, %v1569_v41 }
 0x1b0   : > { %v1551_v48 = vmul.f32 %v2584_v31, %v3593_v39  ;;  %v1523_v13 = vsel %vm1520_vm11, %v1522_v27, %v1518_v16  ;;  %v1561_v45 = vand.u32 2147483648, %v3593_v39  ;;  %vm1556_vm12 = vweird.f32 %v2584_v31  ;;  %2179 = vmatmul.bf16.vlgmr.msra.gmra.mxu3 %v2095_v0 }
 0x1b1   : > { %v1582_v62 = vmul.f32 %v1581_v54, %v3600_v29  ;;  %v1607_v22 = vmul.f32 %v3626_v17, %v3626_v17  ;;  %v1571_v15 = vmul.f32 %v1570_v59, %v3600_v29  ;;  %v1524_v53 = vmul.f32 %v1523_v13, %v1499_v42  ;;  %vm1557_vm14 = vmor %vm1555_vm13, %vm1556_vm12 }
 0x1b2   : > { %v1552_v63 = vsub.f32 1.0, %v1551_v48  ;;  %v1562_v35 = vor.u32 1.1754944e-38, %v1561_v45  ;;  %v512_v42 = vadd.f32 %v511_v11, %v3607_v51 }
 0x1b3   : > { %v1583_v6 = vadd.f32 0.014752088, %v1582_v62  ;;  %v3640_v52 = vmin.f32 %v1607_v22, 16.0  ;;  %v1572_v34 = vadd.f32 0.0036580483, %v1571_v15  ;;  %v2447_v9 = vclamps-f32 %v1524_v53, 1.0 }
 0x1b4   : > { %v1553_v36 = vmul.f32 %v2584_v31, %v1552_v63  ;;  %v514_v63 = vadd.f32 %v513_v5, %v3607_v51 }
 0x1b5   : > { %v1584_v55 = vmul.f32 %v1583_v6, %v3600_v29  ;;  %v1609_v3 = vmul.f32 2.1237322e-06, %v3640_v52  ;;  %v1620_v24 = vmul.f32 3.8918573e-05, %v3640_v52  ;;  %v1573_v20 = vmul.f32 %v1572_v34, %v3600_v29 }
 0x1b6   : > { %v1554_v21 = vadd.f32 %v2584_v31, %v1553_v36  ;;  %v2049_v54 = vadd.f32 1.0, %v2447_v9 }
 0x1b7   : > { %v1585_v8 = vadd.f32 0.112945676, %v1584_v55  ;;  %v1610_v32 = vadd.f32 0.00028619796, %v1609_v3  ;;  %v1621_v58 = vadd.f32 0.001143296, %v1620_v24 }
 0x1b8   : > { %v1558_v60 = vsel %vm1557_vm14, %v2584_v31, %v1554_v21  ;;  %v1574_v31 = vadd.f32 0.05243302, %v1573_v20  ;;  %v2065_v6 = vmul.f32 %v2049_v54, %v1377_v2 }
 0x1b9   : > { %v1586_v28 = vmul.f32 %v1585_v8, %v3600_v29  ;;  %v1611_v10 = vmul.f32 %v1610_v32, %v3640_v52  ;;  %v1622_v41 = vmul.f32 %v1621_v58, %v3640_v52  ;;  %v1563_v39 = vsel %vm1560_vm15, %v1562_v35, %v1558_v60 }
 0x1ba   : > { %v1350_v12 = vpop.f32.mrf.mxu2  ;;  %v1564_v38 = vmul.f32 %v1563_v39, %v1539_v7  ;;  %v1575_v23 = vmul.f32 %v1574_v31, %v3600_v29  ;;  %v2081_v32 = vadd.f32 %v2065_v6, %v512_v42 }
 0x1bb   : > { %v3653_v47 = vadd.f32 %v3419_v4, %v1350_v12  ;;  %v1587_v40 = vadd.f32 0.4994258, %v1586_v28  ;;  %v1612_v46 = vadd.f32 0.0036580483, %v1611_v10  ;;  %v1623_v61 = vadd.f32 0.014752088, %v1622_v41 }
 0x1bc   : > { %v2448_v25 = vclamps-f32 %v1564_v38, 1.0  ;;  %v1576_v58 = vadd.f32 0.18741608, %v1575_v23 }
 0x1bd   : > { %v3658_v56 = vmul.f32 0.70710677, %v3653_v47  ;;  %v1588_v30 = vmul.f32 %v1587_v40, %v3600_v29  ;;  %v1624_v27 = vmul.f32 %v1623_v61, %v3640_v52  ;;  %v1613_v59 = vmul.f32 %v1612_v46, %v3640_v52 }
 0x1be   : > { %v2050_v49 = vadd.f32 1.0, %v2448_v25  ;;  %v1577_v9 = vmul.f32 %v1576_v58, %v3600_v29 }
 0x1bf   : > { %v1647_v33 = vmul.f32 %v3658_v56, %v3658_v56  ;;  %v3664_v16 = vadd.f32 1.0, %v1588_v30  ;;  %v1625_v14 = vadd.f32 0.112945676, %v1624_v27  ;;  %v1614_v44 = vadd.f32 0.05243302, %v1613_v59 }
 0x1c0   : > { %v2066_v45 = vmul.f32 %v2050_v49, %v1378_v37  ;;  %v1578_v59 = vadd.f32 1.1283791, %v1577_v9 }
 0x1c1   : > { %v3668_v62 = vmin.f32 %v1647_v33, 16.0  ;;  %2585 = vrcp.f32 %v3664_v16  ;;  %v1626_v43 = vmul.f32 %v1625_v14, %v3640_v52  ;;  %v1615_v11 = vmul.f32 %v1614_v44, %v3640_v52 }
 0x1c2   : > { %v1352_v22 = vpop.f32.mrf.mxu2  ;;  %v2082_v3 = vadd.f32 %v2066_v45, %v514_v63  ;;  %v1599_v40 = vand.u32 2147483647, %v3664_v16  ;;  %v1601_v61 = vand.u32 2147483648, %v3664_v16  ;;  %vm1595_vm1 = vweird.f32 %v3664_v16 }
 0x1c3   : > { %v1649_v48 = vmul.f32 2.1237322e-06, %v3668_v62  ;;  %v1660_v13 = vmul.f32 3.8918573e-05, %v3668_v62  ;;  %v3677_v18 = vadd.f32 %v3419_v4, %v1352_v22  ;;  %v1627_v15 = vadd.f32 0.4994258, %v1626_v43 }
 0x1c4   : > { %v2096_v28 = vpack.c.bf16 %v2082_v3, %v2081_v32  ;;  %v1616_v7 = vadd.f32 0.18741608, %v1615_v11  ;;  %vm1600_vm3 = vcmp.eq.f32.partialorder %v1599_v40, 8.507059e+37  ;;  %v1602_v22 = vor.u32 1.1754944e-38, %v1601_v61 }
 0x1c5   : > { %v1650_v26 = vadd.f32 0.00028619796, %v1649_v48  ;;  %v1661_v19 = vadd.f32 0.001143296, %v1660_v13  ;;  %v3682_v55 = vmul.f32 0.70710677, %v3677_v18  ;;  %v1628_v24 = vmul.f32 %v1627_v15, %v3640_v52 }
 0x1c6   : > { %2184 = vmatmul.bf16.gmra.mxu3 %v2096_v28  ;;  %v1617_v54 = vmul.f32 %v1616_v7, %v3640_v52  ;;  %v1579_v15 = vmul.f32 %v1578_v59, %v3586_v1 }
 0x1c7   : > { %v1651_v53 = vmul.f32 %v1650_v26, %v3668_v62  ;;  %v2586_v36 = vpop.eup %2585  ;;  %v1662_v0 = vmul.f32 %v1661_v19, %v3668_v62  ;;  %v1687_v8 = vmul.f32 %v3682_v55, %v3682_v55  ;;  %v1629_v35 = vadd.f32 1.0, %v1628_v24 }
 0x1c8   : > { %v1591_v21 = vmul.f32 %v2586_v36, %v3664_v16  ;;  %vm1596_vm0 = vweird.f32 %v2586_v36  ;;  %v1618_v42 = vadd.f32 1.1283791, %v1617_v54 }
 0x1c9   : > { %v1663_v34 = vadd.f32 0.014752088, %v1662_v0  ;;  %v3691_v12 = vmin.f32 %v1687_v8, 16.0  ;;  %2587 = vrcp.f32 %v1629_v35  ;;  %v1652_v41 = vadd.f32 0.0036580483, %v1651_v53  ;;  %vm3703_vm2 = vmor %vm1595_vm1, %vm1596_vm0 }
 0x1ca   : > { %v1592_v10 = vsub.f32 1.0, %v1591_v21  ;;  %v1639_v48 = vand.u32 2147483647, %v1629_v35  ;;  %v1641_v13 = vand.u32 2147483648, %v1629_v35  ;;  %vm1635_vm5 = vweird.f32 %v1629_v35 }
 0x1cb   : > { %v1664_v60 = vmul.f32 %v1663_v34, %v3668_v62  ;;  %v1700_v46 = vmul.f32 3.8918573e-05, %v3691_v12  ;;  %v1689_v20 = vmul.f32 2.1237322e-06, %v3691_v12  ;;  %v1653_v27 = vmul.f32 %v1652_v41, %v3668_v62 }
 0x1cc   : > { %v1593_v39 = vmul.f32 %v2586_v36, %v1592_v10  ;;  %v1619_v32 = vmul.f32 %v1618_v42, %v3626_v17  ;;  %vm1640_vm7 = vcmp.eq.f32.partialorder %v1639_v48, 8.507059e+37  ;;  %v1642_v1 = vor.u32 1.1754944e-38, %v1641_v13 }
 0x1cd   : > { %v1665_v38 = vadd.f32 0.112945676, %v1664_v60  ;;  %v1701_v33 = vadd.f32 0.001143296, %v1700_v46  ;;  %v1690_v49 = vadd.f32 0.00028619796, %v1689_v20 }
 0x1ce   : > { %v1594_v30 = vadd.f32 %v2586_v36, %v1593_v39  ;;  %v1654_v16 = vadd.f32 0.05243302, %v1653_v27  ;;  %v1380_v27 = vmul.f32 0.5, %v3611_v50  ;;  %v3752_v50 = vmul.f32 0.5, %v3653_v47 }
 0x1cf   : > { %v1666_v29 = vmul.f32 %v1665_v38, %v3668_v62  ;;  %v2588_v25 = vpop.eup %2587  ;;  %v1702_v2 = vmul.f32 %v1701_v33, %v3691_v12  ;;  %v1691_v19 = vmul.f32 %v1690_v49, %v3691_v12 }
 0x1d0   : > { %v1598_v31 = vsel %vm3703_vm2, %v2586_v36, %v1594_v30  ;;  %v1631_v5 = vmul.f32 %v2588_v25, %v1629_v35  ;;  %vm1636_vm4 = vweird.f32 %v2588_v25  ;;  %v1655_v3 = vmul.f32 %v1654_v16, %v3668_v62  ;;  %v516_v36 = vpop.f32.mrf.mxu1 }
 0x1d1   : > { %v1667_v37 = vadd.f32 0.4994258, %v1666_v29  ;;  %v1703_v52 = vadd.f32 0.014752088, %v1702_v2  ;;  %v1603_v44 = vsel %vm1600_vm3, %v1602_v22, %v1598_v31  ;;  %vm1637_vm6 = vmor %vm1635_vm5, %vm1636_vm4  ;;  %v1692_v21 = vadd.f32 0.0036580483, %v1691_v19 }
 0x1d2   : > { %v1632_v43 = vsub.f32 1.0, %v1631_v5  ;;  %v1604_v11 = vmul.f32 %v1603_v44, %v1579_v15  ;;  %v1656_v41 = vadd.f32 0.18741608, %v1655_v3  ;;  %v1379_v30 = vmul.f32 0.5, %v3579_v57 }
 0x1d3   : > { %v1668_v63 = vmul.f32 %v1667_v37, %v3668_v62  ;;  %v1704_v45 = vmul.f32 %v1703_v52, %v3691_v12  ;;  %v1693_v40 = vmul.f32 %v1692_v21, %v3691_v12  ;;  %v517_v42 = vadd.f32 %v516_v36, %v3607_v51 }
 0x1d4   : > { %v1633_v26 = vmul.f32 %v2588_v25, %v1632_v43  ;;  %v2449_v17 = vclamps-f32 %v1604_v11, 1.0  ;;  %v1657_v29 = vmul.f32 %v1656_v41, %v3668_v62  ;;  %v3756_v62 = vmul.f32 0.5, %v3677_v18 }
 0x1d5   : > { %v1355_v6 = vpop.f32.mrf.mxu2  ;;  %v3718_v24 = vadd.f32 1.0, %v1668_v63  ;;  %v1705_v53 = vadd.f32 0.112945676, %v1704_v45  ;;  %v1694_v16 = vadd.f32 0.05243302, %v1693_v40 }
 0x1d6   : > { %v3713_v23 = vadd.f32 %v3419_v4, %v1355_v6  ;;  %v1634_v0 = vadd.f32 %v2588_v25, %v1633_v26  ;;  %v2051_v14 = vadd.f32 1.0, %v2449_v17  ;;  %v1658_v44 = vadd.f32 1.1283791, %v1657_v29 }
 0x1d7   : > { %2589 = vrcp.f32 %v3718_v24  ;;  %v1706_v34 = vmul.f32 %v1705_v53, %v3691_v12  ;;  %vm1675_vm8 = vweird.f32 %v3718_v24  ;;  %v1695_v18 = vmul.f32 %v1694_v16, %v3691_v12 }
 0x1d8   : > { %v3721_v8 = vmul.f32 0.70710677, %v3713_v23  ;;  %v1638_v58 = vsel %vm1637_vm6, %v2588_v25, %v1634_v0  ;;  %v518_v57 = vpop.f32.mrf.mxu1  ;;  %v2067_v48 = vmul.f32 %v2051_v14, %v1379_v30  ;;  %v1679_v41 = vand.u32 2147483647, %v3718_v24 }
 0x1d9   : > { %v1643_v10 = vsel %vm1640_vm7, %v1642_v1, %v1638_v58  ;;  %v1707_v7 = vadd.f32 0.4994258, %v1706_v34  ;;  %v519_v47 = vadd.f32 %v518_v57, %v3607_v51  ;;  %v1696_v17 = vadd.f32 0.18741608, %v1695_v18 }
 0x1da   : > { %v1727_v28 = vmul.f32 %v3721_v8, %v3721_v8  ;;  %v1644_v35 = vmul.f32 %v1643_v10, %v1619_v32  ;;  %v1681_v32 = vand.u32 2147483648, %v3718_v24  ;;  %v2083_v21 = vadd.f32 %v2067_v48, %v517_v42 }
 0x1db   : > { %v1708_v46 = vmul.f32 %v1707_v7, %v3691_v12  ;;  %vm1680_vm11 = vcmp.eq.f32.partialorder %v1679_v41, 8.507059e+37  ;;  %v3823_v18 = vmul.f32 0.5, %v3713_v23 }
 0x1dc   : > { %v3728_v60 = vmin.f32 %v1727_v28, 16.0  ;;  %v2450_v54 = vclamps-f32 %v1644_v35, 1.0 }
 0x1dd   : > { %v1357_v9 = vpop.f32.mrf.mxu2  ;;  %v3737_v20 = vpop.eup %2589  ;;  %v3747_v59 = vadd.f32 1.0, %v1708_v46 }
 0x1de   : > { %v3731_v39 = vadd.f32 %v3419_v4, %v1357_v9  ;;  %v1729_v61 = vmul.f32 2.1237322e-06, %v3728_v60  ;;  %v1740_v38 = vmul.f32 3.8918573e-05, %v3728_v60  ;;  %v1671_v25 = vmul.f32 %v3737_v20, %v3718_v24 }
 0x1df   : > { %v2052_v5 = vadd.f32 1.0, %v2450_v54  ;;  %2591 = vrcp.f32 %v3747_v59  ;;  %vm1676_vm9 = vweird.f32 %v3737_v20  ;;  %vm1715_vm13 = vweird.f32 %v3747_v59 }
 0x1e0   : > { %v3742_v33 = vmul.f32 0.70710677, %v3731_v39  ;;  %v1730_v2 = vadd.f32 0.00028619796, %v1729_v61  ;;  %v1741_v31 = vadd.f32 0.001143296, %v1740_v38  ;;  %v1659_v38 = vmul.f32 %v1658_v44, %v3658_v56  ;;  %vm3790_vm10 = vmor %vm1675_vm8, %vm1676_vm9 }
 0x1e1   : > { %v1672_v49 = vsub.f32 1.0, %v1671_v25  ;;  %v2068_v6 = vmul.f32 %v2052_v5, %v1380_v27 }
 0x1e2   : > { %v1767_v22 = vmul.f32 %v3742_v33, %v3742_v33  ;;  %v1731_v37 = vmul.f32 %v1730_v2, %v3728_v60  ;;  %v1742_v52 = vmul.f32 %v1741_v31, %v3728_v60  ;;  %v1682_v2 = vor.u32 1.1754944e-38, %v1681_v32 }
 0x1e3   : > { %v1673_v63 = vmul.f32 %v3737_v20, %v1672_v49  ;;  %v2084_v11 = vadd.f32 %v2068_v6, %v519_v47  ;;  %v1697_v49 = vmul.f32 %v1696_v17, %v3691_v12 }
 0x1e4   : > { %v3761_v43 = vmin.f32 %v1767_v22, 16.0  ;;  %v1732_v45 = vadd.f32 0.0036580483, %v1731_v37  ;;  %v1743_v15 = vadd.f32 0.014752088, %v1742_v52 }
 0x1e5   : > { %v1360_v13 = vpop.f32.mrf.mxu2  ;;  %v3774_v0 = vpop.eup %2591  ;;  %v1674_v34 = vadd.f32 %v3737_v20, %v1673_v63  ;;  %v2097_v61 = vpack.c.bf16 %v2084_v11, %v2083_v21  ;;  %v1698_v11 = vadd.f32 1.1283791, %v1697_v49 }
 0x1e6   : > { %v1769_v26 = vmul.f32 2.1237322e-06, %v3761_v43  ;;  %v1780_v19 = vmul.f32 3.8918573e-05, %v3761_v43  ;;  %v1733_v3 = vmul.f32 %v1732_v45, %v3728_v60  ;;  %v1744_v53 = vmul.f32 %v1743_v15, %v3728_v60 }
 0x1e7   : > { %v3772_v36 = vadd.f32 %v3419_v4, %v1360_v13  ;;  %v1711_v28 = vmul.f32 %v3774_v0, %v3747_v59  ;;  %v1678_v14 = vsel %vm3790_vm10, %v3737_v20, %v1674_v34  ;;  %2189 = vmatmul.bf16.gmra.mxu3 %v2097_v61  ;;  %v1721_v20 = vand.u32 2147483648, %v3747_v59  ;;  %v521_v13 = vpop.f32.mrf.mxu1 }
 0x1e8   : > { %v1770_v1 = vadd.f32 0.00028619796, %v1769_v26  ;;  %v1781_v58 = vadd.f32 0.001143296, %v1780_v19  ;;  %v1734_v10 = vadd.f32 0.05243302, %v1733_v3  ;;  %v1683_v37 = vsel %vm1680_vm11, %v1682_v2, %v1678_v14 }
 0x1e9   : > { %v1745_v35 = vadd.f32 0.112945676, %v1744_v53  ;;  %v1712_v40 = vsub.f32 1.0, %v1711_v28  ;;  %v3785_v46 = vmul.f32 0.70710677, %v3772_v36  ;;  %vm1716_vm12 = vweird.f32 %v3774_v0 }
 0x1ea   : > { %v1771_v7 = vmul.f32 %v1770_v1, %v3761_v43  ;;  %v1782_v9 = vmul.f32 %v1781_v58, %v3761_v43  ;;  %v1735_v31 = vmul.f32 %v1734_v10, %v3728_v60  ;;  %v1684_v15 = vmul.f32 %v1683_v37, %v1659_v38  ;;  %vm3830_vm14 = vmor %vm1715_vm13, %vm1716_vm12 }
 0x1eb   : > { %v1746_v27 = vmul.f32 %v1745_v35, %v3728_v60  ;;  %v1807_v56 = vmul.f32 %v3785_v46, %v3785_v46  ;;  %v1713_v24 = vmul.f32 %v3774_v0, %v1712_v40  ;;  %v1719_v3 = vand.u32 2147483647, %v3747_v59 }
 0x1ec   : > { %v1772_v54 = vadd.f32 0.0036580483, %v1771_v7  ;;  %v1783_v29 = vadd.f32 0.014752088, %v1782_v9  ;;  %v1736_v47 = vadd.f32 0.18741608, %v1735_v31  ;;  %v522_v49 = vadd.f32 %v521_v13, %v3607_v51 }
 0x1ed   : > { %v1362_v25 = vpop.f32.mrf.mxu2  ;;  %v1747_v22 = vadd.f32 0.4994258, %v1746_v27  ;;  %v3808_v16 = vmin.f32 %v1807_v56, 16.0  ;;  %v1714_v12 = vadd.f32 %v3774_v0, %v1713_v24  ;;  %v1722_v59 = vor.u32 1.1754944e-38, %v1721_v20  ;;  %v3864_v56 = vld [vmem:[%s4188_s4] ss:$0 sm:$0xff] }
 0x1ee   : > { %v1784_v57 = vmul.f32 %v1783_v29, %v3761_v43  ;;  %v3804_v5 = vadd.f32 %v3419_v4, %v1362_v25  ;;  %v1773_v42 = vmul.f32 %v1772_v54, %v3761_v43  ;;  %v1737_v34 = vmul.f32 %v1736_v47, %v3728_v60 }
 0x1ef   : > { %v1748_v52 = vmul.f32 %v1747_v22, %v3728_v60  ;;  %v1809_v4 = vmul.f32 2.1237322e-06, %v3808_v16  ;;  %v1820_v6 = vmul.f32 3.8918573e-05, %v3808_v16  ;;  %v1718_v21 = vsel %vm3830_vm14, %v3774_v0, %v1714_v12  ;;  %v523_v14 = vpop.f32.mrf.mxu1 }
 0x1f0   : > { %v1785_v48 = vadd.f32 0.112945676, %v1784_v57  ;;  %v3820_v45 = vmul.f32 0.70710677, %v3804_v5  ;;  %v1774_v53 = vadd.f32 0.05243302, %v1773_v42  ;;  %v1699_v54 = vmul.f32 %v1698_v11, %v3682_v55 }
 0x1f1   : > { %v3816_v44 = vadd.f32 1.0, %v1748_v52  ;;  %v1810_v26 = vadd.f32 0.00028619796, %v1809_v4  ;;  %v1821_v19 = vadd.f32 0.001143296, %v1820_v6  ;;  %v2451_v7 = vclamps-f32 %v1684_v15, 1.0 }
 0x1f2   : > { %v1786_v63 = vmul.f32 %v1785_v48, %v3761_v43  ;;  %v1847_v28 = vmul.f32 %v3820_v45, %v3820_v45  ;;  %vm1720_vm15 = vcmp.eq.f32.partialorder %v1719_v3, 8.507059e+37  ;;  %v3844_v9 = vmul.f32 0.5, %v3731_v39 }
 0x1f3   : > { %2593 = vrcp.f32 %v3816_v44  ;;  %v1811_v23 = vmul.f32 %v1810_v26, %v3808_v16  ;;  %v1822_v58 = vmul.f32 %v1821_v19, %v3808_v16  ;;  %v1775_v17 = vmul.f32 %v1774_v53, %v3761_v43 }
 0x1f4   : > { %v1787_v1 = vadd.f32 0.4994258, %v1786_v63  ;;  %v3847_v40 = vmin.f32 %v1847_v28, 16.0  ;;  %v1723_v61 = vsel %vm1720_vm15, %v1722_v59, %v1718_v21  ;;  %v1738_v29 = vadd.f32 1.1283791, %v1737_v34 }
 0x1f5   : > { %v1812_v41 = vadd.f32 0.0036580483, %v1811_v23  ;;  %v1823_v35 = vadd.f32 0.014752088, %v1822_v58  ;;  %v1365_v0 = vpop.f32.mrf.mxu2  ;;  %v2053_v31 = vadd.f32 1.0, %v2451_v7  ;;  %v1724_v55 = vmul.f32 %v1723_v61, %v1699_v54 }
 0x1f6   : > { %v1788_v10 = vmul.f32 %v1787_v1, %v3761_v43  ;;  %v1849_v39 = vmul.f32 2.1237322e-06, %v3847_v40  ;;  %v1860_v25 = vmul.f32 3.8918573e-05, %v3847_v40  ;;  %v3867_v24 = vadd.f32 %v3864_v56, %v1365_v0 }
 0x1f7   : > { %v1813_v60 = vmul.f32 %v1812_v41, %v3808_v16  ;;  %v1824_v30 = vmul.f32 %v1823_v35, %v3808_v16  ;;  %v1776_v22 = vadd.f32 0.18741608, %v1775_v17  ;;  %v3870_v57 = vmul.f32 0.5, %v3772_v36 }
 0x1f8   : > { %v3849_v38 = vadd.f32 1.0, %v1788_v10  ;;  %v1850_v52 = vadd.f32 0.00028619796, %v1849_v39  ;;  %v3874_v42 = vadd.f32 %v523_v14, %v3607_v51  ;;  %v3877_v48 = vmul.f32 %v1738_v29, %v3721_v8 }
 0x1f9   : > { %v3853_v27 = vpop.eup %2593  ;;  %v1814_v20 = vadd.f32 0.05243302, %v1813_v60  ;;  %v1825_v37 = vadd.f32 0.112945676, %v1824_v30  ;;  %v1761_v4 = vand.u32 2147483648, %v3816_v44  ;;  %v2069_v63 = vmul.f32 %v2053_v31, %v3752_v50 }
 0x1fa   : > { %v1751_v2 = vmul.f32 %v3853_v27, %v3816_v44  ;;  %2595 = vrcp.f32 %v3849_v38  ;;  %v1861_v6 = vadd.f32 0.001143296, %v1860_v25  ;;  %v1851_v36 = vmul.f32 %v1850_v52, %v3847_v40 }
 0x1fb   : > { %v1826_v12 = vmul.f32 %v1825_v37, %v3808_v16  ;;  %v3884_v13 = vmul.f32 0.70710677, %v3867_v24  ;;  %vm1755_vm0 = vweird.f32 %v3816_v44  ;;  %v1759_v15 = vand.u32 2147483647, %v3816_v44 }
 0x1fc   : > { %v1752_v47 = vsub.f32 1.0, %v1751_v2  ;;  %v1777_v8 = vmul.f32 %v1776_v22, %v3761_v43  ;;  %v1862_v26 = vmul.f32 %v1861_v6, %v3847_v40  ;;  %v2452_v19 = vclamps-f32 %v1724_v55, 1.0 }
 0x1fd   : > { %v1815_v53 = vmul.f32 %v1814_v20, %v3808_v16  ;;  %v1827_v11 = vadd.f32 0.4994258, %v1826_v12  ;;  %v1852_v32 = vadd.f32 0.0036580483, %v1851_v36  ;;  %v1887_v50 = vmul.f32 %v3884_v13, %v3884_v13  ;;  %v1367_v0 = vpop.f32.mrf.mxu2  ;;  %v3945_v36 = vpop.f32.mrf.mxu1 }
 0x1fe   : > { %v1753_v1 = vmul.f32 %v3853_v27, %v1752_v47  ;;  %v1762_v23 = vor.u32 1.1754944e-38, %v1761_v4  ;;  %v1863_v21 = vadd.f32 0.014752088, %v1862_v26  ;;  %v3900_v34 = vadd.f32 %v2069_v63, %v522_v49 }
 0x1ff   : > { %v1828_v43 = vmul.f32 %v1827_v11, %v3808_v16  ;;  %v1853_v59 = vmul.f32 %v1852_v32, %v3847_v40  ;;  %v3902_v28 = vmin.f32 %v1887_v50, 16.0  ;;  %vm3904_vm1 = vcmp.eq.f32.partialorder %v1759_v15, 8.507059e+37 }
 0x200   : > { %v3890_v3 = vpop.eup %2595  ;;  %v1778_v41 = vadd.f32 1.1283791, %v1777_v8  ;;  %v1864_v7 = vmul.f32 %v1863_v21, %v3847_v40  ;;  %v2054_v17 = vadd.f32 1.0, %v2452_v19  ;;  %vm1756_vm2 = vweird.f32 %v3853_v27 }
 0x201   : > { %v1791_v58 = vmul.f32 %v3890_v3, %v3849_v38  ;;  %v1816_v61 = vadd.f32 0.18741608, %v1815_v53  ;;  %v3910_v60 = vadd.f32 1.0, %v1828_v43  ;;  %v1889_v30 = vmul.f32 2.1237322e-06, %v3902_v28  ;;  %vm3930_vm3 = vmor %vm1755_vm0, %vm1756_vm2 }
 0x202   : > { %v1754_v54 = vadd.f32 %v3853_v27, %v1753_v1  ;;  %v1799_v29 = vand.u32 2147483647, %v3849_v38  ;;  %v1865_v39 = vadd.f32 0.112945676, %v1864_v7  ;;  %v1900_v25 = vmul.f32 3.8918573e-05, %v3902_v28 }
 0x203   : > { %v1792_v35 = vsub.f32 1.0, %v1791_v58  ;;  %v1801_v14 = vand.u32 2147483648, %v3849_v38  ;;  %2597 = vrcp.f32 %v3910_v60  ;;  %v1854_v2 = vadd.f32 0.05243302, %v1853_v59 }
 0x204   : > { %v3919_v31 = vadd.f32 %v3864_v56, %v1367_v0  ;;  %v3922_v55 = vmul.f32 %v1778_v41, %v3742_v33  ;;  %v1866_v49 = vmul.f32 %v1865_v39, %v3847_v40  ;;  %v1890_v20 = vadd.f32 0.00028619796, %v1889_v30 }
 0x205   : > { %v1793_v22 = vmul.f32 %v3890_v3, %v1792_v35  ;;  %vm1795_vm4 = vweird.f32 %v3849_v38  ;;  %v1817_v52 = vmul.f32 %v1816_v61, %v3808_v16  ;;  %v1901_v47 = vadd.f32 0.001143296, %v1900_v25  ;;  %v1370_v59 = vpop.f32.mrf.mxu2  ;;  %v528_v37 = vpop.f32.mrf.mxu1 }
 0x206   : > { %v2070_v33 = vmul.f32 %v2054_v17, %v3756_v62  ;;  %v1758_v4 = vsel %vm3930_vm3, %v3853_v27, %v1754_v54  ;;  %vm3940_vm5 = vcmp.eq.f32.partialorder %v1799_v29, 8.507059e+37  ;;  %v1867_v44 = vadd.f32 0.4994258, %v1866_v49 }
 0x207   : > { %v1891_v12 = vmul.f32 %v1890_v20, %v3902_v28  ;;  %v1802_v63 = vor.u32 1.1754944e-38, %v1801_v14  ;;  %v1855_v15 = vmul.f32 %v1854_v2, %v3847_v40  ;;  %v1902_v16 = vmul.f32 %v1901_v47, %v3902_v28 }
 0x208   : > { %v3950_v62 = vmul.f32 0.70710677, %v3919_v31  ;;  %v1794_v8 = vadd.f32 %v3890_v3, %v1793_v22  ;;  %vm1796_vm6 = vweird.f32 %v3890_v3  ;;  %v1868_v27 = vmul.f32 %v1867_v44, %v3847_v40 }
 0x209   : > { %v1892_v26 = vadd.f32 0.0036580483, %v1891_v12  ;;  %v3955_v19 = vpop.eup %2597  ;;  %v1763_v53 = vsel %vm3904_vm1, %v1762_v23, %v1758_v4  ;;  %v1818_v11 = vadd.f32 1.1283791, %v1817_v52  ;;  %v1903_v32 = vadd.f32 0.014752088, %v1902_v16  ;;  %vm3969_vm7 = vmor %vm1795_vm4, %vm1796_vm6 }
 0x20a   : > { %v1927_v50 = vmul.f32 %v3950_v62, %v3950_v62  ;;  %v1831_v1 = vmul.f32 %v3955_v19, %v3910_v60  ;;  %v1839_v58 = vand.u32 2147483647, %v3910_v60  ;;  %v3964_v21 = vadd.f32 1.0, %v1868_v27 }
 0x20b   : > { %v2086_v43 = vadd.f32 %v2070_v33, %v3874_v42  ;;  %v1856_v23 = vadd.f32 0.18741608, %v1855_v15  ;;  %v1893_v41 = vmul.f32 %v1892_v26, %v3902_v28  ;;  %v1904_v35 = vmul.f32 %v1903_v32, %v3902_v28 }
 0x20c   : > { %v3975_v7 = vmin.f32 %v1927_v50, 16.0  ;;  %v1764_v17 = vmul.f32 %v1763_v53, %v3877_v48  ;;  %v1798_v42 = vsel %vm3969_vm7, %v3890_v3, %v1794_v8  ;;  %v1832_v0 = vsub.f32 1.0, %v1831_v1 }
 0x20d   : > { %2599 = vrcp.f32 %v3964_v21  ;;  %v3983_v38 = vmul.f32 %v1818_v11, %v3785_v46  ;;  %vm1835_vm8 = vweird.f32 %v3910_v60  ;;  %v1841_v61 = vand.u32 2147483648, %v3910_v60 }
 0x20e   : > { %v3988_v30 = vadd.f32 %v3864_v56, %v1370_v59  ;;  %v1833_v54 = vmul.f32 %v3955_v19, %v1832_v0  ;;  %v1905_v48 = vadd.f32 0.112945676, %v1904_v35  ;;  %v1929_v29 = vmul.f32 2.1237322e-06, %v3975_v7 }
 0x20f   : > { %v1940_v3 = vmul.f32 3.8918573e-05, %v3975_v7  ;;  %v1803_v39 = vsel %vm3940_vm5, %v1802_v63, %v1798_v42  ;;  %vm3995_vm9 = vcmp.eq.f32.partialorder %v1839_v58, 8.507059e+37  ;;  %v1857_v25 = vmul.f32 %v1856_v23, %v3847_v40 }
 0x210   : > { %v1894_v14 = vadd.f32 0.05243302, %v1893_v41  ;;  %v1906_v2 = vmul.f32 %v1905_v48, %v3902_v28  ;;  %v1930_v22 = vadd.f32 0.00028619796, %v1929_v29  ;;  %v2453_v20 = vclamps-f32 %v1764_v17, 1.0 }
 0x211   : > { %v1941_v49 = vadd.f32 0.001143296, %v1940_v3  ;;  %v1834_v52 = vadd.f32 %v3955_v19, %v1833_v54  ;;  %vm1836_vm10 = vweird.f32 %v3955_v19  ;;  %v4004_v47 = vmul.f32 0.70710677, %v3988_v30  ;;  %v4049_v3 = vpop.f32.mrf.mxu1 }
 0x212   : > { %v2098_v33 = vpack.c.bf16 %v2086_v43, %v3900_v34  ;;  %v1804_v40 = vmul.f32 %v1803_v39, %v3922_v55  ;;  %v1907_v6 = vadd.f32 0.4994258, %v1906_v2  ;;  %v1931_v44 = vmul.f32 %v1930_v22, %v3975_v7  ;;  %vm4017_vm11 = vmor %vm1835_vm8, %vm1836_vm10 }
 0x213   : > { %v4007_v4 = vpop.eup %2599  ;;  %v1942_v12 = vmul.f32 %v1941_v49, %v3975_v7  ;;  %v1842_v63 = vor.u32 1.1754944e-38, %v1841_v61  ;;  %v1858_v15 = vadd.f32 1.1283791, %v1857_v25  ;;  %v1895_v8 = vmul.f32 %v1894_v14, %v3902_v28 }
 0x214   : > { %v1871_v16 = vmul.f32 %v4007_v4, %v3964_v21  ;;  %2194 = vmatmul.bf16.gmra.mxu3 %v2098_v33  ;;  %v1908_v55 = vmul.f32 %v1907_v6, %v3902_v28  ;;  %v1932_v27 = vadd.f32 0.0036580483, %v1931_v44  ;;  %v527_v53 = vadd.f32 %v3945_v36, %v3607_v51 }
 0x215   : > { %v1943_v26 = vadd.f32 0.014752088, %v1942_v12  ;;  %v1838_v11 = vsel %vm4017_vm11, %v3955_v19, %v1834_v52  ;;  %v2055_v50 = vadd.f32 1.0, %v2453_v20  ;;  %v1967_v60 = vmul.f32 %v4004_v47, %v4004_v47  ;;  %v1372_v19 = vpop.f32.mrf.mxu2 }
 0x216   : > { %v1872_v32 = vsub.f32 1.0, %v1871_v16  ;;  %v4029_v1 = vadd.f32 1.0, %v1908_v55  ;;  %v1933_v58 = vmul.f32 %v1932_v27, %v3975_v7  ;;  %v2454_v59 = vclamps-f32 %v1804_v40, 1.0 }
 0x217   : > { %v1944_v43 = vmul.f32 %v1943_v26, %v3975_v7  ;;  %v1859_v10 = vmul.f32 %v1858_v15, %v3820_v45  ;;  %v1896_v23 = vadd.f32 0.18741608, %v1895_v8  ;;  %v4035_v41 = vmin.f32 %v1967_v60, 16.0 }
 0x218   : > { %v1873_v36 = vmul.f32 %v4007_v4, %v1872_v32  ;;  %v1843_v35 = vsel %vm3995_vm9, %v1842_v63, %v1838_v11  ;;  %vm1875_vm12 = vweird.f32 %v3964_v21  ;;  %v1879_v17 = vand.u32 2147483647, %v3964_v21 }
 0x219   : > { %2601 = vrcp.f32 %v4029_v1  ;;  %vm1876_vm13 = vweird.f32 %v4007_v4  ;;  %v1945_v45 = vadd.f32 0.112945676, %v1944_v43  ;;  %v1969_v0 = vmul.f32 2.1237322e-06, %v4035_v41 }
 0x21a   : > { %v1874_v42 = vadd.f32 %v4007_v4, %v1873_v36  ;;  %v1934_v61 = vadd.f32 0.05243302, %v1933_v58  ;;  %v1980_v54 = vmul.f32 3.8918573e-05, %v4035_v41  ;;  %v2056_v48 = vadd.f32 1.0, %v2454_v59  ;;  %vm4057_vm14 = vmor %vm1875_vm12, %vm1876_vm13  ;;  %v533_v36 = vpop.f32.mrf.mxu1 }
 0x21b   : > { %v4047_v29 = vadd.f32 %v3864_v56, %v1372_v19  ;;  %v1881_v39 = vand.u32 2147483648, %v3964_v21  ;;  %v1897_v46 = vmul.f32 %v1896_v23, %v3902_v28  ;;  %v1946_v25 = vmul.f32 %v1945_v45, %v3975_v7 }
 0x21c   : > { %v2071_v14 = vmul.f32 %v2055_v50, %v3823_v18  ;;  %v1970_v22 = vadd.f32 0.00028619796, %v1969_v0  ;;  %v1981_v49 = vadd.f32 0.001143296, %v1980_v54  ;;  %v529_v56 = vadd.f32 %v528_v37, %v3607_v51 }
 0x21d   : > { %v2072_v20 = vmul.f32 %v2056_v48, %v3844_v9  ;;  %v1844_v52 = vmul.f32 %v1843_v35, %v3983_v38  ;;  %v1878_v28 = vsel %vm4057_vm14, %v4007_v4, %v1874_v42  ;;  %vm1880_vm15 = vcmp.eq.f32.partialorder %v1879_v17, 8.507059e+37 }
 0x21e   : > { %v1947_v18 = vadd.f32 0.4994258, %v1946_v25  ;;  %v1935_v21 = vmul.f32 %v1934_v61, %v3975_v7  ;;  %v1982_v40 = vmul.f32 %v1981_v49, %v4035_v41  ;;  %v4070_v44 = vmul.f32 0.70710677, %v4047_v29 }
 0x21f   : > { %v2602_v33 = vpop.eup %2601  ;;  %v2088_v6 = vadd.f32 %v2072_v20, %v529_v56  ;;  %v1882_v37 = vor.u32 1.1754944e-38, %v1881_v39  ;;  %v2087_v12 = vadd.f32 %v2071_v14, %v527_v53  ;;  %v1898_v63 = vadd.f32 1.1283791, %v1897_v46 }
 0x220   : > { %v1911_v9 = vmul.f32 %v2602_v33, %v4029_v1  ;;  %v1948_v38 = vmul.f32 %v1947_v18, %v3975_v7  ;;  %v1971_v4 = vmul.f32 %v1970_v22, %v4035_v41  ;;  %v1983_v15 = vadd.f32 0.014752088, %v1982_v40 }
 0x221   : > { %v2007_v16 = vmul.f32 %v4070_v44, %v4070_v44  ;;  %v1883_v8 = vsel %vm1880_vm15, %v1882_v37, %v1878_v28  ;;  %v2099_v27 = vpack.c.bf16 %v2088_v6, %v2087_v12  ;;  %v1936_v26 = vadd.f32 0.18741608, %v1935_v21 }
 0x222   : > { %v1912_v34 = vsub.f32 1.0, %v1911_v9  ;;  %v4077_v55 = vadd.f32 1.0, %v1948_v38  ;;  %v1984_v11 = vmul.f32 %v1983_v15, %v4035_v41  ;;  %v2455_v50 = vclamps-f32 %v1844_v52, 1.0 }
 0x223   : > { %v4080_v32 = vmin.f32 %v2007_v16, 16.0  ;;  %vm1915_vm0 = vweird.f32 %v4029_v1  ;;  %vm1916_vm1 = vweird.f32 %v2602_v33  ;;  %v1884_v53 = vmul.f32 %v1883_v8, %v1859_v10  ;;  %v536_v8 = vpop.f32.mrf.mxu1 }
 0x224   : > { %v1913_v60 = vmul.f32 %v2602_v33, %v1912_v34  ;;  %2603 = vrcp.f32 %v4077_v55  ;;  %2199 = vmatmul.bf16.gmra.mxu3 %v2099_v27  ;;  %v1919_v58 = vand.u32 2147483647, %v4029_v1  ;;  %v1921_v43 = vand.u32 2147483648, %v4029_v1  ;;  %vm4092_vm2 = vmor %vm1915_vm0, %vm1916_vm1 }
 0x225   : > { %v1972_v59 = vadd.f32 0.0036580483, %v1971_v4  ;;  %v1985_v19 = vadd.f32 0.112945676, %v1984_v11  ;;  %v2009_v35 = vmul.f32 2.1237322e-06, %v4080_v32  ;;  %v1899_v45 = vmul.f32 %v1898_v63, %v3884_v13 }
 0x226   : > { %v1914_v23 = vadd.f32 %v2602_v33, %v1913_v60  ;;  %v2020_v17 = vmul.f32 3.8918573e-05, %v4080_v32  ;;  %v1386_v42 = vmul.f32 0.5, %v3804_v5  ;;  %v1937_v0 = vmul.f32 %v1936_v26, %v3975_v7 }
 0x227   : > { %v2057_v61 = vadd.f32 1.0, %v2455_v50  ;;  %v1986_v48 = vmul.f32 %v1985_v19, %v4035_v41  ;;  %v2010_v39 = vadd.f32 0.00028619796, %v2009_v35  ;;  %vm1920_vm3 = vcmp.eq.f32.partialorder %v1919_v58, 8.507059e+37 }
 0x228   : > { %v1918_v54 = vsel %vm4092_vm2, %v2602_v33, %v1914_v23  ;;  %v2021_v46 = vadd.f32 0.001143296, %v2020_v17  ;;  %v1922_v5 = vor.u32 1.1754944e-38, %v1921_v43  ;;  %v1973_v13 = vmul.f32 %v1972_v59, %v4035_v41 }
 0x229   : > { %v2456_v25 = vclamps-f32 %v1884_v53, 1.0  ;;  %v1987_v14 = vadd.f32 0.4994258, %v1986_v48  ;;  %v2011_v2 = vmul.f32 %v2010_v39, %v4080_v32  ;;  %v532_v7 = vadd.f32 %v4049_v3, %v3607_v51 }
 0x22a   : > { %v2604_v1 = vpop.eup %2603  ;;  %v2022_v22 = vmul.f32 %v2021_v46, %v4080_v32  ;;  %v1923_v49 = vsel %vm1920_vm3, %v1922_v5, %v1918_v54  ;;  %v1938_v56 = vadd.f32 1.1283791, %v1937_v0  ;;  %v1961_v28 = vand.u32 2147483648, %v4077_v55  ;;  %v4128_v54 = vld [vmem:[%s4190_s6] ss:$0 sm:$0xff] }
 0x22b   : > { %v1951_v20 = vmul.f32 %v2604_v1, %v4077_v55  ;;  %v2058_v52 = vadd.f32 1.0, %v2456_v25  ;;  %v1988_v18 = vmul.f32 %v1987_v14, %v4035_v41  ;;  %v2073_v21 = vmul.f32 %v2057_v61, %v3870_v57 }
 0x22c   : > { %v2023_v33 = vadd.f32 0.014752088, %v2022_v22  ;;  %v1974_v6 = vadd.f32 0.05243302, %v1973_v13  ;;  %v534_v37 = vadd.f32 %v533_v36, %v3607_v51  ;;  %v1924_v38 = vmul.f32 %v1923_v49, %v1899_v45  ;;  %v538_v13 = vpop.f32.mrf.mxu1 }
 0x22d   : > { %v1952_v40 = vsub.f32 1.0, %v1951_v20  ;;  %v2074_v9 = vmul.f32 %v2058_v52, %v1386_v42  ;;  %v4110_v12 = vadd.f32 1.0, %v1988_v18  ;;  %v2012_v3 = vadd.f32 0.0036580483, %v2011_v2 }
 0x22e   : > { %v2024_v63 = vmul.f32 %v2023_v33, %v4080_v32  ;;  %vm1956_vm4 = vweird.f32 %v2604_v1  ;;  %v1959_v15 = vand.u32 2147483647, %v4077_v55  ;;  %v2089_v57 = vadd.f32 %v2073_v21, %v532_v7 }
 0x22f   : > { %v1953_v4 = vmul.f32 %v2604_v1, %v1952_v40  ;;  %v2090_v16 = vadd.f32 %v2074_v9, %v534_v37  ;;  %2605 = vrcp.f32 %v4110_v12  ;;  %vm1955_vm5 = vweird.f32 %v4077_v55 }
 0x230   : > { %v1975_v27 = vmul.f32 %v1974_v6, %v4035_v41  ;;  %v2025_v26 = vadd.f32 0.112945676, %v2024_v63  ;;  %vm1957_vm6 = vmor %vm1955_vm5, %vm1956_vm4  ;;  %v1962_v11 = vor.u32 1.1754944e-38, %v1961_v28  ;;  %v2013_v50 = vmul.f32 %v2012_v3, %v4080_v32 }
 0x231   : > { %v1954_v34 = vadd.f32 %v2604_v1, %v1953_v4  ;;  %v2457_v60 = vclamps-f32 %v1924_v38, 1.0  ;;  %v2100_v53 = vpack.c.bf16 %v2090_v16, %v2089_v57  ;;  %v1939_v58 = vmul.f32 %v1938_v56, %v3950_v62 }
 0x232   : > { %vm1960_vm7 = vcmp.eq.f32.partialorder %v1959_v15, 8.507059e+37  ;;  %v2026_v59 = vmul.f32 %v2025_v26, %v4080_v32  ;;  %v1976_v55 = vadd.f32 0.18741608, %v1975_v27  ;;  %v2014_v17 = vadd.f32 0.05243302, %v2013_v50 }
 0x233   : > { %v1958_v43 = vsel %vm1957_vm6, %v2604_v1, %v1954_v34  ;;  %v2059_v42 = vadd.f32 1.0, %v2457_v60  ;;  %v1387_v0 = vmul.f32 0.5, %v3867_v24  ;;  %v1388_v62 = vmul.f32 0.5, %v3919_v31  ;;  %v2180_v24 = vpop.f32.mrf.mxu3 }
 0x234   : > { %v1963_v36 = vsel %vm1960_vm7, %v1962_v11, %v1958_v43  ;;  %2204 = vmatmul.bf16.gmra.mxu3 %v2100_v53  ;;  %v2027_v19 = vadd.f32 0.4994258, %v2026_v59  ;;  %v1977_v48 = vmul.f32 %v1976_v55, %v4035_v41  ;;  %v537_v5 = vadd.f32 %v536_v8, %v3607_v51  ;;  %v541_v8 = vpop.f32.mrf.mxu1 }
 0x235   : > { %v1964_v23 = vmul.f32 %v1963_v36, %v1939_v58  ;;  %v2606_v35 = vpop.eup %2605  ;;  %v2015_v31 = vmul.f32 %v2014_v17, %v4080_v32  ;;  %v2075_v25 = vmul.f32 %v2059_v42, %v1387_v0  ;;  %v2181_v14 = vadd.f32 %v4128_v54, %v2180_v24 }
 0x236   : > { %v1991_v45 = vmul.f32 %v2606_v35, %v4110_v12  ;;  %v2028_v10 = vmul.f32 %v2027_v19, %v4080_v32  ;;  %vm1996_vm8 = vweird.f32 %v2606_v35  ;;  %v2001_v41 = vand.u32 2147483648, %v4110_v12 }
 0x237   : > { %v2458_v61 = vclamps-f32 %v1964_v23, 1.0  ;;  %v1999_v22 = vand.u32 2147483647, %v4110_v12  ;;  %v539_v7 = vadd.f32 %v538_v13, %v3607_v51  ;;  %2220 = vst [vmem:[%s4135_s11] sm:$0xff] %v2181_v14  ;;  %vm1995_vm9 = vweird.f32 %v4110_v12 }
 0x238   : > { %v1992_v39 = vsub.f32 1.0, %v1991_v45  ;;  %v2029_v46 = vadd.f32 1.0, %v2028_v10  ;;  %v1978_v20 = vadd.f32 1.1283791, %v1977_v48  ;;  %vm1997_vm10 = vmor %vm1995_vm9, %vm1996_vm8  ;;  %v2016_v52 = vadd.f32 0.18741608, %v2015_v31 }
 0x239   : > { %v2060_v1 = vadd.f32 1.0, %v2458_v61  ;;  %v2091_v28 = vadd.f32 %v2075_v25, %v537_v5  ;;  %v2002_v21 = vor.u32 1.1754944e-38, %v2001_v41  ;;  %vm2000_vm11 = vcmp.eq.f32.partialorder %v1999_v22, 8.507059e+37 }
 0x23a   : > { %v1993_v2 = vmul.f32 %v2606_v35, %v1992_v39  ;;  %2607 = vrcp.f32 %v2029_v46  ;;  %v1979_v38 = vmul.f32 %v1978_v20, %v4004_v47  ;;  %v2017_v3 = vmul.f32 %v2016_v52, %v4080_v32 }
 0x23b   : > { %v2076_v49 = vmul.f32 %v2060_v1, %v1388_v62  ;;  %v2182_v9 = vpop.f32.mrf.mxu3  ;;  %v2041_v16 = vand.u32 2147483648, %v2029_v46  ;;  %v2039_v27 = vand.u32 2147483647, %v2029_v46  ;;  %vm2035_vm13 = vweird.f32 %v2029_v46 }
 0x23c   : > { %v1994_v56 = vadd.f32 %v2606_v35, %v1993_v2  ;;  %v2183_v12 = vadd.f32 %v4128_v54, %v2182_v9  ;;  %v2018_v57 = vadd.f32 1.1283791, %v2017_v3  ;;  %v1389_v36 = vmul.f32 0.5, %v3988_v30  ;;  %v543_v55 = vpop.f32.mrf.mxu1 }
 0x23d   : > { %v2092_v18 = vadd.f32 %v2076_v49, %v539_v7  ;;  %v2042_v47 = vor.u32 1.1754944e-38, %v2041_v16  ;;  %vm2040_vm15 = vcmp.eq.f32.partialorder %v2039_v27, 8.507059e+37  ;;  %v1390_v19 = vmul.f32 0.5, %v4047_v29 }
 0x23e   : > { %v1998_v33 = vsel %vm1997_vm10, %v2606_v35, %v1994_v56  ;;  %2221 = vst [vmem:[%s4135_s11 + $0x8] sm:$0xff] %v2183_v12  ;;  %v2019_v32 = vmul.f32 %v2018_v57, %v4070_v44  ;;  %v542_v35 = vadd.f32 %v541_v8, %v3607_v51  ;;  %v544_v42 = vadd.f32 %v543_v55, %v3607_v51 }
 0x23f   : > { %v2101_v40 = vpack.c.bf16 %v2092_v18, %v2091_v28  ;;  %v2003_v37 = vsel %vm2000_vm11, %v2002_v21, %v1998_v33 }
 0x240   : > { %v2608_v6 = vpop.eup %2607  ;;  %v2004_v4 = vmul.f32 %v2003_v37, %v1979_v38 }
 0x241   : > { %v2031_v63 = vmul.f32 %v2608_v6, %v2029_v46  ;;  %vm2036_vm12 = vweird.f32 %v2608_v6 }
 0x242   : > { %v2459_v11 = vclamps-f32 %v2004_v4, 1.0  ;;  %vm2037_vm14 = vmor %vm2035_vm13, %vm2036_vm12 }
 0x243   : > { %v2032_v15 = vsub.f32 1.0, %v2031_v63 }
 0x244   : > { %2209 = vmatmul.bf16.gmra.mxu3 %v2101_v40  ;;  %v2061_v58 = vadd.f32 1.0, %v2459_v11 }
 0x245   : > { %v2033_v34 = vmul.f32 %v2608_v6, %v2032_v15 }
 0x246   : > { %v2077_v44 = vmul.f32 %v2061_v58, %v1389_v36 }
 0x247   : > { %v2034_v26 = vadd.f32 %v2608_v6, %v2033_v34 }
 0x248   : > { %v2093_v10 = vadd.f32 %v2077_v44, %v542_v35 }
 0x249   : > { %v2038_v50 = vsel %vm2037_vm14, %v2608_v6, %v2034_v26  ;;  %v2185_v43 = vpop.f32.mrf.mxu3 }
 0x24a   : > { %v2043_v60 = vsel %vm2040_vm15, %v2042_v47, %v2038_v50  ;;  %v2186_v59 = vadd.f32 %v4128_v54, %v2185_v43 }
 0x24b   : > { %v2044_v53 = vmul.f32 %v2043_v60, %v2019_v32 }
 0x24c   : > { %2222 = vst [vmem:[%s4135_s11 + $0x10] sm:$0xff] %v2186_v59 }
 0x24d   : > { %v2460_v23 = vclamps-f32 %v2044_v53, 1.0 }
 0x24f   : > { %v2062_v17 = vadd.f32 1.0, %v2460_v23 }
 0x251   : > { %v2078_v45 = vmul.f32 %v2062_v17, %v1390_v19  ;;  %v2187_v62 = vpop.f32.mrf.mxu3 }
 0x252   : > { %v2188_v30 = vadd.f32 %v4128_v54, %v2187_v62 }
 0x253   : > { %v2094_v0 = vadd.f32 %v2078_v45, %v544_v42 }
 0x254   : > { %2223 = vst [vmem:[%s4135_s11 + $0x18] sm:$0xff] %v2188_v30 }
 0x255   : > { %v2102_v61 = vpack.c.bf16 %v2094_v0, %v2093_v10 }
 0x257   : > { %2214 = vmatmul.bf16.gmra.mxu3 %v2102_v61 }
 0x26a   : > { %v2190_v29 = vpop.f32.mrf.mxu3 }
 0x26b   : > { %v2191_v48 = vadd.f32 %v4128_v54, %v2190_v29 }
 0x26d   : > { %2224 = vst [vmem:[%s4135_s11 + $0x20] sm:$0xff] %v2191_v48 }
 0x272   : > { %v2192_v39 = vpop.f32.mrf.mxu3 }
 0x273   : > { %v2193_v51 = vadd.f32 %v4128_v54, %v2192_v39 }
 0x275   : > { %2225 = vst [vmem:[%s4135_s11 + $0x28] sm:$0xff] %v2193_v51 }
 0x297   : > { %v2195_v46 = vpop.f32.mrf.mxu3 }
 0x298   : > { %v2196_v5 = vadd.f32 %v4128_v54, %v2195_v46 }
 0x29a   : > { %2226 = vst [vmem:[%s4135_s11 + $0x30] sm:$0xff] %v2196_v5 }
 0x29f   : > { %v2197_v13 = vpop.f32.mrf.mxu3 }
 0x2a0   : > { %v2198_v24 = vadd.f32 %v4128_v54, %v2197_v13 }
 0x2a2   : > { %2227 = vst [vmem:[%s4135_s11 + $0x38] sm:$0xff] %v2198_v24 }
 0x2a7   : > { %v2200_v31 = vpop.f32.mrf.mxu3 }
 0x2a8   : > { %v2201_v25 = vadd.f32 %v4128_v54, %v2200_v31 }
 0x2aa   : > { %2228 = vst [vmem:[%s4135_s11 + $0x40] sm:$0xff] %v2201_v25 }
 0x2af   : > { %v2202_v1 = vpop.f32.mrf.mxu3 }
 0x2b0   : > { %v2203_v14 = vadd.f32 %v4128_v54, %v2202_v1 }
 0x2b2   : > { %2229 = vst [vmem:[%s4135_s11 + $0x48] sm:$0xff] %v2203_v14 }
 0x2b7   : > { %v2205_v2 = vpop.f32.mrf.mxu3 }
 0x2b8   : > { %v2206_v41 = vadd.f32 %v4128_v54, %v2205_v2 }
 0x2ba   : > { %2230 = vst [vmem:[%s4135_s11 + $0x50] sm:$0xff] %v2206_v41 }
 0x2bf   : > { %v2207_v22 = vpop.f32.mrf.mxu3 }
 0x2c0   : > { %v2208_v7 = vadd.f32 %v4128_v54, %v2207_v22 }
 0x2c2   : > { %2231 = vst [vmem:[%s4135_s11 + $0x58] sm:$0xff] %v2208_v7 }
 0x2c7   : > { %v2210_v49 = vpop.f32.mrf.mxu3 }
 0x2c8   : > { %v2211_v56 = vadd.f32 %v4128_v54, %v2210_v49 }
 0x2ca   : > { %2232 = vst [vmem:[%s4135_s11 + $0x60] sm:$0xff] %v2211_v56 }
 0x2cf   : > { %v2212_v20 = vpop.f32.mrf.mxu3 }
 0x2d0   : > { %v2213_v52 = vadd.f32 %v4128_v54, %v2212_v20 }
 0x2d2   : > { %2233 = vst [vmem:[%s4135_s11 + $0x68] sm:$0xff] %v2213_v52 }
 0x2da   : > { %v2215_v28 = vpop.f32.mrf.mxu3 }
 0x2db   : > { %v2216_v18 = vadd.f32 %v4128_v54, %v2215_v28 }
 0x2dd   : > { %2234 = vst [vmem:[%s4135_s11 + $0x70] sm:$0xff] %v2216_v18 }
 0x2e2   : > { %v2217_v33 = vpop.f32.mrf.mxu3 }
 0x2e3   : > { %v2218_v21 = vadd.f32 %v4128_v54, %v2217_v33 }
 0x2e5   : > { %2235 = vst [vmem:[%s4135_s11 + $0x78] sm:$0xff] %v2218_v21 }
 0x2e6 PF: > { %s17_s24 = sadd.s32 1, %s2624_s24  }
 0x2e7   : > { %p14_p4 = scmp.ge.s32.totalorder %s17_s24, 6  }
 0x2e9   :  { %16 = sbr.rel (!%p14_p4) target bundleno = 1 (0x1), region = 78 }

// kernel: _mlp_pallas.1
= control target key start
LH: loop header
LB: loop body
LE: loop exit
PB: predicated region body
PF: predicated region fallthrough
CT: control target
= control target key end

     0   :  { %s2666_s24 = smov 0   ;;  %s4184_s0 = inlined_call_operand.vmem [shape: bf16[512,128], index: 0, kind: input, shape index: {}]   ;;  %s4185_s1 = inlined_call_operand.vmem [shape: bf16[128,256], index: 1, kind: input, shape index: {}]   ;;  %s4186_s2 = inlined_call_operand.vmem [shape: f32[1,256], index: 2, kind: input, shape index: {}]   ;;  %s4187_s3 = inlined_call_operand.vmem [shape: bf16[128,128], index: 3, kind: input, shape index: {}]   ;;  %s4188_s4 = inlined_call_operand.vmem [shape: f32[1,128], index: 4, kind: input, shape index: {}]   ;;  %s4189_s5 = inlined_call_operand.vmem [shape: bf16[128,128], index: 5, kind: input, shape index: {}]   ;;  %s4190_s6 = inlined_call_operand.vmem [shape: f32[1,128], index: 6, kind: input, shape index: {}]   ;;  %s4191_s7 = inlined_call_operand.vmem [shape: f32[512,128], index: 7, kind: output, shape index: {}]  }
   0x1 LB: > { %s2292_s25 = sadd.s32 4294967295, %s2624_s24   ;;  %p2296_p0 = scmp.ge.s32.totalorder %s2624_s24, 1  ;;  %s2624_s24 = sphi %s2666_s24, %s17_s24  }
   0x2   : > { %p238_p1 = scmp.lt.s32.totalorder %s2624_s24, 5 }
   0x4   : > { %p239_p2 = pnand %p2296_p0, %p238_p1 }
   0x5   : > { %s2297_s23 = sshll.u32 (!%p239_p2), %s2292_s25, 4 }
   0x6   : > { %242 = sbr.rel (%p239_p2) target bundleno = 742 (0x2e6), region = 48  ;;  %p271_p3 = scmp.lt.s32.totalorder (!%p239_p2), %s2297_s23, 63 }
   0xb   : > { %v2391_v0 = vld [vmem:[%s4185_s1 + $0x70] sm:$0xf]  ;;  %v2518_v1 = vld [vmem:[%s4185_s1 + $0x74] sm:$0xf0]  ;;  %v2383_v2 = vld [vmem:[%s4185_s1 + $0x60] sm:$0xf] }
   0xc   : > { %v2392_v3 = vor.u32 %v2518_v1, %v2391_v0  ;;  %v2516_v4 = vld [vmem:[%s4185_s1 + $0x64] sm:$0xf0]  ;;  %v2375_v6 = vld [vmem:[%s4185_s1 + $0x50] sm:$0xf]  ;;  %v2514_v7 = vld [vmem:[%s4185_s1 + $0x54] sm:$0xf0] }
   0xd   : > { %v2384_v5 = vor.u32 %v2516_v4, %v2383_v2  ;;  %v2376_v8 = vor.u32 %v2514_v7, %v2375_v6  ;;  %v2367_v9 = vld [vmem:[%s4185_s1 + $0x40] sm:$0xf]  ;;  %v2512_v10 = vld [vmem:[%s4185_s1 + $0x44] sm:$0xf0]  ;;  %v2359_v12 = vld [vmem:[%s4185_s1 + $0x30] sm:$0xf] }
   0xe   : > { %448 = vmatpush.bf16.msra.mxu0 %v2392_v3  ;;  %v2368_v11 = vor.u32 %v2512_v10, %v2367_v9  ;;  %v2510_v13 = vld [vmem:[%s4185_s1 + $0x34] sm:$0xf0]  ;;  %v2351_v15 = vld [vmem:[%s4185_s1 + $0x20] sm:$0xf]  ;;  %v2508_v16 = vld [vmem:[%s4185_s1 + $0x24] sm:$0xf0] }
   0xf   : > { %v2360_v14 = vor.u32 %v2510_v13, %v2359_v12  ;;  %v2352_v17 = vor.u32 %v2508_v16, %v2351_v15  ;;  %v2343_v18 = vld [vmem:[%s4185_s1 + $0x10] sm:$0xf]  ;;  %v2506_v19 = vld [vmem:[%s4185_s1 + $0x14] sm:$0xf0]  ;;  %s4239_s23 = smov (!%p271_p3, %s2297_s23), 63  ;;  %v2524_v42 = vld [vmem:[%s4187_s3 + $0x28] sm:$0xff] }
  0x10   : > { %v2344_v20 = vor.u32 %v2506_v19, %v2343_v18  ;;  %v2335_v21 = vld [vmem:[%s4185_s1] sm:$0xf]  ;;  %v2504_v22 = vld [vmem:[%s4185_s1 + $0x4] sm:$0xf0]  ;;  %s2298_s14 = sshll.u32 %s4239_s23, 2  ;;  %v2526_v35 = vld [vmem:[%s4187_s3 + $0x38] sm:$0xff] }
  0x11   : > { %v2336_v23 = vor.u32 %v2504_v22, %v2335_v21  ;;  %s2728_s17 = scalar_lea.vmem %s4184_s0, %s2298_s14  ;;  %v314_v32 = vld [vmem:[%s4186_s2] sm:$0x3]  ;;  %1326 = vmatpush.bf16.msra.mxu2 %v2526_v35  ;;  %v2525_v38 = vld [vmem:[%s4187_s3 + $0x30] sm:$0xff]  ;;  %v2522_v55 = vld [vmem:[%s4187_s3 + $0x18] sm:$0xff]  ;;  %s2300_s9 = sshll.u32 %s4239_s23, 3 }
  0x12   : > { %449 = vmatpush.bf16.msra.mxu0 %v2384_v5  ;;  %v2731_v24 = vld [vmem:[%s2728_s17] sm:$0xff]  ;;  %v2496_v25 = vld [vmem:[%s2728_s17 + $0x8] sm:$0xff]  ;;  %v2497_v26 = vld [vmem:[%s2728_s17 + $0x10] sm:$0xff]  ;;  %v2744_v33 = vperm.slane %v314_v32, 0  ;;  %s4135_s11 = scalar_lea.vmem %s4191_s7, %s2300_s9 }
  0x13   : > { %v2498_v27 = vld [vmem:[%s2728_s17 + $0x18] sm:$0xff]  ;;  %v2499_v28 = vld [vmem:[%s2728_s17 + $0x20] sm:$0xff]  ;;  %v2500_v29 = vld [vmem:[%s2728_s17 + $0x28] sm:$0xff] }
  0x14   : > { %v2501_v30 = vld [vmem:[%s2728_s17 + $0x30] sm:$0xff]  ;;  %v2502_v31 = vld [vmem:[%s2728_s17 + $0x38] sm:$0xff]  ;;  %v2523_v48 = vld [vmem:[%s4187_s3 + $0x20] sm:$0xff] }
  0x15   : > { %1327 = vmatpush.bf16.msra.mxu2 %v2525_v38  ;;  %v2521_v0 = vld [vmem:[%s4187_s3 + $0x10] sm:$0xff]  ;;  %v2520_v10 = vld [vmem:[%s4187_s3 + $0x8] sm:$0xff] }
  0x16   : > { %450 = vmatpush.bf16.msra.mxu0 %v2376_v8 }
  0x19   : > { %1328 = vmatpush.bf16.msra.mxu2 %v2524_v42 }
  0x1a   : > { %451 = vmatpush.bf16.msra.mxu0 %v2368_v11 }
  0x1d   : > { %1329 = vmatpush.bf16.msra.mxu2 %v2523_v48 }
  0x1e   : > { %452 = vmatpush.bf16.msra.mxu0 %v2360_v14 }
  0x21   : > { %1330 = vmatpush.bf16.msra.mxu2 %v2522_v55 }
  0x22   : > { %453 = vmatpush.bf16.msra.mxu0 %v2352_v17 }
  0x25   : > { %1331 = vmatpush.bf16.msra.mxu2 %v2521_v0 }
  0x26   : > { %454 = vmatpush.bf16.msra.mxu0 %v2344_v20  ;;  %v2519_v20 = vld [vmem:[%s4187_s3] sm:$0xff] }
  0x29   : > { %1332 = vmatpush.bf16.msra.mxu2 %v2520_v10 }
  0x2a   : > { %455 = vmatpush.bf16.msra.mxu0 %v2336_v23 }
  0x2d   : > { %456 = vmatmul.bf16.vlgmr.msra.gmra.mxu0 %v2731_v24  ;;  %1333 = vmatpush.bf16.msra.mxu2 %v2519_v20 }
  0x3d   : > { %461 = vmatmul.bf16.gmra.mxu0 %v2496_v25 }
  0x4d   : > { %466 = vmatmul.bf16.gmra.mxu0 %v2497_v26 }
  0x5d   : > { %471 = vmatmul.bf16.gmra.mxu0 %v2498_v27 }
  0x6d   : > { %476 = vmatmul.bf16.gmra.mxu0 %v2499_v28 }
  0x7d   : > { %481 = vmatmul.bf16.gmra.mxu0 %v2500_v29 }
  0x8d   : > { %486 = vmatmul.bf16.gmra.mxu0 %v2501_v30 }
  0x9d   : > { %491 = vmatmul.bf16.gmra.mxu0 %v2502_v31 }
  0xaa   : > { %v457_v34 = vpop.f32.mrf.mxu0 }
  0xab   : > { %v2750_v36 = vadd.f32 %v457_v34, %v2744_v33 }
  0xad   : > { %v2753_v37 = vmul.f32 0.70710677, %v2750_v36 }
  0xaf   : > { %v578_v39 = vmul.f32 %v2753_v37, %v2753_v37 }
  0xb1   : > { %v2760_v40 = vmin.f32 %v578_v39, 16.0 }
  0xb2   : > { %v459_v41 = vpop.f32.mrf.mxu0 }
  0xb3   : > { %v580_v43 = vmul.f32 2.1237322e-06, %v2760_v40  ;;  %v2767_v44 = vadd.f32 %v459_v41, %v2744_v33  ;;  %v591_v45 = vmul.f32 3.8918573e-05, %v2760_v40 }
  0xb5   : > { %v581_v46 = vadd.f32 0.00028619796, %v580_v43  ;;  %v2771_v47 = vmul.f32 0.70710677, %v2767_v44  ;;  %v592_v49 = vadd.f32 0.001143296, %v591_v45 }
  0xb7   : > { %v618_v50 = vmul.f32 %v2771_v47, %v2771_v47  ;;  %v593_v51 = vmul.f32 %v592_v49, %v2760_v40  ;;  %v582_v52 = vmul.f32 %v581_v46, %v2760_v40 }
  0xb9   : > { %v2780_v53 = vmin.f32 %v618_v50, 16.0  ;;  %v594_v56 = vadd.f32 0.014752088, %v593_v51  ;;  %v583_v61 = vadd.f32 0.0036580483, %v582_v52 }
  0xba   : > { %v462_v54 = vpop.f32.mrf.mxu0 }
  0xbb   : > { %v620_v57 = vmul.f32 2.1237322e-06, %v2780_v53  ;;  %v2787_v58 = vadd.f32 %v462_v54, %v2744_v33  ;;  %v631_v59 = vmul.f32 3.8918573e-05, %v2780_v53  ;;  %v595_v60 = vmul.f32 %v594_v56, %v2760_v40 }
  0xbc   : > { %v584_v7 = vmul.f32 %v583_v61, %v2760_v40 }
  0xbd   : > { %v621_v62 = vadd.f32 0.00028619796, %v620_v57  ;;  %v2792_v63 = vmul.f32 0.70710677, %v2787_v58  ;;  %v596_v1 = vadd.f32 0.112945676, %v595_v60 }
  0xbe   : > { %v632_v3 = vadd.f32 0.001143296, %v631_v59  ;;  %v585_v18 = vadd.f32 0.05243302, %v584_v7 }
  0xbf   : > { %v622_v2 = vmul.f32 %v621_v62, %v2780_v53  ;;  %v658_v4 = vmul.f32 %v2792_v63, %v2792_v63  ;;  %v597_v5 = vmul.f32 %v596_v1, %v2760_v40 }
  0xc0   : > { %v633_v6 = vmul.f32 %v632_v3, %v2780_v53  ;;  %v586_v28 = vmul.f32 %v585_v18, %v2760_v40 }
  0xc1   : > { %v2803_v8 = vmin.f32 %v658_v4, 16.0  ;;  %v598_v11 = vadd.f32 0.4994258, %v597_v5  ;;  %v623_v12 = vadd.f32 0.0036580483, %v622_v2 }
  0xc2   : > { %v464_v9 = vpop.f32.mrf.mxu0  ;;  %v634_v14 = vadd.f32 0.014752088, %v633_v6  ;;  %v587_v45 = vadd.f32 0.18741608, %v586_v28 }
  0xc3   : > { %v2809_v13 = vadd.f32 %v464_v9, %v2744_v33  ;;  %v599_v15 = vmul.f32 %v598_v11, %v2760_v40  ;;  %v671_v16 = vmul.f32 3.8918573e-05, %v2803_v8  ;;  %v624_v22 = vmul.f32 %v623_v12, %v2780_v53 }
  0xc4   : > { %v635_v17 = vmul.f32 %v634_v14, %v2780_v53  ;;  %v660_v34 = vmul.f32 2.1237322e-06, %v2803_v8  ;;  %v588_v59 = vmul.f32 %v587_v45, %v2760_v40 }
  0xc5   : > { %v2815_v19 = vmul.f32 0.70710677, %v2809_v13  ;;  %v600_v21 = vadd.f32 1.0, %v599_v15  ;;  %v672_v25 = vadd.f32 0.001143296, %v671_v16 }
  0xc6   : > { %v636_v23 = vadd.f32 0.112945676, %v635_v17  ;;  %v625_v32 = vadd.f32 0.05243302, %v624_v22  ;;  %v661_v50 = vadd.f32 0.00028619796, %v660_v34 }
  0xc7   : > { %v698_v26 = vmul.f32 %v2815_v19, %v2815_v19  ;;  %2545 = vrcp.f32 %v600_v21  ;;  %v673_v31 = vmul.f32 %v672_v25, %v2803_v8  ;;  %v612_v7 = vand.u32 2147483648, %v600_v21 }
  0xc8   : > { %v637_v27 = vmul.f32 %v636_v23, %v2780_v53  ;;  %v626_v49 = vmul.f32 %v625_v32, %v2780_v53  ;;  %v662_v62 = vmul.f32 %v661_v50, %v2803_v8  ;;  %vm606_vm1 = vweird.f32 %v600_v21 }
  0xc9   : > { %v2825_v29 = vmin.f32 %v698_v26, 16.0  ;;  %v674_v41 = vadd.f32 0.014752088, %v673_v31  ;;  %v610_v9 = vand.u32 2147483647, %v600_v21  ;;  %v613_v23 = vor.u32 1.1754944e-38, %v612_v7 }
  0xca   : > { %v467_v30 = vpop.f32.mrf.mxu0  ;;  %v638_v39 = vadd.f32 0.4994258, %v637_v27  ;;  %v627_v61 = vadd.f32 0.18741608, %v626_v49  ;;  %v589_v10 = vadd.f32 1.1283791, %v588_v59 }
  0xcb   : > { %v2830_v35 = vadd.f32 %v467_v30, %v2744_v33  ;;  %v700_v38 = vmul.f32 2.1237322e-06, %v2825_v29  ;;  %v675_v48 = vmul.f32 %v674_v41, %v2803_v8  ;;  %v711_v4 = vmul.f32 3.8918573e-05, %v2825_v29 }
  0xcc   : > { %v639_v46 = vmul.f32 %v638_v39, %v2780_v53  ;;  %v628_v11 = vmul.f32 %v627_v61, %v2780_v53  ;;  %v663_v12 = vadd.f32 0.0036580483, %v662_v62  ;;  %vm611_vm3 = vcmp.eq.f32.partialorder %v610_v9, 8.507059e+37 }
  0xcd   : > { %v2834_v42 = vmul.f32 0.70710677, %v2830_v35  ;;  %v2546_v43 = vpop.eup %2545  ;;  %v701_v52 = vadd.f32 0.00028619796, %v700_v38  ;;  %v676_v55 = vadd.f32 0.112945676, %v675_v48  ;;  %v590_v28 = vmul.f32 %v589_v10, %v2753_v37 }
  0xce   : > { %v602_v51 = vmul.f32 %v2546_v43, %v600_v21  ;;  %v2839_v54 = vadd.f32 1.0, %v639_v46  ;;  %vm607_vm0 = vweird.f32 %v2546_v43  ;;  %v712_v20 = vadd.f32 0.001143296, %v711_v4 }
  0xcf   : > { %v738_v56 = vmul.f32 %v2834_v42, %v2834_v42  ;;  %v702_v2 = vmul.f32 %v701_v52, %v2825_v29  ;;  %v677_v3 = vmul.f32 %v676_v55, %v2803_v8  ;;  %vm2858_vm2 = vmor %vm606_vm1, %vm607_vm0  ;;  %v629_v30 = vadd.f32 1.1283791, %v628_v11 }
  0xd0   : > { %v603_v57 = vsub.f32 1.0, %v602_v51  ;;  %2547 = vrcp.f32 %v2839_v54  ;;  %v713_v27 = vmul.f32 %v712_v20, %v2825_v29  ;;  %v664_v31 = vmul.f32 %v663_v12, %v2803_v8 }
  0xd1   : > { %v2852_v5 = vmin.f32 %v738_v56, 16.0  ;;  %v678_v15 = vadd.f32 0.4994258, %v677_v3  ;;  %v703_v17 = vadd.f32 0.0036580483, %v702_v2  ;;  %v652_v46 = vand.u32 2147483648, %v2839_v54 }
  0xd2   : > { %v469_v60 = vpop.f32.mrf.mxu0  ;;  %v604_v1 = vmul.f32 %v2546_v43, %v603_v57  ;;  %v650_v39 = vand.u32 2147483647, %v2839_v54  ;;  %v714_v48 = vadd.f32 0.014752088, %v713_v27  ;;  %v665_v37 = vadd.f32 0.05243302, %v664_v31 }
  0xd3   : > { %v2847_v0 = vadd.f32 %v469_v60, %v2744_v33  ;;  %v740_v22 = vmul.f32 2.1237322e-06, %v2852_v5  ;;  %v679_v26 = vmul.f32 %v678_v15, %v2803_v8  ;;  %v704_v34 = vmul.f32 %v703_v17, %v2825_v29 }
  0xd4   : > { %v605_v6 = vadd.f32 %v2546_v43, %v604_v1  ;;  %v630_v51 = vmul.f32 %v629_v30, %v2771_v47  ;;  %vm646_vm5 = vweird.f32 %v2839_v54  ;;  %v653_v59 = vor.u32 1.1754944e-38, %v652_v46  ;;  %v2517_v46 = vld [vmem:[%s4185_s1 + $0x74] sm:$0xf] }
  0xd5   : > { %v2855_v40 = vmul.f32 0.70710677, %v2847_v0  ;;  %v2874_v41 = vadd.f32 1.0, %v679_v26  ;;  %v705_v52 = vadd.f32 0.05243302, %v704_v34  ;;  %v715_v60 = vmul.f32 %v714_v48, %v2825_v29 }
  0xd6   : > { %v2548_v16 = vpop.eup %2547  ;;  %v609_v18 = vsel %vm2858_vm2, %v2546_v43, %v605_v6  ;;  %v741_v43 = vadd.f32 0.00028619796, %v740_v22  ;;  %vm651_vm7 = vcmp.eq.f32.partialorder %v650_v39, 8.507059e+37  ;;  %v666_v47 = vmul.f32 %v665_v37, %v2803_v8  ;;  %v2393_v48 = vld [vmem:[%s4185_s1 + $0x78] sm:$0xf0] }
  0xd7   : > { %v778_v21 = vmul.f32 %v2855_v40, %v2855_v40  ;;  %v642_v53 = vmul.f32 %v2548_v16, %v2839_v54  ;;  %v614_v32 = vsel %vm611_vm3, %v613_v23, %v609_v18  ;;  %vm647_vm4 = vweird.f32 %v2548_v16 }
  0xd8   : > { %v615_v49 = vmul.f32 %v614_v32, %v590_v28  ;;  %2549 = vrcp.f32 %v2874_v41  ;;  %v742_v56 = vmul.f32 %v741_v43, %v2852_v5  ;;  %vm648_vm6 = vmor %vm646_vm5, %vm647_vm4  ;;  %v716_v7 = vadd.f32 0.112945676, %v715_v60 }
  0xd9   : > { %v643_v38 = vsub.f32 1.0, %v642_v53  ;;  %v2876_v45 = vmin.f32 %v778_v21, 16.0  ;;  %v751_v9 = vmul.f32 3.8918573e-05, %v2852_v5  ;;  %v706_v10 = vmul.f32 %v705_v52, %v2825_v29 }
  0xda   : > { %v472_v25 = vpop.f32.mrf.mxu0  ;;  %v2397_v1 = vclamps-f32 %v615_v49, 1.0  ;;  %v743_v11 = vadd.f32 0.0036580483, %v742_v56  ;;  %v546_v18 = vmul.f32 0.5, %v2750_v36  ;;  %v667_v20 = vadd.f32 0.18741608, %v666_v47 }
  0xdb   : > { %v644_v50 = vmul.f32 %v2548_v16, %v643_v38  ;;  %v780_v57 = vmul.f32 2.1237322e-06, %v2876_v45  ;;  %v2886_v61 = vadd.f32 %v472_v25, %v2744_v33  ;;  %v717_v21 = vmul.f32 %v716_v7, %v2825_v29 }
  0xdc   : > { %v1218_v17 = vadd.f32 1.0, %v2397_v1  ;;  %v547_v23 = vmul.f32 0.5, %v2767_v44  ;;  %v752_v26 = vadd.f32 0.001143296, %v751_v9  ;;  %v707_v27 = vadd.f32 0.18741608, %v706_v10 }
  0xdd   : > { %v645_v55 = vadd.f32 %v2548_v16, %v644_v50  ;;  %v781_v12 = vadd.f32 0.00028619796, %v780_v57  ;;  %v2899_v15 = vmul.f32 0.70710677, %v2886_v61  ;;  %v744_v28 = vmul.f32 %v743_v11, %v2852_v5 }
  0xde   : > { %v2889_v4 = vpop.eup %2549  ;;  %v718_v31 = vadd.f32 0.4994258, %v717_v21  ;;  %v1234_v34 = vmul.f32 %v1218_v17, %v546_v18  ;;  %v753_v49 = vmul.f32 %v752_v26, %v2852_v5  ;;  %v668_v52 = vmul.f32 %v667_v20, %v2803_v8  ;;  %v2515_v8 = vld [vmem:[%s4185_s1 + $0x64] sm:$0xf]  ;;  %v2513_v21 = vld [vmem:[%s4185_s1 + $0x54] sm:$0xf] }
  0xdf   : > { %v649_v2 = vsel %vm648_vm6, %v2548_v16, %v645_v55  ;;  %v682_v14 = vmul.f32 %v2889_v4, %v2874_v41  ;;  %v782_v30 = vmul.f32 %v781_v12, %v2876_v45  ;;  %v818_v36 = vmul.f32 %v2899_v15, %v2899_v15 }
  0xe0   : > { %v654_v3 = vsel %vm651_vm7, %v653_v59, %v649_v2  ;;  %v719_v43 = vmul.f32 %v718_v31, %v2825_v29  ;;  %v708_v55 = vmul.f32 %v707_v27, %v2825_v29  ;;  %v745_v56 = vadd.f32 0.05243302, %v744_v28  ;;  %v2385_v29 = vld [vmem:[%s4185_s1 + $0x68] sm:$0xf0] }
  0xe1   : > { %v655_v6 = vmul.f32 %v654_v3, %v630_v51  ;;  %v683_v22 = vsub.f32 1.0, %v682_v14  ;;  %v2396_v51 = vor.u32 %v2517_v46, %v2393_v48  ;;  %v783_v57 = vadd.f32 0.0036580483, %v782_v30  ;;  %v2511_v48 = vld [vmem:[%s4185_s1 + $0x44] sm:$0xf] }
  0xe2   : > { %v474_v62 = vpop.f32.mrf.mxu0  ;;  %v2927_v59 = vmin.f32 %v818_v36, 16.0  ;;  %v2933_v1 = vadd.f32 1.0, %v719_v43  ;;  %vm687_vm8 = vweird.f32 %v2889_v4  ;;  %v754_v47 = vadd.f32 0.014752088, %v753_v49  ;;  %v2369_v49 = vld [vmem:[%s4185_s1 + $0x48] sm:$0xf0] }
  0xe3   : > { %v2892_v54 = vadd.f32 %v474_v62, %v2744_v33  ;;  %v2398_v16 = vclamps-f32 %v655_v6, 1.0  ;;  %v684_v44 = vmul.f32 %v2889_v4, %v683_v22  ;;  %v692_v62 = vand.u32 2147483648, %v2874_v41  ;;  %497 = vmatpush.bf16.msra.mxu1 %v2396_v51 }
  0xe4   : > { %v2944_v3 = vmul.f32 0.5, %v2787_v58  ;;  %v2947_v6 = vmul.f32 0.5, %v2809_v13  ;;  %2551 = vrcp.f32 %v2933_v1  ;;  %v669_v9 = vadd.f32 1.1283791, %v668_v52 }
  0xe5   : > { %v2905_v53 = vmul.f32 0.70710677, %v2892_v54  ;;  %v1219_v25 = vadd.f32 1.0, %v2398_v16  ;;  %v685_v2 = vadd.f32 %v2889_v4, %v684_v44  ;;  %v746_v10 = vmul.f32 %v745_v56, %v2852_v5 }
  0xe6   : > { %vm686_vm9 = vweird.f32 %v2874_v41  ;;  %v690_v11 = vand.u32 2147483647, %v2874_v41  ;;  %v709_v12 = vadd.f32 1.1283791, %v708_v55  ;;  %v784_v14 = vmul.f32 %v783_v57, %v2876_v45 }
  0xe7   : > { %v1235_v38 = vmul.f32 %v1219_v25, %v547_v23  ;;  %v858_v50 = vmul.f32 %v2905_v53, %v2905_v53  ;;  %vm2958_vm10 = vmor %vm686_vm9, %vm687_vm8  ;;  %v2388_v13 = vor.u32 %v2515_v8, %v2385_v29  ;;  %v755_v17 = vmul.f32 %v754_v47, %v2852_v5  ;;  %v2377_v25 = vld [vmem:[%s4185_s1 + $0x58] sm:$0xf0] }
  0xe8   : > { %v820_v18 = vmul.f32 2.1237322e-06, %v2927_v59  ;;  %v689_v41 = vsel %vm2958_vm10, %v2889_v4, %v685_v2  ;;  %v693_v22 = vor.u32 1.1754944e-38, %v692_v62  ;;  %v747_v27 = vadd.f32 0.18741608, %v746_v10 }
  0xe9   : > { %v1250_v37 = vpack.c.bf16 %v1235_v38, %v1234_v34  ;;  %v2949_v7 = vmin.f32 %v858_v50, 16.0  ;;  %498 = vmatpush.bf16.msra.mxu1 %v2388_v13  ;;  %v756_v26 = vadd.f32 0.112945676, %v755_v17  ;;  %vm691_vm11 = vcmp.eq.f32.partialorder %v690_v11, 8.507059e+37 }
  0xea   : > { %v477_v32 = vpop.f32.mrf.mxu0  ;;  %v2380_v30 = vor.u32 %v2513_v21, %v2377_v25  ;;  %v2552_v4 = vpop.eup %2551  ;;  %v785_v31 = vadd.f32 0.05243302, %v784_v14  ;;  %v694_v36 = vsel %vm691_vm11, %v693_v22, %v689_v41  ;;  %v791_v34 = vmul.f32 3.8918573e-05, %v2876_v45 }
  0xeb   : > { %v2912_v39 = vadd.f32 %v477_v32, %v2744_v33  ;;  %1334 = vmatmul.bf16.vlgmr.msra.gmra.mxu2 %v1250_v37  ;;  %v860_v23 = vmul.f32 2.1237322e-06, %v2949_v7  ;;  %v757_v32 = vmul.f32 %v756_v26, %v2852_v5  ;;  %v670_v38 = vmul.f32 %v669_v9, %v2792_v63 }
  0xec   : > { %v2983_v44 = vmul.f32 0.5, %v2830_v35  ;;  %v722_v46 = vmul.f32 %v2552_v4, %v2933_v1  ;;  %v821_v50 = vadd.f32 0.00028619796, %v820_v18  ;;  %v2372_v51 = vor.u32 %v2511_v48, %v2369_v49 }
  0xed   : > { %v2930_v60 = vmul.f32 0.70710677, %v2912_v39  ;;  %v861_v37 = vadd.f32 0.00028619796, %v860_v23  ;;  %499 = vmatpush.bf16.msra.mxu1 %v2380_v30  ;;  %v758_v63 = vadd.f32 0.4994258, %v757_v32  ;;  %v695_v52 = vmul.f32 %v694_v36, %v670_v38 }
  0xee   : > { %v723_v55 = vsub.f32 1.0, %v722_v46  ;;  %v732_v56 = vand.u32 2147483648, %v2933_v1  ;;  %v730_v62 = vand.u32 2147483647, %v2933_v1  ;;  %v792_v8 = vadd.f32 0.001143296, %v791_v34 }
  0xef   : > { %v898_v20 = vmul.f32 %v2930_v60, %v2930_v60  ;;  %v759_v2 = vmul.f32 %v758_v63, %v2852_v5  ;;  %v831_v29 = vmul.f32 3.8918573e-05, %v2927_v59  ;;  %vm727_vm12 = vweird.f32 %v2552_v4 }
  0xf0   : > { %v724_v10 = vmul.f32 %v2552_v4, %v723_v55  ;;  %v822_v11 = vmul.f32 %v821_v50, %v2927_v59  ;;  %v862_v14 = vmul.f32 %v861_v37, %v2949_v7  ;;  %vm726_vm13 = vweird.f32 %v2933_v1 }
  0xf1   : > { %v2985_v43 = vmin.f32 %v898_v20, 16.0  ;;  %500 = vmatpush.bf16.msra.mxu1 %v2372_v51  ;;  %v2399_v13 = vclamps-f32 %v695_v52, 1.0  ;;  %v733_v18 = vor.u32 1.1754944e-38, %v732_v56  ;;  %vm728_vm14 = vmor %vm726_vm13, %vm727_vm12  ;;  %v793_v41 = vmul.f32 %v792_v8, %v2876_v45 }
  0xf2   : > { %v479_v16 = vpop.f32.mrf.mxu0  ;;  %v725_v17 = vadd.f32 %v2552_v4, %v724_v10  ;;  %v832_v22 = vadd.f32 0.001143296, %v831_v29  ;;  %v710_v1 = vmul.f32 %v709_v12, %v2815_v19  ;;  %vm731_vm15 = vcmp.eq.f32.partialorder %v730_v62, 8.507059e+37 }
  0xf3   : > { %v2977_v28 = vadd.f32 %v479_v16, %v2744_v33  ;;  %v900_v47 = vmul.f32 2.1237322e-06, %v2985_v43  ;;  %v3008_v16 = vadd.f32 1.0, %v759_v2  ;;  %v748_v25 = vmul.f32 %v747_v27, %v2852_v5 }
  0xf4   : > { %v729_v23 = vsel %vm728_vm14, %v2552_v4, %v725_v17  ;;  %v786_v26 = vmul.f32 %v785_v31, %v2876_v45  ;;  %v823_v32 = vadd.f32 0.0036580483, %v822_v11  ;;  %v863_v34 = vadd.f32 0.0036580483, %v862_v14 }
  0xf5   : > { %v2995_v35 = vmul.f32 0.70710677, %v2977_v28  ;;  %2553 = vrcp.f32 %v3008_v16  ;;  %v901_v21 = vadd.f32 0.00028619796, %v900_v47  ;;  %v734_v36 = vsel %vm731_vm15, %v733_v18, %v729_v23 }
  0xf6   : > { %v735_v38 = vmul.f32 %v734_v36, %v710_v1  ;;  %v1220_v46 = vadd.f32 1.0, %v2399_v13  ;;  %v3023_v48 = vmul.f32 0.5, %v2847_v0  ;;  %v794_v12 = vadd.f32 0.014752088, %v793_v41 }
  0xf7   : > { %v938_v58 = vmul.f32 %v2995_v35, %v2995_v35  ;;  %v833_v4 = vmul.f32 %v832_v22, %v2927_v59  ;;  %v3029_v5 = vmul.f32 0.5, %v2886_v61  ;;  %v902_v27 = vmul.f32 %v901_v21, %v2985_v43 }
  0xf8   : > { %v2400_v31 = vclamps-f32 %v735_v38, 1.0  ;;  %v749_v51 = vadd.f32 1.1283791, %v748_v25  ;;  %v787_v0 = vadd.f32 0.18741608, %v786_v26  ;;  %v795_v52 = vmul.f32 %v794_v12, %v2876_v45 }
  0xf9   : > { %v3025_v49 = vmin.f32 %v938_v58, 16.0  ;;  %v824_v55 = vmul.f32 %v823_v32, %v2927_v59  ;;  %v864_v56 = vmul.f32 %v863_v34, %v2949_v7  ;;  %v834_v29 = vadd.f32 0.014752088, %v833_v4 }
  0xfa   : > { %v482_v57 = vpop.f32.mrf.mxu0  ;;  %v1221_v61 = vadd.f32 1.0, %v2400_v31  ;;  %v903_v47 = vadd.f32 0.0036580483, %v902_v27  ;;  %v796_v11 = vadd.f32 0.112945676, %v795_v52  ;;  %v788_v58 = vmul.f32 %v787_v0, %v2876_v45 }
  0xfb   : > { %v3003_v9 = vadd.f32 %v482_v57, %v2744_v33  ;;  %v3035_v37 = vpop.eup %2553  ;;  %v1236_v57 = vmul.f32 %v1220_v46, %v2944_v3  ;;  %v940_v62 = vmul.f32 2.1237322e-06, %v3025_v49  ;;  %v871_v14 = vmul.f32 3.8918573e-05, %v2949_v7  ;;  %v2509_v46 = vld [vmem:[%s4185_s1 + $0x34] sm:$0xf] }
  0xfc   : > { %v762_v8 = vmul.f32 %v3035_v37, %v3008_v16  ;;  %v1237_v10 = vmul.f32 %v1221_v61, %v2947_v6  ;;  %v3053_v13 = vmul.f32 0.5, %v2892_v54  ;;  %v825_v18 = vadd.f32 0.05243302, %v824_v55  ;;  %v2507_v52 = vld [vmem:[%s4185_s1 + $0x24] sm:$0xf] }
  0xfd   : > { %v3013_v20 = vmul.f32 0.70710677, %v3003_v9  ;;  %v797_v1 = vmul.f32 %v796_v11, %v2876_v45  ;;  %v865_v21 = vadd.f32 0.05243302, %v864_v56  ;;  %v941_v6 = vadd.f32 0.00028619796, %v940_v62 }
  0xfe   : > { %v1251_v41 = vpack.c.bf16 %v1237_v10, %v1236_v57  ;;  %v763_v22 = vsub.f32 1.0, %v762_v8  ;;  %v835_v26 = vmul.f32 %v834_v29, %v2927_v59  ;;  %v904_v54 = vmul.f32 %v903_v47, %v2985_v43  ;;  %v2353_v62 = vld [vmem:[%s4185_s1 + $0x28] sm:$0xf0] }
  0xff   : > { %v978_v30 = vmul.f32 %v3013_v20, %v3013_v20  ;;  %v798_v36 = vadd.f32 0.4994258, %v797_v1  ;;  %v872_v32 = vadd.f32 0.001143296, %v871_v14  ;;  %v3067_v34 = vmul.f32 %v749_v51, %v2834_v42 }
 0x100   : > { %1339 = vmatmul.bf16.gmra.mxu2 %v1251_v41  ;;  %v764_v27 = vmul.f32 %v3035_v37, %v763_v22  ;;  %v789_v42 = vadd.f32 1.1283791, %v788_v58  ;;  %v942_v51 = vmul.f32 %v941_v6, %v3025_v49  ;;  %v836_v55 = vadd.f32 0.112945676, %v835_v26  ;;  %v2505_v58 = vld [vmem:[%s4185_s1 + $0x14] sm:$0xf] }
 0x101   : > { %v3037_v63 = vmin.f32 %v978_v30, 16.0  ;;  %v799_v31 = vmul.f32 %v798_v36, %v2876_v45  ;;  %v905_v56 = vadd.f32 0.05243302, %v904_v54  ;;  %v873_v45 = vmul.f32 %v872_v32, %v2949_v7 }
 0x102   : > { %v484_v19 = vpop.f32.mrf.mxu0  ;;  %v826_v8 = vmul.f32 %v825_v18, %v2927_v59  ;;  %v866_v29 = vmul.f32 %v865_v21, %v2949_v7  ;;  %v2356_v10 = vor.u32 %v2507_v52, %v2353_v62  ;;  %v765_v14 = vadd.f32 %v3035_v37, %v764_v27  ;;  %v2337_v27 = vld [vmem:[%s4185_s1 + $0x8] sm:$0xf0] }
 0x103   : > { %v3033_v50 = vadd.f32 %v484_v19, %v2744_v33  ;;  %v980_v3 = vmul.f32 2.1237322e-06, %v3037_v63  ;;  %v2361_v19 = vld [vmem:[%s4185_s1 + $0x38] sm:$0xf0]  ;;  %v3087_v57 = vadd.f32 1.0, %v799_v31  ;;  %vm767_vm0 = vweird.f32 %v3035_v37 }
 0x104   : > { %v2364_v0 = vor.u32 %v2509_v46, %v2361_v19  ;;  %v772_v41 = vand.u32 2147483648, %v3008_v16  ;;  %v837_v22 = vmul.f32 %v836_v55, %v2927_v59  ;;  %v906_v1 = vmul.f32 %v905_v56, %v2985_v43 }
 0x105   : > { %v3045_v2 = vmul.f32 0.70710677, %v3033_v50  ;;  %v981_v38 = vadd.f32 0.00028619796, %v980_v3  ;;  %2555 = vrcp.f32 %v3087_v57  ;;  %v2345_v3 = vld [vmem:[%s4185_s1 + $0x18] sm:$0xf0]  ;;  %vm766_vm1 = vweird.f32 %v3008_v16 }
 0x106   : > { %501 = vmatpush.bf16.msra.mxu1 %v2364_v0  ;;  %v770_v21 = vand.u32 2147483647, %v3008_v16  ;;  %v874_v6 = vadd.f32 0.014752088, %v873_v45  ;;  %v3113_v26 = vmul.f32 0.5, %v2912_v39  ;;  %vm3117_vm2 = vmor %vm766_vm1, %vm767_vm0  ;;  %v790_v46 = vmul.f32 %v789_v42, %v2855_v40 }
 0x107   : > { %v1018_v17 = vmul.f32 %v3045_v2, %v3045_v2  ;;  %v982_v47 = vmul.f32 %v981_v38, %v3037_v63  ;;  %v2348_v38 = vor.u32 %v2505_v58, %v2345_v3  ;;  %v867_v19 = vadd.f32 0.18741608, %v866_v29 }
 0x108   : > { %v769_v39 = vsel %vm3117_vm2, %v3035_v37, %v765_v14  ;;  %v773_v40 = vor.u32 1.1754944e-38, %v772_v41  ;;  %v838_v42 = vadd.f32 0.4994258, %v837_v22  ;;  %v907_v52 = vadd.f32 0.18741608, %v906_v1 }
 0x109   : > { %v3059_v23 = vmin.f32 %v1018_v17, 16.0  ;;  %v943_v17 = vadd.f32 0.0036580483, %v942_v51  ;;  %v983_v54 = vadd.f32 0.0036580483, %v982_v47  ;;  %vm771_vm3 = vcmp.eq.f32.partialorder %v770_v21, 8.507059e+37 }
 0x10a   : > { %v487_v25 = vpop.f32.mrf.mxu0  ;;  %502 = vmatpush.bf16.msra.mxu1 %v2356_v10  ;;  %v875_v37 = vmul.f32 %v874_v6, %v2949_v7  ;;  %v839_v29 = vmul.f32 %v838_v42, %v2927_v59  ;;  %v911_v10 = vmul.f32 3.8918573e-05, %v2985_v43  ;;  %v812_v41 = vand.u32 2147483648, %v3087_v57 }
 0x10b   : > { %v3064_v30 = vadd.f32 %v487_v25, %v2744_v33  ;;  %v1020_v12 = vmul.f32 2.1237322e-06, %v3059_v23  ;;  %v827_v25 = vadd.f32 0.18741608, %v826_v8  ;;  %v944_v31 = vmul.f32 %v943_v17, %v3025_v49  ;;  %v2556_v0 = vpop.eup %2555 }
 0x10c   : > { %v984_v56 = vmul.f32 %v983_v54, %v3037_v63  ;;  %v802_v62 = vmul.f32 %v2556_v0, %v3087_v57  ;;  %v876_v47 = vadd.f32 0.112945676, %v875_v37  ;;  %v3148_v1 = vadd.f32 1.0, %v839_v29 }
 0x10d   : > { %v3077_v4 = vmul.f32 0.70710677, %v3064_v30  ;;  %v1021_v11 = vadd.f32 0.00028619796, %v1020_v12  ;;  %v2503_v12 = vld [vmem:[%s4185_s1 + $0x4] sm:$0xf]  ;;  %vm807_vm4 = vweird.f32 %v2556_v0  ;;  %vm806_vm5 = vweird.f32 %v3087_v57 }
 0x10e   : > { %503 = vmatpush.bf16.msra.mxu1 %v2348_v38  ;;  %v2340_v45 = vor.u32 %v2503_v12, %v2337_v27  ;;  %v945_v14 = vadd.f32 0.05243302, %v944_v31  ;;  %v803_v3 = vsub.f32 1.0, %v802_v62  ;;  %v810_v6 = vand.u32 2147483647, %v3087_v57  ;;  %vm808_vm6 = vmor %vm806_vm5, %vm807_vm4 }
 0x10f   : > { %v1058_v61 = vmul.f32 %v3077_v4, %v3077_v4  ;;  %v1022_v16 = vmul.f32 %v1021_v11, %v3059_v23  ;;  %v828_v11 = vmul.f32 %v827_v25, %v2927_v59  ;;  %v877_v54 = vmul.f32 %v876_v47, %v2949_v7 }
 0x110   : > { %v804_v21 = vmul.f32 %v2556_v0, %v803_v3  ;;  %v985_v59 = vadd.f32 0.05243302, %v984_v56  ;;  %2557 = vrcp.f32 %v3148_v1  ;;  %v946_v36 = vmul.f32 %v945_v14, %v3025_v49 }
 0x111   : > { %v3105_v18 = vmin.f32 %v1058_v61, 16.0  ;;  %v774_v61 = vsel %vm771_vm3, %v773_v40, %v769_v39  ;;  %v1023_v8 = vadd.f32 0.0036580483, %v1022_v16  ;;  %v868_v16 = vmul.f32 %v867_v19, %v2949_v7 }
 0x112   : > { %v489_v32 = vpop.f32.mrf.mxu0  ;;  %v775_v17 = vmul.f32 %v774_v61, %v3067_v34  ;;  %504 = vmatpush.bf16.msra.mxu1 %v2340_v45  ;;  %v912_v34 = vadd.f32 0.001143296, %v911_v10  ;;  %v805_v38 = vadd.f32 %v2556_v0, %v804_v21  ;;  %v813_v12 = vor.u32 1.1754944e-38, %v812_v41 }
 0x113   : > { %v1060_v51 = vmul.f32 2.1237322e-06, %v3105_v18  ;;  %v3135_v55 = vadd.f32 %v489_v32, %v2744_v33  ;;  %v1024_v25 = vmul.f32 %v1023_v8, %v3059_v23  ;;  %v908_v31 = vmul.f32 %v907_v52, %v2985_v43 }
 0x114   : > { %v2401_v39 = vclamps-f32 %v775_v17, 1.0  ;;  %vm811_vm7 = vcmp.eq.f32.partialorder %v810_v6, 8.507059e+37  ;;  %v878_v40 = vadd.f32 0.4994258, %v877_v54  ;;  %v986_v42 = vmul.f32 %v985_v59, %v3037_v63 }
 0x115   : > { %v1061_v58 = vadd.f32 0.00028619796, %v1060_v51  ;;  %v3146_v22 = vmul.f32 0.70710677, %v3135_v55  ;;  %505 = vmatmul.bf16.vlgmr.msra.gmra.mxu1 %v2731_v24  ;;  %v809_v51 = vsel %vm808_vm6, %v2556_v0, %v805_v38  ;;  %v1025_v37 = vadd.f32 0.05243302, %v1024_v25 }
 0x116   : > { %v814_v56 = vsel %vm811_vm7, %v813_v12, %v809_v51  ;;  %v913_v57 = vmul.f32 %v912_v34, %v2985_v43  ;;  %v947_v19 = vadd.f32 0.18741608, %v946_v36  ;;  %v879_v45 = vmul.f32 %v878_v40, %v2949_v7  ;;  %v2558_v8 = vpop.eup %2557 }
 0x117   : > { %v1062_v32 = vmul.f32 %v1061_v58, %v3105_v18  ;;  %v1098_v27 = vmul.f32 %v3146_v22, %v3146_v22  ;;  %v815_v62 = vmul.f32 %v814_v56, %v790_v46  ;;  %v829_v29 = vadd.f32 1.1283791, %v828_v11 }
 0x118   : > { %v3166_v24 = vmul.f32 0.5, %v2977_v28  ;;  %v1222_v52 = vadd.f32 1.0, %v2401_v39  ;;  %v869_v47 = vadd.f32 1.1283791, %v868_v16  ;;  %v909_v10 = vadd.f32 1.1283791, %v908_v31 }
 0x119   : > { %v1063_v61 = vadd.f32 0.0036580483, %v1062_v32  ;;  %v3168_v0 = vmin.f32 %v1098_v27, 16.0  ;;  %v2402_v14 = vclamps-f32 %v815_v62, 1.0  ;;  %v842_v58 = vmul.f32 %v2558_v8, %v3148_v1 }
 0x11a   : > { %v987_v3 = vadd.f32 0.18741608, %v986_v42  ;;  %v1026_v17 = vmul.f32 %v1025_v37, %v3059_v23  ;;  %v3172_v41 = vadd.f32 1.0, %v879_v45  ;;  %v914_v46 = vadd.f32 0.014752088, %v913_v57  ;;  %v492_v21 = vpop.f32.mrf.mxu0 }
 0x11b   : > { %v948_v7 = vmul.f32 %v947_v19, %v3025_v49  ;;  %v1064_v11 = vmul.f32 %v1063_v61, %v3105_v18  ;;  %v1223_v28 = vadd.f32 1.0, %v2402_v14  ;;  %v843_v6 = vsub.f32 1.0, %v842_v58 }
 0x11c   : > { %v1238_v54 = vmul.f32 %v1222_v52, %v2983_v44  ;;  %v1100_v59 = vmul.f32 2.1237322e-06, %v3168_v0  ;;  %v852_v25 = vand.u32 2147483648, %v3148_v1  ;;  %2559 = vrcp.f32 %v3172_v41 }
 0x11d   : > { %v1239_v34 = vmul.f32 %v1223_v28, %v3023_v48  ;;  %v844_v36 = vmul.f32 %v2558_v8, %v843_v6  ;;  %vm847_vm8 = vweird.f32 %v2558_v8  ;;  %v850_v32 = vand.u32 2147483647, %v3148_v1 }
 0x11e   : > { %v988_v38 = vmul.f32 %v987_v3, %v3037_v63  ;;  %v1027_v16 = vadd.f32 0.18741608, %v1026_v17  ;;  %v3184_v39 = vadd.f32 %v492_v21, %v2744_v33  ;;  %v915_v44 = vmul.f32 %v914_v46, %v2985_v43 }
 0x11f   : > { %v1065_v12 = vadd.f32 0.05243302, %v1064_v11  ;;  %v1252_v27 = vpack.c.bf16 %v1239_v34, %v1238_v54  ;;  %v845_v31 = vadd.f32 %v2558_v8, %v844_v36  ;;  %vm846_vm9 = vweird.f32 %v3148_v1 }
 0x120   : > { %v830_v51 = vmul.f32 %v829_v29, %v2899_v15  ;;  %v1101_v48 = vadd.f32 0.00028619796, %v1100_v59  ;;  %vm848_vm10 = vmor %vm846_vm9, %vm847_vm8  ;;  %v853_v40 = vor.u32 1.1754944e-38, %v852_v25  ;;  %v916_v42 = vadd.f32 0.112945676, %v915_v44 }
 0x121   : > { %1344 = vmatmul.bf16.gmra.mxu2 %v1252_v27  ;;  %v849_v37 = vsel %vm848_vm10, %v2558_v8, %v845_v31  ;;  %vm851_vm11 = vcmp.eq.f32.partialorder %v850_v32, 8.507059e+37  ;;  %v951_v56 = vmul.f32 3.8918573e-05, %v3025_v49  ;;  %v991_v57 = vmul.f32 3.8918573e-05, %v3037_v63 }
 0x122   : > { %v2560_v19 = vpop.eup %2559  ;;  %v870_v61 = vmul.f32 %v869_v47, %v2905_v53  ;;  %v3193_v62 = vmul.f32 0.70710677, %v3184_v39  ;;  %v854_v1 = vsel %vm851_vm11, %v853_v40, %v849_v37  ;;  %v917_v15 = vmul.f32 %v916_v42, %v2985_v43  ;;  %v2609_v47 = vld [vmem:[%s2728_s17 + $0x8] sm:$0xff]  ;;  %v494_v28 = vpop.f32.mrf.mxu0 }
 0x123   : > { %v3197_v45 = vmul.f32 %v909_v10, %v2930_v60  ;;  %v949_v29 = vadd.f32 1.1283791, %v948_v7  ;;  %v3199_v8 = vadd.f32 1.1283791, %v988_v38  ;;  %v882_v52 = vmul.f32 %v2560_v19, %v3172_v41 }
 0x124   : > { %v1028_v14 = vmul.f32 %v1027_v16, %v3059_v23  ;;  %v1102_v58 = vmul.f32 %v1101_v48, %v3168_v0  ;;  %v918_v3 = vadd.f32 0.4994258, %v917_v15  ;;  %v952_v53 = vadd.f32 0.001143296, %v951_v56 }
 0x125   : > { %510 = vmatmul.bf16.gmra.mxu1 %v2609_v47  ;;  %v1066_v17 = vmul.f32 %v1065_v12, %v3105_v18  ;;  %v855_v46 = vmul.f32 %v854_v1, %v830_v51  ;;  %v883_v11 = vsub.f32 1.0, %v882_v52  ;;  %v992_v60 = vadd.f32 0.001143296, %v991_v57 }
 0x126   : > { %v1138_v10 = vmul.f32 %v3193_v62, %v3193_v62  ;;  %v892_v7 = vand.u32 2147483648, %v3172_v41  ;;  %v919_v21 = vmul.f32 %v918_v3, %v2985_v43  ;;  %v953_v6 = vmul.f32 %v952_v53, %v3025_v49 }
 0x127   : > { %v884_v54 = vmul.f32 %v2560_v19, %v883_v11  ;;  %vm887_vm12 = vweird.f32 %v2560_v19  ;;  %v890_v59 = vand.u32 2147483647, %v3172_v41  ;;  %v993_v25 = vmul.f32 %v992_v60, %v3037_v63 }
 0x128   : > { %v1103_v34 = vadd.f32 0.0036580483, %v1102_v58  ;;  %v3214_v36 = vadd.f32 %v494_v28, %v2744_v33  ;;  %v3216_v32 = vadd.f32 1.0, %v919_v21  ;;  %v954_v38 = vadd.f32 0.014752088, %v953_v6 }
 0x129   : > { %v2403_v16 = vclamps-f32 %v855_v46, 1.0  ;;  %v885_v44 = vadd.f32 %v2560_v19, %v884_v54  ;;  %vm886_vm13 = vweird.f32 %v3172_v41  ;;  %v994_v43 = vadd.f32 0.014752088, %v993_v25 }
 0x12a   : > { %v3219_v12 = vadd.f32 1.1283791, %v1028_v14  ;;  %vm888_vm14 = vmor %vm886_vm13, %vm887_vm12  ;;  %v893_v27 = vor.u32 1.1754944e-38, %v892_v7  ;;  %2561 = vrcp.f32 %v3216_v32  ;;  %v1031_v31 = vmul.f32 3.8918573e-05, %v3059_v23 }
 0x12b   : > { %v3223_v51 = vmin.f32 %v1138_v10, 16.0  ;;  %v889_v33 = vsel %vm888_vm14, %v2560_v19, %v885_v44  ;;  %vm891_vm15 = vcmp.eq.f32.partialorder %v890_v59, 8.507059e+37  ;;  %v955_v48 = vmul.f32 %v954_v38, %v3025_v49 }
 0x12c   : > { %v1067_v40 = vadd.f32 0.18741608, %v1066_v17  ;;  %v894_v42 = vsel %vm891_vm15, %v893_v27, %v889_v33  ;;  %v3227_v37 = vmul.f32 0.70710677, %v3214_v36  ;;  %v995_v41 = vmul.f32 %v994_v43, %v3037_v63 }
 0x12d   : > { %v1104_v56 = vmul.f32 %v1103_v34, %v3168_v0  ;;  %v895_v57 = vmul.f32 %v894_v42, %v870_v61  ;;  %v1224_v1 = vadd.f32 1.0, %v2403_v16  ;;  %v956_v15 = vadd.f32 0.112945676, %v955_v48 }
 0x12e   : > { %v3232_v52 = vmul.f32 %v949_v29, %v2995_v35  ;;  %v996_v14 = vadd.f32 0.112945676, %v995_v41  ;;  %v1032_v19 = vadd.f32 0.001143296, %v1031_v31  ;;  %v1071_v58 = vmul.f32 3.8918573e-05, %v3105_v18 }
 0x12f   : > { %v1140_v3 = vmul.f32 2.1237322e-06, %v3223_v51  ;;  %v2404_v53 = vclamps-f32 %v895_v57, 1.0  ;;  %v957_v47 = vmul.f32 %v956_v15, %v3025_v49  ;;  %v1111_v17 = vmul.f32 3.8918573e-05, %v3168_v0  ;;  %v2610_v31 = vld [vmem:[%s2728_s17 + $0x10] sm:$0xff] }
 0x130   : > { %v3238_v46 = vpop.eup %2561  ;;  %v1178_v61 = vmul.f32 %v3227_v37, %v3227_v37  ;;  %v997_v11 = vmul.f32 %v996_v14, %v3037_v63  ;;  %v1033_v35 = vmul.f32 %v1032_v19, %v3059_v23  ;;  %v1072_v29 = vadd.f32 0.001143296, %v1071_v58 }
 0x131   : > { %v1105_v28 = vadd.f32 0.05243302, %v1104_v56  ;;  %v1225_v60 = vadd.f32 1.0, %v2404_v53  ;;  %v922_v10 = vmul.f32 %v3238_v46, %v3216_v32  ;;  %v958_v7 = vadd.f32 0.4994258, %v957_v47 }
 0x132   : > { %v1240_v21 = vmul.f32 %v1224_v1, %v3029_v5  ;;  %v998_v6 = vadd.f32 0.4994258, %v997_v11  ;;  %v1034_v54 = vadd.f32 0.014752088, %v1033_v35  ;;  %v1073_v59 = vmul.f32 %v1072_v29, %v3105_v18 }
 0x133   : > { %v1241_v25 = vmul.f32 %v1225_v60, %v3053_v13  ;;  %v923_v34 = vsub.f32 1.0, %v922_v10  ;;  %v959_v38 = vmul.f32 %v958_v7, %v3025_v49  ;;  %v1112_v16 = vadd.f32 0.001143296, %v1111_v17 }
 0x134   : > { %v3250_v44 = vmin.f32 %v1178_v61, 16.0  ;;  %v999_v43 = vmul.f32 %v998_v6, %v3037_v63  ;;  %v1035_v27 = vmul.f32 %v1034_v54, %v3059_v23  ;;  %v1074_v33 = vadd.f32 0.014752088, %v1073_v59 }
 0x135   : > { %515 = vmatmul.bf16.gmra.mxu1 %v2610_v31  ;;  %v1141_v5 = vadd.f32 0.00028619796, %v1140_v3  ;;  %v1253_v48 = vpack.c.bf16 %v1241_v25, %v1240_v21  ;;  %v924_v42 = vmul.f32 %v3238_v46, %v923_v34  ;;  %v3256_v41 = vadd.f32 1.0, %v959_v38 }
 0x136   : > { %v1106_v13 = vmul.f32 %v1105_v28, %v3168_v0  ;;  %v3259_v56 = vadd.f32 1.0, %v999_v43  ;;  %v1036_v49 = vadd.f32 0.112945676, %v1035_v27  ;;  %v1075_v57 = vmul.f32 %v1074_v33, %v3105_v18 }
 0x137   : > { %1349 = vmatmul.bf16.gmra.mxu2 %v1253_v48  ;;  %v925_v63 = vadd.f32 %v3238_v46, %v924_v42  ;;  %vm927_vm0 = vweird.f32 %v3238_v46  ;;  %2563 = vrcp.f32 %v3256_v41  ;;  %v1113_v1 = vmul.f32 %v1112_v16, %v3168_v0 }
 0x138   : > { %v1180_v15 = vmul.f32 2.1237322e-06, %v3250_v44  ;;  %v932_v14 = vand.u32 2147483648, %v3216_v32  ;;  %2565 = vrcp.f32 %v3259_v56  ;;  %v1151_v19 = vmul.f32 3.8918573e-05, %v3223_v51 }
 0x139   : > { %v3272_v58 = vmul.f32 %v3199_v8, %v3013_v20  ;;  %vm926_vm1 = vweird.f32 %v3216_v32  ;;  %v930_v3 = vand.u32 2147483647, %v3216_v32  ;;  %v1037_v53 = vmul.f32 %v1036_v49, %v3059_v23 }
 0x13a   : > { %v3279_v47 = vmul.f32 %v3219_v12, %v3045_v2  ;;  %v3282_v17 = vmul.f32 %v1067_v40, %v3105_v18  ;;  %v1142_v61 = vmul.f32 %v1141_v5, %v3223_v51  ;;  %vm3285_vm2 = vmor %vm926_vm1, %vm927_vm0  ;;  %v1076_v20 = vadd.f32 0.112945676, %v1075_v57 }
 0x13b   : > { %v3289_v8 = vadd.f32 0.18741608, %v1106_v13  ;;  %v929_v32 = vsel %vm3285_vm2, %v3238_v46, %v925_v63  ;;  %v1038_v35 = vadd.f32 0.4994258, %v1037_v53  ;;  %v1114_v29 = vadd.f32 0.014752088, %v1113_v1 }
 0x13c   : > { %v1181_v2 = vadd.f32 0.00028619796, %v1180_v15  ;;  %v933_v12 = vor.u32 1.1754944e-38, %v932_v14  ;;  %v1077_v40 = vmul.f32 %v1076_v20, %v3105_v18  ;;  %v1152_v28 = vadd.f32 0.001143296, %v1151_v19  ;;  %v2611_v19 = vld [vmem:[%s2728_s17 + $0x18] sm:$0xff] }
 0x13d   : > { %v2564_v60 = vpop.eup %2563  ;;  %vm931_vm3 = vcmp.eq.f32.partialorder %v930_v3, 8.507059e+37  ;;  %vm966_vm4 = vweird.f32 %v3256_v41  ;;  %v1039_v10 = vmul.f32 %v1038_v35, %v3059_v23  ;;  %v1115_v7 = vmul.f32 %v1114_v29, %v3168_v0 }
 0x13e   : > { %v3298_v21 = vpop.eup %2565  ;;  %v934_v6 = vsel %vm931_vm3, %v933_v12, %v929_v32  ;;  %v962_v46 = vmul.f32 %v2564_v60, %v3256_v41  ;;  %v1078_v54 = vadd.f32 0.4994258, %v1077_v40  ;;  %v1153_v59 = vmul.f32 %v1152_v28, %v3223_v51 }
 0x13f   : > { %v970_v25 = vand.u32 2147483647, %v3256_v41  ;;  %v1002_v34 = vmul.f32 %v3298_v21, %v3259_v56  ;;  %v3305_v38 = vadd.f32 1.0, %v1039_v10  ;;  %v1191_v16 = vmul.f32 3.8918573e-05, %v3250_v44 }
 0x140   : > { %v963_v23 = vsub.f32 1.0, %v962_v46  ;;  %v1079_v43 = vmul.f32 %v1078_v54, %v3105_v18  ;;  %v1116_v27 = vadd.f32 0.112945676, %v1115_v7  ;;  %v1154_v31 = vadd.f32 0.014752088, %v1153_v59 }
 0x141   : > { %v935_v33 = vmul.f32 %v934_v6, %v3197_v45  ;;  %v972_v5 = vand.u32 2147483648, %v3256_v41  ;;  %v1003_v48 = vsub.f32 1.0, %v1002_v34  ;;  %2567 = vrcp.f32 %v3305_v38 }
 0x142   : > { %v964_v42 = vmul.f32 %v2564_v60, %v963_v23  ;;  %vm967_vm5 = vweird.f32 %v2564_v60  ;;  %v1010_v13 = vand.u32 2147483647, %v3259_v56  ;;  %v3313_v49 = vadd.f32 1.0, %v1079_v43 }
 0x143   : > { %v1004_v57 = vmul.f32 %v3298_v21, %v1003_v48  ;;  %v1117_v18 = vmul.f32 %v1116_v27, %v3168_v0  ;;  %v1155_v63 = vmul.f32 %v1154_v31, %v3223_v51  ;;  %v1192_v1 = vadd.f32 0.001143296, %v1191_v16  ;;  %vm968_vm7 = vmor %vm966_vm4, %vm967_vm5 }
 0x144   : > { %v965_v45 = vadd.f32 %v2564_v60, %v964_v42  ;;  %vm3318_vm6 = vcmp.eq.f32.partialorder %v970_v25, 8.507059e+37  ;;  %v1012_v14 = vand.u32 2147483648, %v3259_v56  ;;  %2569 = vrcp.f32 %v3313_v49 }
 0x145   : > { %520 = vmatmul.bf16.gmra.mxu1 %v2611_v19  ;;  %v2405_v3 = vclamps-f32 %v935_v33, 1.0  ;;  %v973_v53 = vor.u32 1.1754944e-38, %v972_v5  ;;  %v1005_v11 = vadd.f32 %v3298_v21, %v1004_v57  ;;  %vm1007_vm8 = vweird.f32 %v3298_v21 }
 0x146   : > { %v969_v20 = vsel %vm968_vm7, %v2564_v60, %v965_v45  ;;  %v1118_v32 = vadd.f32 0.4994258, %v1117_v18  ;;  %v1156_v35 = vadd.f32 0.112945676, %v1155_v63  ;;  %v1193_v29 = vmul.f32 %v1192_v1, %v3250_v44 }
 0x147   : > { %v2568_v12 = vpop.eup %2567  ;;  %v1143_v40 = vadd.f32 0.0036580483, %v1142_v61  ;;  %v1182_v28 = vmul.f32 %v1181_v2, %v3250_v44  ;;  %v974_v10 = vsel %vm3318_vm6, %v973_v53, %v969_v20  ;;  %vm1006_vm9 = vweird.f32 %v3259_v56 }
 0x148   : > { %v975_v41 = vmul.f32 %v974_v10, %v3232_v52  ;;  %vm3335_vm10 = vcmp.eq.f32.partialorder %v1010_v13, 8.507059e+37  ;;  %v1013_v60 = vor.u32 1.1754944e-38, %v1012_v14  ;;  %v1042_v6 = vmul.f32 %v2568_v12, %v3305_v38  ;;  %vm3342_vm11 = vmor %vm1006_vm9, %vm1007_vm8 }
 0x149   : > { %v1226_v46 = vadd.f32 1.0, %v2405_v3  ;;  %v1119_v2 = vmul.f32 %v1118_v32, %v3168_v0  ;;  %v1157_v56 = vmul.f32 %v1156_v35, %v3223_v51  ;;  %v1194_v54 = vadd.f32 0.014752088, %v1193_v29 }
 0x14a   : > { %v3348_v52 = vpop.eup %2569  ;;  %v2406_v59 = vclamps-f32 %v975_v41, 1.0  ;;  %v1009_v25 = vsel %vm3342_vm11, %v3298_v21, %v1005_v11  ;;  %v1043_v34 = vsub.f32 1.0, %v1042_v6  ;;  %v1050_v16 = vand.u32 2147483647, %v3305_v38  ;;  %v2612_v41 = vld [vmem:[%s2728_s17 + $0x20] sm:$0xff] }
 0x14b   : > { %vm1047_vm12 = vweird.f32 %v2568_v12  ;;  %v1052_v23 = vand.u32 2147483648, %v3305_v38  ;;  %v1082_v43 = vmul.f32 %v3348_v52, %v3313_v49  ;;  %v3357_v27 = vadd.f32 1.0, %v1119_v2 }
 0x14c   : > { %v1227_v31 = vadd.f32 1.0, %v2406_v59  ;;  %v1044_v33 = vmul.f32 %v2568_v12, %v1043_v34  ;;  %v1158_v5 = vadd.f32 0.4994258, %v1157_v56  ;;  %v1195_v48 = vmul.f32 %v1194_v54, %v3250_v44 }
 0x14d   : > { %v1183_v42 = vadd.f32 0.0036580483, %v1182_v28  ;;  %v1242_v13 = vmul.f32 %v1226_v46, %v3113_v26  ;;  %v1014_v21 = vsel %vm3335_vm10, %v1013_v60, %v1009_v25  ;;  %2571 = vrcp.f32 %v3357_v27 }
 0x14e   : > { %v1243_v57 = vmul.f32 %v1227_v31, %v3166_v24  ;;  %v1045_v18 = vadd.f32 %v2568_v12, %v1044_v33  ;;  %vm1046_vm13 = vweird.f32 %v3305_v38  ;;  %v1083_v63 = vsub.f32 1.0, %v1082_v43 }
 0x14f   : > { %v1108_v1 = vmul.f32 %v3289_v8, %v3168_v0  ;;  %vm1048_vm14 = vmor %vm1046_vm13, %vm1047_vm12  ;;  %v1053_v45 = vor.u32 1.1754944e-38, %v1052_v23  ;;  %v1159_v15 = vmul.f32 %v1158_v5, %v3223_v51  ;;  %v1196_v26 = vadd.f32 0.112945676, %v1195_v48 }
 0x150   : > { %v1254_v14 = vpack.c.bf16 %v1243_v57, %v1242_v13  ;;  %v1015_v19 = vmul.f32 %v1014_v21, %v3272_v58  ;;  %v1049_v3 = vsel %vm1048_vm14, %v2568_v12, %v1045_v18  ;;  %vm1051_vm15 = vcmp.eq.f32.partialorder %v1050_v16, 8.507059e+37 }
 0x151   : > { %v1184_v24 = vmul.f32 %v1183_v42, %v3250_v44  ;;  %v1054_v53 = vsel %vm1051_vm15, %v1053_v45, %v1049_v3  ;;  %v3372_v38 = vadd.f32 1.0, %v1159_v15  ;;  %v1197_v11 = vmul.f32 %v1196_v26, %v3250_v44 }
 0x152   : > { %1354 = vmatmul.bf16.gmra.mxu2 %v1254_v14  ;;  %v1055_v0 = vmul.f32 %v1054_v53, %v3279_v47  ;;  %v1084_v8 = vmul.f32 %v3348_v52, %v1083_v63  ;;  %v556_v32 = vmul.f32 0.5, %v3003_v9  ;;  %v557_v58 = vmul.f32 0.5, %v3033_v50 }
 0x153   : > { %v2572_v20 = vpop.eup %2571  ;;  %v1069_v35 = vadd.f32 1.1283791, %v3282_v17  ;;  %2573 = vrcp.f32 %v3372_v38  ;;  %v1144_v29 = vmul.f32 %v1143_v40, %v3223_v51  ;;  %v2407_v12 = vclamps-f32 %v1015_v19, 1.0 }
 0x154   : > { %v2408_v28 = vclamps-f32 %v1055_v0, 1.0  ;;  %v1122_v10 = vmul.f32 %v2572_v20, %v3357_v27  ;;  %v1109_v47 = vadd.f32 1.1283791, %v1108_v1  ;;  %v1185_v7 = vadd.f32 0.05243302, %v1184_v24 }
 0x155   : > { %525 = vmatmul.bf16.gmra.mxu1 %v2612_v41  ;;  %vm1086_vm0 = vweird.f32 %v3313_v49  ;;  %v1198_v60 = vadd.f32 0.4994258, %v1197_v11  ;;  %v1085_v50 = vadd.f32 %v3348_v52, %v1084_v8  ;;  %vm1087_vm1 = vweird.f32 %v3348_v52 }
 0x156   : > { %v1229_v9 = vadd.f32 1.0, %v2408_v28  ;;  %v1123_v17 = vsub.f32 1.0, %v1122_v10  ;;  %v1090_v6 = vand.u32 2147483647, %v3313_v49  ;;  %v1092_v40 = vand.u32 2147483648, %v3313_v49  ;;  %vm3397_vm3 = vmor %vm1086_vm0, %vm1087_vm1 }
 0x157   : > { %v1132_v46 = vand.u32 2147483648, %v3357_v27  ;;  %v1199_v61 = vmul.f32 %v1198_v60, %v3250_v44  ;;  %v1228_v2 = vadd.f32 1.0, %v2407_v12  ;;  %vm1127_vm2 = vweird.f32 %v2572_v20 }
 0x158   : > { %v1124_v56 = vmul.f32 %v2572_v20, %v1123_v17  ;;  %v1130_v54 = vand.u32 2147483647, %v3357_v27  ;;  %v1110_v25 = vmul.f32 %v1109_v47, %v3146_v22  ;;  %v1145_v34 = vadd.f32 0.05243302, %v1144_v29 }
 0x159   : > { %v3392_v59 = vpop.eup %2573  ;;  %vm1126_vm4 = vweird.f32 %v3357_v27  ;;  %v3402_v23 = vadd.f32 1.0, %v1199_v61  ;;  %v1245_v43 = vmul.f32 %v1229_v9, %v557_v58  ;;  %v1089_v31 = vsel %vm3397_vm3, %v3348_v52, %v1085_v50 }
 0x15a   : > { %v1125_v33 = vadd.f32 %v2572_v20, %v1124_v56  ;;  %v1162_v22 = vmul.f32 %v3392_v59, %v3372_v38  ;;  %v1186_v5 = vmul.f32 %v1185_v7, %v3250_v44  ;;  %v1093_v49 = vor.u32 1.1754944e-38, %v1092_v40  ;;  %vm1128_vm5 = vmor %vm1126_vm4, %vm1127_vm2 }
 0x15b   : > { %v1133_v48 = vor.u32 1.1754944e-38, %v1132_v46  ;;  %2575 = vrcp.f32 %v3402_v23  ;;  %v1244_v42 = vmul.f32 %v1228_v2, %v556_v32  ;;  %vm1091_vm6 = vcmp.eq.f32.partialorder %v1090_v6, 8.507059e+37 }
 0x15c   : > { %v1129_v27 = vsel %vm1128_vm5, %v2572_v20, %v1125_v33  ;;  %vm1131_vm7 = vcmp.eq.f32.partialorder %v1130_v54, 8.507059e+37  ;;  %v1146_v13 = vmul.f32 %v1145_v34, %v3223_v51  ;;  %v1094_v21 = vsel %vm1091_vm6, %v1093_v49, %v1089_v31  ;;  %v2613_v20 = vld [vmem:[%s2728_s17 + $0x28] sm:$0xff] }
 0x15d   : > { %v1134_v57 = vsel %vm1131_vm7, %v1133_v48, %v1129_v27  ;;  %v1070_v52 = vmul.f32 %v1069_v35, %v3077_v4  ;;  %v1255_v18 = vpack.c.bf16 %v1245_v43, %v1244_v42  ;;  %v1163_v1 = vsub.f32 1.0, %v1162_v22  ;;  %v3419_v4 = vld [vmem:[%s4188_s4] ss:$0 sm:$0xff]  ;;  %v2614_v48 = vld [vmem:[%s2728_s17 + $0x30] sm:$0xff] }
 0x15e   : > { %v1135_v63 = vmul.f32 %v1134_v57, %v1110_v25  ;;  %v1187_v45 = vadd.f32 0.18741608, %v1186_v5  ;;  %v1147_v14 = vadd.f32 0.18741608, %v1146_v13  ;;  %v559_v11 = vmul.f32 0.5, %v3135_v55 }
 0x15f   : > { %v1095_v15 = vmul.f32 %v1094_v21, %v1070_v52  ;;  %v1164_v3 = vmul.f32 %v3392_v59, %v1163_v1  ;;  %vm1167_vm8 = vweird.f32 %v3392_v59  ;;  %v1210_v58 = vand.u32 2147483647, %v3402_v23 }
 0x160   : > { %v2410_v19 = vclamps-f32 %v1135_v63, 1.0  ;;  %v1188_v53 = vmul.f32 %v1187_v45, %v3250_v44  ;;  %v1148_v32 = vmul.f32 %v1147_v14, %v3223_v51  ;;  %v1212_v35 = vand.u32 2147483648, %v3402_v23 }
 0x161   : > { %v2576_v26 = vpop.eup %2575  ;;  %v2409_v0 = vclamps-f32 %v1095_v15, 1.0  ;;  %v1165_v29 = vadd.f32 %v3392_v59, %v1164_v3  ;;  %vm1166_vm10 = vweird.f32 %v3372_v38  ;;  %v1172_v55 = vand.u32 2147483648, %v3372_v38 }
 0x162   : > { %1359 = vmatmul.bf16.gmra.mxu2 %v1255_v18  ;;  %v1202_v24 = vmul.f32 %v2576_v26, %v3402_v23  ;;  %v1231_v44 = vadd.f32 1.0, %v2410_v19  ;;  %vm1207_vm9 = vweird.f32 %v2576_v26  ;;  %v1189_v10 = vadd.f32 1.1283791, %v1188_v53  ;;  %vm3433_vm11 = vmor %vm1166_vm10, %vm1167_vm8 }
 0x163   : > { %v1230_v51 = vadd.f32 1.0, %v2409_v0  ;;  %v1170_v7 = vand.u32 2147483647, %v3372_v38  ;;  %vm1206_vm12 = vweird.f32 %v3402_v23  ;;  %v558_v9 = vmul.f32 0.5, %v3064_v30 }
 0x164   : > { %v1203_v8 = vsub.f32 1.0, %v1202_v24  ;;  %v1149_v50 = vadd.f32 1.1283791, %v1148_v32  ;;  %vm1208_vm13 = vmor %vm1206_vm12, %vm1207_vm9  ;;  %v1213_v17 = vor.u32 1.1754944e-38, %v1212_v35  ;;  %v1247_v40 = vmul.f32 %v1231_v44, %v559_v11 }
 0x165   : > { %530 = vmatmul.bf16.gmra.mxu1 %v2613_v20  ;;  %v1169_v46 = vsel %vm3433_vm11, %v3392_v59, %v1165_v29  ;;  %vm1211_vm14 = vcmp.eq.f32.partialorder %v1210_v58, 8.507059e+37  ;;  %v1173_v2 = vor.u32 1.1754944e-38, %v1172_v55  ;;  %v1190_v30 = vmul.f32 %v1189_v10, %v3227_v37  ;;  %v2615_v29 = vld [vmem:[%s2728_s17 + $0x38] sm:$0xff] }
 0x166   : > { %v1204_v12 = vmul.f32 %v2576_v26, %v1203_v8  ;;  %v1246_v54 = vmul.f32 %v1230_v51, %v558_v9  ;;  %vm1171_vm15 = vcmp.eq.f32.partialorder %v1170_v7, 8.507059e+37  ;;  %v1150_v16 = vmul.f32 %v1149_v50, %v3193_v62 }
 0x167   : > { %v1174_v25 = vsel %vm1171_vm15, %v1173_v2, %v1169_v46  ;;  %v561_v57 = vmul.f32 0.5, %v3214_v36  ;;  %v560_v1 = vmul.f32 0.5, %v3184_v39 }
 0x168   : > { %v1205_v60 = vadd.f32 %v2576_v26, %v1204_v12  ;;  %v1256_v23 = vpack.c.bf16 %v1247_v40, %v1246_v54  ;;  %v1175_v31 = vmul.f32 %v1174_v25, %v1150_v16 }
 0x16a   : > { %v1209_v61 = vsel %vm1208_vm13, %v2576_v26, %v1205_v60  ;;  %v2411_v49 = vclamps-f32 %v1175_v31, 1.0 }
 0x16b   : > { %v1214_v38 = vsel %vm1211_vm14, %v1213_v17, %v1209_v61 }
 0x16c   : > { %v1215_v43 = vmul.f32 %v1214_v38, %v1190_v30  ;;  %v1232_v52 = vadd.f32 1.0, %v2411_v49 }
 0x16e   : > { %v1335_v28 = vpop.f32.mrf.mxu2  ;;  %v2412_v22 = vclamps-f32 %v1215_v43, 1.0  ;;  %v1248_v19 = vmul.f32 %v1232_v52, %v560_v1 }
 0x16f   : > { %v3431_v41 = vadd.f32 %v3419_v4, %v1335_v28 }
 0x170   : > { %v1233_v13 = vadd.f32 1.0, %v2412_v22 }
 0x171   : > { %v3441_v6 = vmul.f32 0.70710677, %v3431_v41 }
 0x172   : > { %1364 = vmatmul.bf16.gmra.mxu2 %v1256_v23  ;;  %v1249_v45 = vmul.f32 %v1233_v13, %v561_v57 }
 0x173   : > { %v1407_v56 = vmul.f32 %v3441_v6, %v3441_v6 }
 0x174   : > { %v1257_v24 = vpack.c.bf16 %v1249_v45, %v1248_v19 }
 0x175   : > { %v3449_v34 = vmin.f32 %v1407_v56, 16.0  ;;  %535 = vmatmul.bf16.gmra.mxu1 %v2614_v48 }
 0x176   : > { %v1337_v37 = vpop.f32.mrf.mxu2 }
 0x177   : > { %v1420_v59 = vmul.f32 3.8918573e-05, %v3449_v34  ;;  %v3456_v27 = vadd.f32 %v3419_v4, %v1337_v37  ;;  %v1409_v15 = vmul.f32 2.1237322e-06, %v3449_v34 }
 0x179   : > { %v1421_v33 = vadd.f32 0.001143296, %v1420_v59  ;;  %v3460_v21 = vmul.f32 0.70710677, %v3456_v27  ;;  %v1410_v53 = vadd.f32 0.00028619796, %v1409_v15 }
 0x17b   : > { %v1422_v5 = vmul.f32 %v1421_v33, %v3449_v34  ;;  %v1447_v63 = vmul.f32 %v3460_v21, %v3460_v21  ;;  %v1411_v39 = vmul.f32 %v1410_v53, %v3449_v34 }
 0x17d   : > { %v1423_v42 = vadd.f32 0.014752088, %v1422_v5  ;;  %v3468_v14 = vmin.f32 %v1447_v63, 16.0  ;;  %v1412_v28 = vadd.f32 0.0036580483, %v1411_v39  ;;  %v2534_v63 = vld [vmem:[%s4189_s5 + $0x38] sm:$0xff] }
 0x17e   : > { %2171 = vmatpush.bf16.msra.mxu3 %v2534_v63  ;;  %v2533_v39 = vld [vmem:[%s4189_s5 + $0x30] sm:$0xff]  ;;  %v2530_v63 = vld [vmem:[%s4189_s5 + $0x18] sm:$0xff] }
 0x17f   : > { %v1424_v62 = vmul.f32 %v1423_v42, %v3449_v34  ;;  %v1460_v36 = vmul.f32 3.8918573e-05, %v3468_v14  ;;  %v1449_v8 = vmul.f32 2.1237322e-06, %v3468_v14  ;;  %v1413_v60 = vmul.f32 %v1412_v28, %v3449_v34 }
 0x181   : > { %v1425_v18 = vadd.f32 0.112945676, %v1424_v62  ;;  %v1461_v0 = vadd.f32 0.001143296, %v1460_v36  ;;  %v1450_v12 = vadd.f32 0.00028619796, %v1449_v8 }
 0x182   : > { %1369 = vmatmul.bf16.gmra.mxu2 %v1257_v24  ;;  %v1414_v38 = vadd.f32 0.05243302, %v1413_v60  ;;  %2172 = vmatpush.bf16.msra.mxu3 %v2533_v39 }
 0x183   : > { %v1426_v26 = vmul.f32 %v1425_v18, %v3449_v34  ;;  %v1462_v32 = vmul.f32 %v1461_v0, %v3468_v14  ;;  %v1340_v58 = vpop.f32.mrf.mxu2  ;;  %v1451_v47 = vmul.f32 %v1450_v12, %v3468_v14 }
 0x184   : > { %v3478_v44 = vadd.f32 %v3419_v4, %v1340_v58  ;;  %v1415_v22 = vmul.f32 %v1414_v38, %v3449_v34 }
 0x185   : > { %v1427_v3 = vadd.f32 0.4994258, %v1426_v26  ;;  %v1463_v35 = vadd.f32 0.014752088, %v1462_v32  ;;  %540 = vmatmul.bf16.gmra.mxu1 %v2615_v29  ;;  %v1452_v46 = vadd.f32 0.0036580483, %v1451_v47 }
 0x186   : > { %v3484_v55 = vmul.f32 0.70710677, %v3478_v44  ;;  %v1416_v57 = vadd.f32 0.18741608, %v1415_v22 }
 0x187   : > { %v1428_v11 = vmul.f32 %v1427_v3, %v3449_v34  ;;  %v1464_v10 = vmul.f32 %v1463_v35, %v3468_v14  ;;  %v1453_v59 = vmul.f32 %v1452_v46, %v3468_v14  ;;  %v2532_v46 = vld [vmem:[%s4189_s5 + $0x28] sm:$0xff] }
 0x188   : > { %v1487_v7 = vmul.f32 %v3484_v55, %v3484_v55  ;;  %2173 = vmatpush.bf16.msra.mxu3 %v2532_v46 }
 0x189   : > { %v3474_v20 = vadd.f32 1.0, %v1428_v11  ;;  %v1465_v51 = vadd.f32 0.112945676, %v1464_v10  ;;  %v1454_v42 = vadd.f32 0.05243302, %v1453_v59  ;;  %v1417_v11 = vmul.f32 %v1416_v57, %v3449_v34 }
 0x18a   : > { %v3491_v50 = vmin.f32 %v1487_v7, 16.0  ;;  %v2616_v10 = vld [vmem:[%s4186_s2] sm:$0x3] }
 0x18b   : > { %2577 = vrcp.f32 %v3474_v20  ;;  %v1466_v9 = vmul.f32 %v1465_v51, %v3468_v14  ;;  %v1342_v30 = vpop.f32.mrf.mxu2  ;;  %v1455_v19 = vmul.f32 %v1454_v42, %v3468_v14  ;;  %vm1435_vm1 = vweird.f32 %v3474_v20 }
 0x18c   : > { %v1489_v61 = vmul.f32 2.1237322e-06, %v3491_v50  ;;  %v1500_v2 = vmul.f32 3.8918573e-05, %v3491_v50  ;;  %v3501_v23 = vadd.f32 %v3419_v4, %v1342_v30  ;;  %v1441_v34 = vand.u32 2147483648, %v3474_v20 }
 0x18d   : > { %v1467_v40 = vadd.f32 0.4994258, %v1466_v9  ;;  %v1456_v12 = vadd.f32 0.18741608, %v1455_v19  ;;  %v1439_v51 = vand.u32 2147483647, %v3474_v20 }
 0x18e   : > { %v1490_v25 = vadd.f32 0.00028619796, %v1489_v61  ;;  %v1501_v16 = vadd.f32 0.001143296, %v1500_v2  ;;  %v3508_v33 = vmul.f32 0.70710677, %v3501_v23 }
 0x18f   : > { %v1468_v56 = vmul.f32 %v1467_v40, %v3468_v14  ;;  %v1418_v9 = vadd.f32 1.1283791, %v1417_v11  ;;  %v1457_v30 = vmul.f32 %v1456_v12, %v3468_v14  ;;  %vm1440_vm4 = vcmp.eq.f32.partialorder %v1439_v51, 8.507059e+37  ;;  %v2531_v14 = vld [vmem:[%s4189_s5 + $0x20] sm:$0xff] }
 0x190   : > { %v1502_v31 = vmul.f32 %v1501_v16, %v3491_v50  ;;  %v1491_v49 = vmul.f32 %v1490_v25, %v3491_v50  ;;  %v1527_v48 = vmul.f32 %v3508_v33, %v3508_v33  ;;  %2174 = vmatpush.bf16.msra.mxu3 %v2531_v14  ;;  %v3607_v51 = vperm.slane %v2616_v10, 1 }
 0x191   : > { %v3493_v17 = vpop.eup %2577  ;;  %v3503_v43 = vadd.f32 1.0, %v1468_v56  ;;  %v1442_v56 = vor.u32 1.1754944e-38, %v1441_v34  ;;  %v1458_v42 = vadd.f32 1.1283791, %v1457_v30 }
 0x192   : > { %v1431_v54 = vmul.f32 %v3493_v17, %v3474_v20  ;;  %v1503_v37 = vadd.f32 0.014752088, %v1502_v31  ;;  %v3516_v62 = vmin.f32 %v1527_v48, 16.0  ;;  %v1492_v18 = vadd.f32 0.0036580483, %v1491_v49  ;;  %v506_v48 = vpop.f32.mrf.mxu1 }
 0x193   : > { %2579 = vrcp.f32 %v3503_v43  ;;  %vm1436_vm0 = vweird.f32 %v3493_v17  ;;  %vm1475_vm5 = vweird.f32 %v3503_v43  ;;  %v1479_v16 = vand.u32 2147483647, %v3503_v43 }
 0x194   : > { %v1432_v5 = vsub.f32 1.0, %v1431_v54  ;;  %v1504_v13 = vmul.f32 %v1503_v37, %v3491_v50  ;;  %v1529_v15 = vmul.f32 2.1237322e-06, %v3516_v62  ;;  %v1540_v26 = vmul.f32 3.8918573e-05, %v3516_v62  ;;  %vm3542_vm2 = vmor %vm1435_vm1, %vm1436_vm0  ;;  %2175 = vmatpush.bf16.msra.mxu3 %v2530_v63 }
 0x195   : > { %v1493_v32 = vmul.f32 %v1492_v18, %v3491_v50  ;;  %v1419_v31 = vmul.f32 %v1418_v9, %v3441_v6  ;;  %vm1480_vm7 = vcmp.eq.f32.partialorder %v1479_v16, 8.507059e+37  ;;  %v507_v14 = vadd.f32 %v506_v48, %v3607_v51 }
 0x196   : > { %v1433_v52 = vmul.f32 %v3493_v17, %v1432_v5  ;;  %v1505_v45 = vadd.f32 0.112945676, %v1504_v13  ;;  %v1530_v53 = vadd.f32 0.00028619796, %v1529_v15  ;;  %v1541_v36 = vadd.f32 0.001143296, %v1540_v26 }
 0x197   : > { %v1494_v61 = vadd.f32 0.05243302, %v1493_v32  ;;  %v2529_v32 = vld [vmem:[%s4189_s5 + $0x10] sm:$0xff] }
 0x198   : > { %v1506_v24 = vmul.f32 %v1505_v45, %v3491_v50  ;;  %v1434_v0 = vadd.f32 %v3493_v17, %v1433_v52  ;;  %v1531_v35 = vmul.f32 %v1530_v53, %v3516_v62  ;;  %v1542_v29 = vmul.f32 %v1541_v36, %v3516_v62  ;;  %2176 = vmatpush.bf16.msra.mxu3 %v2529_v32 }
 0x199   : > { %v3522_v1 = vpop.eup %2579  ;;  %v1495_v5 = vmul.f32 %v1494_v61, %v3491_v50  ;;  %v2528_v61 = vld [vmem:[%s4189_s5 + $0x8] sm:$0xff] }
 0x19a   : > { %v1471_v3 = vmul.f32 %v3522_v1, %v3503_v43  ;;  %v1507_v58 = vadd.f32 0.4994258, %v1506_v24  ;;  %v1532_v7 = vadd.f32 0.0036580483, %v1531_v35  ;;  %v1543_v60 = vadd.f32 0.014752088, %v1542_v29 }
 0x19b   : > { %v1438_v40 = vsel %vm3542_vm2, %v3493_v17, %v1434_v0  ;;  %vm1476_vm3 = vweird.f32 %v3522_v1  ;;  %v1481_v17 = vand.u32 2147483648, %v3503_v43  ;;  %v1496_v26 = vadd.f32 0.18741608, %v1495_v5 }
 0x19c   : > { %v1472_v8 = vsub.f32 1.0, %v1471_v3  ;;  %v1508_v47 = vmul.f32 %v1507_v58, %v3491_v50  ;;  %v1533_v38 = vmul.f32 %v1532_v7, %v3516_v62  ;;  %v1544_v20 = vmul.f32 %v1543_v60, %v3516_v62  ;;  %vm3569_vm6 = vmor %vm1475_vm5, %vm1476_vm3  ;;  %v508_v7 = vpop.f32.mrf.mxu1  ;;  %2177 = vmatpush.bf16.msra.mxu3 %v2528_v61 }
 0x19d   : > { %v1443_v25 = vsel %vm1440_vm4, %v1442_v56, %v1438_v40  ;;  %v1482_v52 = vor.u32 1.1754944e-38, %v1481_v17  ;;  %v1459_v3 = vmul.f32 %v1458_v42, %v3460_v21  ;;  %v1375_v58 = vmul.f32 0.5, %v3431_v41 }
 0x19e   : > { %v1473_v28 = vmul.f32 %v3522_v1, %v1472_v8  ;;  %v3554_v2 = vadd.f32 1.0, %v1508_v47  ;;  %v1545_v59 = vadd.f32 0.112945676, %v1544_v20  ;;  %v1534_v49 = vadd.f32 0.05243302, %v1533_v38 }
 0x19f   : > { %v1444_v6 = vmul.f32 %v1443_v25, %v1419_v31  ;;  %v1497_v21 = vmul.f32 %v1496_v26, %v3491_v50  ;;  %v1376_v60 = vmul.f32 0.5, %v3456_v27  ;;  %v509_v5 = vadd.f32 %v508_v7, %v3607_v51 }
 0x1a0   : > { %v1474_v54 = vadd.f32 %v3522_v1, %v1473_v28  ;;  %2581 = vrcp.f32 %v3554_v2  ;;  %v1546_v13 = vmul.f32 %v1545_v59, %v3516_v62  ;;  %v1535_v19 = vmul.f32 %v1534_v49, %v3516_v62 }
 0x1a1   : > { %v2445_v11 = vclamps-f32 %v1444_v6, 1.0  ;;  %v1521_v28 = vand.u32 2147483648, %v3554_v2  ;;  %v1498_v38 = vadd.f32 1.1283791, %v1497_v21  ;;  %vm1515_vm9 = vweird.f32 %v3554_v2 }
 0x1a2   : > { %v1478_v43 = vsel %vm3569_vm6, %v3522_v1, %v1474_v54  ;;  %v1547_v18 = vadd.f32 0.4994258, %v1546_v13  ;;  %v1536_v35 = vadd.f32 0.18741608, %v1535_v19  ;;  %v1519_v20 = vand.u32 2147483647, %v3554_v2 }
 0x1a3   : > { %v1483_v15 = vsel %vm1480_vm7, %v1482_v52, %v1478_v43  ;;  %v2047_v47 = vadd.f32 1.0, %v2445_v11  ;;  %v1522_v27 = vor.u32 1.1754944e-38, %v1521_v28  ;;  %v1499_v42 = vmul.f32 %v1498_v38, %v3484_v55 }
 0x1a4   : > { %v1345_v37 = vpop.f32.mrf.mxu2  ;;  %v1548_v53 = vmul.f32 %v1547_v18, %v3516_v62  ;;  %v1484_v0 = vmul.f32 %v1483_v15, %v1459_v3  ;;  %v1537_v56 = vmul.f32 %v1536_v35, %v3516_v62  ;;  %vm1520_vm11 = vcmp.eq.f32.partialorder %v1519_v20, 8.507059e+37  ;;  %v511_v11 = vpop.f32.mrf.mxu1 }
 0x1a5   : > { %v3579_v57 = vadd.f32 %v3419_v4, %v1345_v37  ;;  %v2527_v37 = vld [vmem:[%s4189_s5] sm:$0xff] }
 0x1a6   : > { %v2582_v45 = vpop.eup %2581  ;;  %v3593_v39 = vadd.f32 1.0, %v1548_v53  ;;  %v2446_v46 = vclamps-f32 %v1484_v0, 1.0  ;;  %v1538_v43 = vadd.f32 1.1283791, %v1537_v56  ;;  %2178 = vmatpush.bf16.msra.mxu3 %v2527_v37  ;;  %v1378_v37 = vmul.f32 0.5, %v3501_v23 }
 0x1a7   : > { %v3586_v1 = vmul.f32 0.70710677, %v3579_v57  ;;  %v1511_v24 = vmul.f32 %v2582_v45, %v3554_v2  ;;  %vm1516_vm8 = vweird.f32 %v2582_v45  ;;  %v2063_v2 = vmul.f32 %v2047_v47, %v1375_v58 }
 0x1a8   : > { %2583 = vrcp.f32 %v3593_v39  ;;  %vm3621_vm10 = vmor %vm1515_vm9, %vm1516_vm8  ;;  %v2048_v25 = vadd.f32 1.0, %v2446_v46  ;;  %v1559_v19 = vand.u32 2147483647, %v3593_v39  ;;  %vm1555_vm13 = vweird.f32 %v3593_v39 }
 0x1a9   : > { %v1567_v36 = vmul.f32 %v3586_v1, %v3586_v1  ;;  %v1512_v8 = vsub.f32 1.0, %v1511_v24  ;;  %v2079_v26 = vadd.f32 %v2063_v2, %v507_v14  ;;  %v1539_v7 = vmul.f32 %v1538_v43, %v3508_v33 }
 0x1aa   : > { %v2064_v49 = vmul.f32 %v2048_v25, %v1376_v60  ;;  %vm1560_vm15 = vcmp.eq.f32.partialorder %v1559_v19, 8.507059e+37  ;;  %v1377_v2 = vmul.f32 0.5, %v3478_v44 }
 0x1ab   : > { %v3600_v29 = vmin.f32 %v1567_v36, 16.0  ;;  %v1513_v12 = vmul.f32 %v2582_v45, %v1512_v8 }
 0x1ac   : > { %v1347_v34 = vpop.f32.mrf.mxu2  ;;  %v2080_v18 = vadd.f32 %v2064_v49, %v509_v5  ;;  %v513_v5 = vpop.f32.mrf.mxu1 }
 0x1ad   : > { %v1569_v41 = vmul.f32 2.1237322e-06, %v3600_v29  ;;  %v3611_v50 = vadd.f32 %v3419_v4, %v1347_v34  ;;  %v1514_v9 = vadd.f32 %v2582_v45, %v1513_v12  ;;  %v1580_v40 = vmul.f32 3.8918573e-05, %v3600_v29 }
 0x1ae   : > { %v2584_v31 = vpop.eup %2583  ;;  %v2095_v0 = vpack.c.bf16 %v2080_v18, %v2079_v26 }
 0x1af   : > { %v1581_v54 = vadd.f32 0.001143296, %v1580_v40  ;;  %v3626_v17 = vmul.f32 0.70710677, %v3611_v50  ;;  %v1518_v16 = vsel %vm3621_vm10, %v2582_v45, %v1514_v9  ;;  %v1570_v59 = vadd.f32 0.00028619796, %v1569_v41 }
 0x1b0   : > { %v1551_v48 = vmul.f32 %v2584_v31, %v3593_v39  ;;  %v1523_v13 = vsel %vm1520_vm11, %v1522_v27, %v1518_v16  ;;  %v1561_v45 = vand.u32 2147483648, %v3593_v39  ;;  %vm1556_vm12 = vweird.f32 %v2584_v31  ;;  %2179 = vmatmul.bf16.vlgmr.msra.gmra.mxu3 %v2095_v0 }
 0x1b1   : > { %v1582_v62 = vmul.f32 %v1581_v54, %v3600_v29  ;;  %v1607_v22 = vmul.f32 %v3626_v17, %v3626_v17  ;;  %v1571_v15 = vmul.f32 %v1570_v59, %v3600_v29  ;;  %v1524_v53 = vmul.f32 %v1523_v13, %v1499_v42  ;;  %vm1557_vm14 = vmor %vm1555_vm13, %vm1556_vm12 }
 0x1b2   : > { %v1552_v63 = vsub.f32 1.0, %v1551_v48  ;;  %v1562_v35 = vor.u32 1.1754944e-38, %v1561_v45  ;;  %v512_v42 = vadd.f32 %v511_v11, %v3607_v51 }
 0x1b3   : > { %v1583_v6 = vadd.f32 0.014752088, %v1582_v62  ;;  %v3640_v52 = vmin.f32 %v1607_v22, 16.0  ;;  %v1572_v34 = vadd.f32 0.0036580483, %v1571_v15  ;;  %v2447_v9 = vclamps-f32 %v1524_v53, 1.0 }
 0x1b4   : > { %v1553_v36 = vmul.f32 %v2584_v31, %v1552_v63  ;;  %v514_v63 = vadd.f32 %v513_v5, %v3607_v51 }
 0x1b5   : > { %v1584_v55 = vmul.f32 %v1583_v6, %v3600_v29  ;;  %v1609_v3 = vmul.f32 2.1237322e-06, %v3640_v52  ;;  %v1620_v24 = vmul.f32 3.8918573e-05, %v3640_v52  ;;  %v1573_v20 = vmul.f32 %v1572_v34, %v3600_v29 }
 0x1b6   : > { %v1554_v21 = vadd.f32 %v2584_v31, %v1553_v36  ;;  %v2049_v54 = vadd.f32 1.0, %v2447_v9 }
 0x1b7   : > { %v1585_v8 = vadd.f32 0.112945676, %v1584_v55  ;;  %v1610_v32 = vadd.f32 0.00028619796, %v1609_v3  ;;  %v1621_v58 = vadd.f32 0.001143296, %v1620_v24 }
 0x1b8   : > { %v1558_v60 = vsel %vm1557_vm14, %v2584_v31, %v1554_v21  ;;  %v1574_v31 = vadd.f32 0.05243302, %v1573_v20  ;;  %v2065_v6 = vmul.f32 %v2049_v54, %v1377_v2 }
 0x1b9   : > { %v1586_v28 = vmul.f32 %v1585_v8, %v3600_v29  ;;  %v1611_v10 = vmul.f32 %v1610_v32, %v3640_v52  ;;  %v1622_v41 = vmul.f32 %v1621_v58, %v3640_v52  ;;  %v1563_v39 = vsel %vm1560_vm15, %v1562_v35, %v1558_v60 }
 0x1ba   : > { %v1350_v12 = vpop.f32.mrf.mxu2  ;;  %v1564_v38 = vmul.f32 %v1563_v39, %v1539_v7  ;;  %v1575_v23 = vmul.f32 %v1574_v31, %v3600_v29  ;;  %v2081_v32 = vadd.f32 %v2065_v6, %v512_v42 }
 0x1bb   : > { %v3653_v47 = vadd.f32 %v3419_v4, %v1350_v12  ;;  %v1587_v40 = vadd.f32 0.4994258, %v1586_v28  ;;  %v1612_v46 = vadd.f32 0.0036580483, %v1611_v10  ;;  %v1623_v61 = vadd.f32 0.014752088, %v1622_v41 }
 0x1bc   : > { %v2448_v25 = vclamps-f32 %v1564_v38, 1.0  ;;  %v1576_v58 = vadd.f32 0.18741608, %v1575_v23 }
 0x1bd   : > { %v3658_v56 = vmul.f32 0.70710677, %v3653_v47  ;;  %v1588_v30 = vmul.f32 %v1587_v40, %v3600_v29  ;;  %v1624_v27 = vmul.f32 %v1623_v61, %v3640_v52  ;;  %v1613_v59 = vmul.f32 %v1612_v46, %v3640_v52 }
 0x1be   : > { %v2050_v49 = vadd.f32 1.0, %v2448_v25  ;;  %v1577_v9 = vmul.f32 %v1576_v58, %v3600_v29 }
 0x1bf   : > { %v1647_v33 = vmul.f32 %v3658_v56, %v3658_v56  ;;  %v3664_v16 = vadd.f32 1.0, %v1588_v30  ;;  %v1625_v14 = vadd.f32 0.112945676, %v1624_v27  ;;  %v1614_v44 = vadd.f32 0.05243302, %v1613_v59 }
 0x1c0   : > { %v2066_v45 = vmul.f32 %v2050_v49, %v1378_v37  ;;  %v1578_v59 = vadd.f32 1.1283791, %v1577_v9 }
 0x1c1   : > { %v3668_v62 = vmin.f32 %v1647_v33, 16.0  ;;  %2585 = vrcp.f32 %v3664_v16  ;;  %v1626_v43 = vmul.f32 %v1625_v14, %v3640_v52  ;;  %v1615_v11 = vmul.f32 %v1614_v44, %v3640_v52 }
 0x1c2   : > { %v1352_v22 = vpop.f32.mrf.mxu2  ;;  %v2082_v3 = vadd.f32 %v2066_v45, %v514_v63  ;;  %v1599_v40 = vand.u32 2147483647, %v3664_v16  ;;  %v1601_v61 = vand.u32 2147483648, %v3664_v16  ;;  %vm1595_vm1 = vweird.f32 %v3664_v16 }
 0x1c3   : > { %v1649_v48 = vmul.f32 2.1237322e-06, %v3668_v62  ;;  %v1660_v13 = vmul.f32 3.8918573e-05, %v3668_v62  ;;  %v3677_v18 = vadd.f32 %v3419_v4, %v1352_v22  ;;  %v1627_v15 = vadd.f32 0.4994258, %v1626_v43 }
 0x1c4   : > { %v2096_v28 = vpack.c.bf16 %v2082_v3, %v2081_v32  ;;  %v1616_v7 = vadd.f32 0.18741608, %v1615_v11  ;;  %vm1600_vm3 = vcmp.eq.f32.partialorder %v1599_v40, 8.507059e+37  ;;  %v1602_v22 = vor.u32 1.1754944e-38, %v1601_v61 }
 0x1c5   : > { %v1650_v26 = vadd.f32 0.00028619796, %v1649_v48  ;;  %v1661_v19 = vadd.f32 0.001143296, %v1660_v13  ;;  %v3682_v55 = vmul.f32 0.70710677, %v3677_v18  ;;  %v1628_v24 = vmul.f32 %v1627_v15, %v3640_v52 }
 0x1c6   : > { %2184 = vmatmul.bf16.gmra.mxu3 %v2096_v28  ;;  %v1617_v54 = vmul.f32 %v1616_v7, %v3640_v52  ;;  %v1579_v15 = vmul.f32 %v1578_v59, %v3586_v1 }
 0x1c7   : > { %v1651_v53 = vmul.f32 %v1650_v26, %v3668_v62  ;;  %v2586_v36 = vpop.eup %2585  ;;  %v1662_v0 = vmul.f32 %v1661_v19, %v3668_v62  ;;  %v1687_v8 = vmul.f32 %v3682_v55, %v3682_v55  ;;  %v1629_v35 = vadd.f32 1.0, %v1628_v24 }
 0x1c8   : > { %v1591_v21 = vmul.f32 %v2586_v36, %v3664_v16  ;;  %vm1596_vm0 = vweird.f32 %v2586_v36  ;;  %v1618_v42 = vadd.f32 1.1283791, %v1617_v54 }
 0x1c9   : > { %v1663_v34 = vadd.f32 0.014752088, %v1662_v0  ;;  %v3691_v12 = vmin.f32 %v1687_v8, 16.0  ;;  %2587 = vrcp.f32 %v1629_v35  ;;  %v1652_v41 = vadd.f32 0.0036580483, %v1651_v53  ;;  %vm3703_vm2 = vmor %vm1595_vm1, %vm1596_vm0 }
 0x1ca   : > { %v1592_v10 = vsub.f32 1.0, %v1591_v21  ;;  %v1639_v48 = vand.u32 2147483647, %v1629_v35  ;;  %v1641_v13 = vand.u32 2147483648, %v1629_v35  ;;  %vm1635_vm5 = vweird.f32 %v1629_v35 }
 0x1cb   : > { %v1664_v60 = vmul.f32 %v1663_v34, %v3668_v62  ;;  %v1700_v46 = vmul.f32 3.8918573e-05, %v3691_v12  ;;  %v1689_v20 = vmul.f32 2.1237322e-06, %v3691_v12  ;;  %v1653_v27 = vmul.f32 %v1652_v41, %v3668_v62 }
 0x1cc   : > { %v1593_v39 = vmul.f32 %v2586_v36, %v1592_v10  ;;  %v1619_v32 = vmul.f32 %v1618_v42, %v3626_v17  ;;  %vm1640_vm7 = vcmp.eq.f32.partialorder %v1639_v48, 8.507059e+37  ;;  %v1642_v1 = vor.u32 1.1754944e-38, %v1641_v13 }
 0x1cd   : > { %v1665_v38 = vadd.f32 0.112945676, %v1664_v60  ;;  %v1701_v33 = vadd.f32 0.001143296, %v1700_v46  ;;  %v1690_v49 = vadd.f32 0.00028619796, %v1689_v20 }
 0x1ce   : > { %v1594_v30 = vadd.f32 %v2586_v36, %v1593_v39  ;;  %v1654_v16 = vadd.f32 0.05243302, %v1653_v27  ;;  %v1380_v27 = vmul.f32 0.5, %v3611_v50  ;;  %v3752_v50 = vmul.f32 0.5, %v3653_v47 }
 0x1cf   : > { %v1666_v29 = vmul.f32 %v1665_v38, %v3668_v62  ;;  %v2588_v25 = vpop.eup %2587  ;;  %v1702_v2 = vmul.f32 %v1701_v33, %v3691_v12  ;;  %v1691_v19 = vmul.f32 %v1690_v49, %v3691_v12 }
 0x1d0   : > { %v1598_v31 = vsel %vm3703_vm2, %v2586_v36, %v1594_v30  ;;  %v1631_v5 = vmul.f32 %v2588_v25, %v1629_v35  ;;  %vm1636_vm4 = vweird.f32 %v2588_v25  ;;  %v1655_v3 = vmul.f32 %v1654_v16, %v3668_v62  ;;  %v516_v36 = vpop.f32.mrf.mxu1 }
 0x1d1   : > { %v1667_v37 = vadd.f32 0.4994258, %v1666_v29  ;;  %v1703_v52 = vadd.f32 0.014752088, %v1702_v2  ;;  %v1603_v44 = vsel %vm1600_vm3, %v1602_v22, %v1598_v31  ;;  %vm1637_vm6 = vmor %vm1635_vm5, %vm1636_vm4  ;;  %v1692_v21 = vadd.f32 0.0036580483, %v1691_v19 }
 0x1d2   : > { %v1632_v43 = vsub.f32 1.0, %v1631_v5  ;;  %v1604_v11 = vmul.f32 %v1603_v44, %v1579_v15  ;;  %v1656_v41 = vadd.f32 0.18741608, %v1655_v3  ;;  %v1379_v30 = vmul.f32 0.5, %v3579_v57 }
 0x1d3   : > { %v1668_v63 = vmul.f32 %v1667_v37, %v3668_v62  ;;  %v1704_v45 = vmul.f32 %v1703_v52, %v3691_v12  ;;  %v1693_v40 = vmul.f32 %v1692_v21, %v3691_v12  ;;  %v517_v42 = vadd.f32 %v516_v36, %v3607_v51 }
 0x1d4   : > { %v1633_v26 = vmul.f32 %v2588_v25, %v1632_v43  ;;  %v2449_v17 = vclamps-f32 %v1604_v11, 1.0  ;;  %v1657_v29 = vmul.f32 %v1656_v41, %v3668_v62  ;;  %v3756_v62 = vmul.f32 0.5, %v3677_v18 }
 0x1d5   : > { %v1355_v6 = vpop.f32.mrf.mxu2  ;;  %v3718_v24 = vadd.f32 1.0, %v1668_v63  ;;  %v1705_v53 = vadd.f32 0.112945676, %v1704_v45  ;;  %v1694_v16 = vadd.f32 0.05243302, %v1693_v40 }
 0x1d6   : > { %v3713_v23 = vadd.f32 %v3419_v4, %v1355_v6  ;;  %v1634_v0 = vadd.f32 %v2588_v25, %v1633_v26  ;;  %v2051_v14 = vadd.f32 1.0, %v2449_v17  ;;  %v1658_v44 = vadd.f32 1.1283791, %v1657_v29 }
 0x1d7   : > { %2589 = vrcp.f32 %v3718_v24  ;;  %v1706_v34 = vmul.f32 %v1705_v53, %v3691_v12  ;;  %vm1675_vm8 = vweird.f32 %v3718_v24  ;;  %v1695_v18 = vmul.f32 %v1694_v16, %v3691_v12 }
 0x1d8   : > { %v3721_v8 = vmul.f32 0.70710677, %v3713_v23  ;;  %v1638_v58 = vsel %vm1637_vm6, %v2588_v25, %v1634_v0  ;;  %v518_v57 = vpop.f32.mrf.mxu1  ;;  %v2067_v48 = vmul.f32 %v2051_v14, %v1379_v30  ;;  %v1679_v41 = vand.u32 2147483647, %v3718_v24 }
 0x1d9   : > { %v1643_v10 = vsel %vm1640_vm7, %v1642_v1, %v1638_v58  ;;  %v1707_v7 = vadd.f32 0.4994258, %v1706_v34  ;;  %v519_v47 = vadd.f32 %v518_v57, %v3607_v51  ;;  %v1696_v17 = vadd.f32 0.18741608, %v1695_v18 }
 0x1da   : > { %v1727_v28 = vmul.f32 %v3721_v8, %v3721_v8  ;;  %v1644_v35 = vmul.f32 %v1643_v10, %v1619_v32  ;;  %v1681_v32 = vand.u32 2147483648, %v3718_v24  ;;  %v2083_v21 = vadd.f32 %v2067_v48, %v517_v42 }
 0x1db   : > { %v1708_v46 = vmul.f32 %v1707_v7, %v3691_v12  ;;  %vm1680_vm11 = vcmp.eq.f32.partialorder %v1679_v41, 8.507059e+37  ;;  %v3823_v18 = vmul.f32 0.5, %v3713_v23 }
 0x1dc   : > { %v3728_v60 = vmin.f32 %v1727_v28, 16.0  ;;  %v2450_v54 = vclamps-f32 %v1644_v35, 1.0 }
 0x1dd   : > { %v1357_v9 = vpop.f32.mrf.mxu2  ;;  %v3737_v20 = vpop.eup %2589  ;;  %v3747_v59 = vadd.f32 1.0, %v1708_v46 }
 0x1de   : > { %v3731_v39 = vadd.f32 %v3419_v4, %v1357_v9  ;;  %v1729_v61 = vmul.f32 2.1237322e-06, %v3728_v60  ;;  %v1740_v38 = vmul.f32 3.8918573e-05, %v3728_v60  ;;  %v1671_v25 = vmul.f32 %v3737_v20, %v3718_v24 }
 0x1df   : > { %v2052_v5 = vadd.f32 1.0, %v2450_v54  ;;  %2591 = vrcp.f32 %v3747_v59  ;;  %vm1676_vm9 = vweird.f32 %v3737_v20  ;;  %vm1715_vm13 = vweird.f32 %v3747_v59 }
 0x1e0   : > { %v3742_v33 = vmul.f32 0.70710677, %v3731_v39  ;;  %v1730_v2 = vadd.f32 0.00028619796, %v1729_v61  ;;  %v1741_v31 = vadd.f32 0.001143296, %v1740_v38  ;;  %v1659_v38 = vmul.f32 %v1658_v44, %v3658_v56  ;;  %vm3790_vm10 = vmor %vm1675_vm8, %vm1676_vm9 }
 0x1e1   : > { %v1672_v49 = vsub.f32 1.0, %v1671_v25  ;;  %v2068_v6 = vmul.f32 %v2052_v5, %v1380_v27 }
 0x1e2   : > { %v1767_v22 = vmul.f32 %v3742_v33, %v3742_v33  ;;  %v1731_v37 = vmul.f32 %v1730_v2, %v3728_v60  ;;  %v1742_v52 = vmul.f32 %v1741_v31, %v3728_v60  ;;  %v1682_v2 = vor.u32 1.1754944e-38, %v1681_v32 }
 0x1e3   : > { %v1673_v63 = vmul.f32 %v3737_v20, %v1672_v49  ;;  %v2084_v11 = vadd.f32 %v2068_v6, %v519_v47  ;;  %v1697_v49 = vmul.f32 %v1696_v17, %v3691_v12 }
 0x1e4   : > { %v3761_v43 = vmin.f32 %v1767_v22, 16.0  ;;  %v1732_v45 = vadd.f32 0.0036580483, %v1731_v37  ;;  %v1743_v15 = vadd.f32 0.014752088, %v1742_v52 }
 0x1e5   : > { %v1360_v13 = vpop.f32.mrf.mxu2  ;;  %v3774_v0 = vpop.eup %2591  ;;  %v1674_v34 = vadd.f32 %v3737_v20, %v1673_v63  ;;  %v2097_v61 = vpack.c.bf16 %v2084_v11, %v2083_v21  ;;  %v1698_v11 = vadd.f32 1.1283791, %v1697_v49 }
 0x1e6   : > { %v1769_v26 = vmul.f32 2.1237322e-06, %v3761_v43  ;;  %v1780_v19 = vmul.f32 3.8918573e-05, %v3761_v43  ;;  %v1733_v3 = vmul.f32 %v1732_v45, %v3728_v60  ;;  %v1744_v53 = vmul.f32 %v1743_v15, %v3728_v60 }
 0x1e7   : > { %v3772_v36 = vadd.f32 %v3419_v4, %v1360_v13  ;;  %v1711_v28 = vmul.f32 %v3774_v0, %v3747_v59  ;;  %v1678_v14 = vsel %vm3790_vm10, %v3737_v20, %v1674_v34  ;;  %2189 = vmatmul.bf16.gmra.mxu3 %v2097_v61  ;;  %v1721_v20 = vand.u32 2147483648, %v3747_v59  ;;  %v521_v13 = vpop.f32.mrf.mxu1 }
 0x1e8   : > { %v1770_v1 = vadd.f32 0.00028619796, %v1769_v26  ;;  %v1781_v58 = vadd.f32 0.001143296, %v1780_v19  ;;  %v1734_v10 = vadd.f32 0.05243302, %v1733_v3  ;;  %v1683_v37 = vsel %vm1680_vm11, %v1682_v2, %v1678_v14 }
 0x1e9   : > { %v1745_v35 = vadd.f32 0.112945676, %v1744_v53  ;;  %v1712_v40 = vsub.f32 1.0, %v1711_v28  ;;  %v3785_v46 = vmul.f32 0.70710677, %v3772_v36  ;;  %vm1716_vm12 = vweird.f32 %v3774_v0 }
 0x1ea   : > { %v1771_v7 = vmul.f32 %v1770_v1, %v3761_v43  ;;  %v1782_v9 = vmul.f32 %v1781_v58, %v3761_v43  ;;  %v1735_v31 = vmul.f32 %v1734_v10, %v3728_v60  ;;  %v1684_v15 = vmul.f32 %v1683_v37, %v1659_v38  ;;  %vm3830_vm14 = vmor %vm1715_vm13, %vm1716_vm12 }
 0x1eb   : > { %v1746_v27 = vmul.f32 %v1745_v35, %v3728_v60  ;;  %v1807_v56 = vmul.f32 %v3785_v46, %v3785_v46  ;;  %v1713_v24 = vmul.f32 %v3774_v0, %v1712_v40  ;;  %v1719_v3 = vand.u32 2147483647, %v3747_v59 }
 0x1ec   : > { %v1772_v54 = vadd.f32 0.0036580483, %v1771_v7  ;;  %v1783_v29 = vadd.f32 0.014752088, %v1782_v9  ;;  %v1736_v47 = vadd.f32 0.18741608, %v1735_v31  ;;  %v522_v49 = vadd.f32 %v521_v13, %v3607_v51 }
 0x1ed   : > { %v1362_v25 = vpop.f32.mrf.mxu2  ;;  %v1747_v22 = vadd.f32 0.4994258, %v1746_v27  ;;  %v3808_v16 = vmin.f32 %v1807_v56, 16.0  ;;  %v1714_v12 = vadd.f32 %v3774_v0, %v1713_v24  ;;  %v1722_v59 = vor.u32 1.1754944e-38, %v1721_v20  ;;  %v3864_v56 = vld [vmem:[%s4188_s4] ss:$0 sm:$0xff] }
 0x1ee   : > { %v1784_v57 = vmul.f32 %v1783_v29, %v3761_v43  ;;  %v3804_v5 = vadd.f32 %v3419_v4, %v1362_v25  ;;  %v1773_v42 = vmul.f32 %v1772_v54, %v3761_v43  ;;  %v1737_v34 = vmul.f32 %v1736_v47, %v3728_v60 }
 0x1ef   : > { %v1748_v52 = vmul.f32 %v1747_v22, %v3728_v60  ;;  %v1809_v4 = vmul.f32 2.1237322e-06, %v3808_v16  ;;  %v1820_v6 = vmul.f32 3.8918573e-05, %v3808_v16  ;;  %v1718_v21 = vsel %vm3830_vm14, %v3774_v0, %v1714_v12  ;;  %v523_v14 = vpop.f32.mrf.mxu1 }
 0x1f0   : > { %v1785_v48 = vadd.f32 0.112945676, %v1784_v57  ;;  %v3820_v45 = vmul.f32 0.70710677, %v3804_v5  ;;  %v1774_v53 = vadd.f32 0.05243302, %v1773_v42  ;;  %v1699_v54 = vmul.f32 %v1698_v11, %v3682_v55 }
 0x1f1   : > { %v3816_v44 = vadd.f32 1.0, %v1748_v52  ;;  %v1810_v26 = vadd.f32 0.00028619796, %v1809_v4  ;;  %v1821_v19 = vadd.f32 0.001143296, %v1820_v6  ;;  %v2451_v7 = vclamps-f32 %v1684_v15, 1.0 }
 0x1f2   : > { %v1786_v63 = vmul.f32 %v1785_v48, %v3761_v43  ;;  %v1847_v28 = vmul.f32 %v3820_v45, %v3820_v45  ;;  %vm1720_vm15 = vcmp.eq.f32.partialorder %v1719_v3, 8.507059e+37  ;;  %v3844_v9 = vmul.f32 0.5, %v3731_v39 }
 0x1f3   : > { %2593 = vrcp.f32 %v3816_v44  ;;  %v1811_v23 = vmul.f32 %v1810_v26, %v3808_v16  ;;  %v1822_v58 = vmul.f32 %v1821_v19, %v3808_v16  ;;  %v1775_v17 = vmul.f32 %v1774_v53, %v3761_v43 }
 0x1f4   : > { %v1787_v1 = vadd.f32 0.4994258, %v1786_v63  ;;  %v3847_v40 = vmin.f32 %v1847_v28, 16.0  ;;  %v1723_v61 = vsel %vm1720_vm15, %v1722_v59, %v1718_v21  ;;  %v1738_v29 = vadd.f32 1.1283791, %v1737_v34 }
 0x1f5   : > { %v1812_v41 = vadd.f32 0.0036580483, %v1811_v23  ;;  %v1823_v35 = vadd.f32 0.014752088, %v1822_v58  ;;  %v1365_v0 = vpop.f32.mrf.mxu2  ;;  %v2053_v31 = vadd.f32 1.0, %v2451_v7  ;;  %v1724_v55 = vmul.f32 %v1723_v61, %v1699_v54 }
 0x1f6   : > { %v1788_v10 = vmul.f32 %v1787_v1, %v3761_v43  ;;  %v1849_v39 = vmul.f32 2.1237322e-06, %v3847_v40  ;;  %v1860_v25 = vmul.f32 3.8918573e-05, %v3847_v40  ;;  %v3867_v24 = vadd.f32 %v3864_v56, %v1365_v0 }
 0x1f7   : > { %v1813_v60 = vmul.f32 %v1812_v41, %v3808_v16  ;;  %v1824_v30 = vmul.f32 %v1823_v35, %v3808_v16  ;;  %v1776_v22 = vadd.f32 0.18741608, %v1775_v17  ;;  %v3870_v57 = vmul.f32 0.5, %v3772_v36 }
 0x1f8   : > { %v3849_v38 = vadd.f32 1.0, %v1788_v10  ;;  %v1850_v52 = vadd.f32 0.00028619796, %v1849_v39  ;;  %v3874_v42 = vadd.f32 %v523_v14, %v3607_v51  ;;  %v3877_v48 = vmul.f32 %v1738_v29, %v3721_v8 }
 0x1f9   : > { %v3853_v27 = vpop.eup %2593  ;;  %v1814_v20 = vadd.f32 0.05243302, %v1813_v60  ;;  %v1825_v37 = vadd.f32 0.112945676, %v1824_v30  ;;  %v1761_v4 = vand.u32 2147483648, %v3816_v44  ;;  %v2069_v63 = vmul.f32 %v2053_v31, %v3752_v50 }
 0x1fa   : > { %v1751_v2 = vmul.f32 %v3853_v27, %v3816_v44  ;;  %2595 = vrcp.f32 %v3849_v38  ;;  %v1861_v6 = vadd.f32 0.001143296, %v1860_v25  ;;  %v1851_v36 = vmul.f32 %v1850_v52, %v3847_v40 }
 0x1fb   : > { %v1826_v12 = vmul.f32 %v1825_v37, %v3808_v16  ;;  %v3884_v13 = vmul.f32 0.70710677, %v3867_v24  ;;  %vm1755_vm0 = vweird.f32 %v3816_v44  ;;  %v1759_v15 = vand.u32 2147483647, %v3816_v44 }
 0x1fc   : > { %v1752_v47 = vsub.f32 1.0, %v1751_v2  ;;  %v1777_v8 = vmul.f32 %v1776_v22, %v3761_v43  ;;  %v1862_v26 = vmul.f32 %v1861_v6, %v3847_v40  ;;  %v2452_v19 = vclamps-f32 %v1724_v55, 1.0 }
 0x1fd   : > { %v1815_v53 = vmul.f32 %v1814_v20, %v3808_v16  ;;  %v1827_v11 = vadd.f32 0.4994258, %v1826_v12  ;;  %v1852_v32 = vadd.f32 0.0036580483, %v1851_v36  ;;  %v1887_v50 = vmul.f32 %v3884_v13, %v3884_v13  ;;  %v1367_v0 = vpop.f32.mrf.mxu2  ;;  %v3945_v36 = vpop.f32.mrf.mxu1 }
 0x1fe   : > { %v1753_v1 = vmul.f32 %v3853_v27, %v1752_v47  ;;  %v1762_v23 = vor.u32 1.1754944e-38, %v1761_v4  ;;  %v1863_v21 = vadd.f32 0.014752088, %v1862_v26  ;;  %v3900_v34 = vadd.f32 %v2069_v63, %v522_v49 }
 0x1ff   : > { %v1828_v43 = vmul.f32 %v1827_v11, %v3808_v16  ;;  %v1853_v59 = vmul.f32 %v1852_v32, %v3847_v40  ;;  %v3902_v28 = vmin.f32 %v1887_v50, 16.0  ;;  %vm3904_vm1 = vcmp.eq.f32.partialorder %v1759_v15, 8.507059e+37 }
 0x200   : > { %v3890_v3 = vpop.eup %2595  ;;  %v1778_v41 = vadd.f32 1.1283791, %v1777_v8  ;;  %v1864_v7 = vmul.f32 %v1863_v21, %v3847_v40  ;;  %v2054_v17 = vadd.f32 1.0, %v2452_v19  ;;  %vm1756_vm2 = vweird.f32 %v3853_v27 }
 0x201   : > { %v1791_v58 = vmul.f32 %v3890_v3, %v3849_v38  ;;  %v1816_v61 = vadd.f32 0.18741608, %v1815_v53  ;;  %v3910_v60 = vadd.f32 1.0, %v1828_v43  ;;  %v1889_v30 = vmul.f32 2.1237322e-06, %v3902_v28  ;;  %vm3930_vm3 = vmor %vm1755_vm0, %vm1756_vm2 }
 0x202   : > { %v1754_v54 = vadd.f32 %v3853_v27, %v1753_v1  ;;  %v1799_v29 = vand.u32 2147483647, %v3849_v38  ;;  %v1865_v39 = vadd.f32 0.112945676, %v1864_v7  ;;  %v1900_v25 = vmul.f32 3.8918573e-05, %v3902_v28 }
 0x203   : > { %v1792_v35 = vsub.f32 1.0, %v1791_v58  ;;  %v1801_v14 = vand.u32 2147483648, %v3849_v38  ;;  %2597 = vrcp.f32 %v3910_v60  ;;  %v1854_v2 = vadd.f32 0.05243302, %v1853_v59 }
 0x204   : > { %v3919_v31 = vadd.f32 %v3864_v56, %v1367_v0  ;;  %v3922_v55 = vmul.f32 %v1778_v41, %v3742_v33  ;;  %v1866_v49 = vmul.f32 %v1865_v39, %v3847_v40  ;;  %v1890_v20 = vadd.f32 0.00028619796, %v1889_v30 }
 0x205   : > { %v1793_v22 = vmul.f32 %v3890_v3, %v1792_v35  ;;  %vm1795_vm4 = vweird.f32 %v3849_v38  ;;  %v1817_v52 = vmul.f32 %v1816_v61, %v3808_v16  ;;  %v1901_v47 = vadd.f32 0.001143296, %v1900_v25  ;;  %v1370_v59 = vpop.f32.mrf.mxu2  ;;  %v528_v37 = vpop.f32.mrf.mxu1 }
 0x206   : > { %v2070_v33 = vmul.f32 %v2054_v17, %v3756_v62  ;;  %v1758_v4 = vsel %vm3930_vm3, %v3853_v27, %v1754_v54  ;;  %vm3940_vm5 = vcmp.eq.f32.partialorder %v1799_v29, 8.507059e+37  ;;  %v1867_v44 = vadd.f32 0.4994258, %v1866_v49 }
 0x207   : > { %v1891_v12 = vmul.f32 %v1890_v20, %v3902_v28  ;;  %v1802_v63 = vor.u32 1.1754944e-38, %v1801_v14  ;;  %v1855_v15 = vmul.f32 %v1854_v2, %v3847_v40  ;;  %v1902_v16 = vmul.f32 %v1901_v47, %v3902_v28 }
 0x208   : > { %v3950_v62 = vmul.f32 0.70710677, %v3919_v31  ;;  %v1794_v8 = vadd.f32 %v3890_v3, %v1793_v22  ;;  %vm1796_vm6 = vweird.f32 %v3890_v3  ;;  %v1868_v27 = vmul.f32 %v1867_v44, %v3847_v40 }
 0x209   : > { %v1892_v26 = vadd.f32 0.0036580483, %v1891_v12  ;;  %v3955_v19 = vpop.eup %2597  ;;  %v1763_v53 = vsel %vm3904_vm1, %v1762_v23, %v1758_v4  ;;  %v1818_v11 = vadd.f32 1.1283791, %v1817_v52  ;;  %v1903_v32 = vadd.f32 0.014752088, %v1902_v16  ;;  %vm3969_vm7 = vmor %vm1795_vm4, %vm1796_vm6 }
 0x20a   : > { %v1927_v50 = vmul.f32 %v3950_v62, %v3950_v62  ;;  %v1831_v1 = vmul.f32 %v3955_v19, %v3910_v60  ;;  %v1839_v58 = vand.u32 2147483647, %v3910_v60  ;;  %v3964_v21 = vadd.f32 1.0, %v1868_v27 }
 0x20b   : > { %v2086_v43 = vadd.f32 %v2070_v33, %v3874_v42  ;;  %v1856_v23 = vadd.f32 0.18741608, %v1855_v15  ;;  %v1893_v41 = vmul.f32 %v1892_v26, %v3902_v28  ;;  %v1904_v35 = vmul.f32 %v1903_v32, %v3902_v28 }
 0x20c   : > { %v3975_v7 = vmin.f32 %v1927_v50, 16.0  ;;  %v1764_v17 = vmul.f32 %v1763_v53, %v3877_v48  ;;  %v1798_v42 = vsel %vm3969_vm7, %v3890_v3, %v1794_v8  ;;  %v1832_v0 = vsub.f32 1.0, %v1831_v1 }
 0x20d   : > { %2599 = vrcp.f32 %v3964_v21  ;;  %v3983_v38 = vmul.f32 %v1818_v11, %v3785_v46  ;;  %vm1835_vm8 = vweird.f32 %v3910_v60  ;;  %v1841_v61 = vand.u32 2147483648, %v3910_v60 }
 0x20e   : > { %v3988_v30 = vadd.f32 %v3864_v56, %v1370_v59  ;;  %v1833_v54 = vmul.f32 %v3955_v19, %v1832_v0  ;;  %v1905_v48 = vadd.f32 0.112945676, %v1904_v35  ;;  %v1929_v29 = vmul.f32 2.1237322e-06, %v3975_v7 }
 0x20f   : > { %v1940_v3 = vmul.f32 3.8918573e-05, %v3975_v7  ;;  %v1803_v39 = vsel %vm3940_vm5, %v1802_v63, %v1798_v42  ;;  %vm3995_vm9 = vcmp.eq.f32.partialorder %v1839_v58, 8.507059e+37  ;;  %v1857_v25 = vmul.f32 %v1856_v23, %v3847_v40 }
 0x210   : > { %v1894_v14 = vadd.f32 0.05243302, %v1893_v41  ;;  %v1906_v2 = vmul.f32 %v1905_v48, %v3902_v28  ;;  %v1930_v22 = vadd.f32 0.00028619796, %v1929_v29  ;;  %v2453_v20 = vclamps-f32 %v1764_v17, 1.0 }
 0x211   : > { %v1941_v49 = vadd.f32 0.001143296, %v1940_v3  ;;  %v1834_v52 = vadd.f32 %v3955_v19, %v1833_v54  ;;  %vm1836_vm10 = vweird.f32 %v3955_v19  ;;  %v4004_v47 = vmul.f32 0.70710677, %v3988_v30  ;;  %v4049_v3 = vpop.f32.mrf.mxu1 }
 0x212   : > { %v2098_v33 = vpack.c.bf16 %v2086_v43, %v3900_v34  ;;  %v1804_v40 = vmul.f32 %v1803_v39, %v3922_v55  ;;  %v1907_v6 = vadd.f32 0.4994258, %v1906_v2  ;;  %v1931_v44 = vmul.f32 %v1930_v22, %v3975_v7  ;;  %vm4017_vm11 = vmor %vm1835_vm8, %vm1836_vm10 }
 0x213   : > { %v4007_v4 = vpop.eup %2599  ;;  %v1942_v12 = vmul.f32 %v1941_v49, %v3975_v7  ;;  %v1842_v63 = vor.u32 1.1754944e-38, %v1841_v61  ;;  %v1858_v15 = vadd.f32 1.1283791, %v1857_v25  ;;  %v1895_v8 = vmul.f32 %v1894_v14, %v3902_v28 }
 0x214   : > { %v1871_v16 = vmul.f32 %v4007_v4, %v3964_v21  ;;  %2194 = vmatmul.bf16.gmra.mxu3 %v2098_v33  ;;  %v1908_v55 = vmul.f32 %v1907_v6, %v3902_v28  ;;  %v1932_v27 = vadd.f32 0.0036580483, %v1931_v44  ;;  %v527_v53 = vadd.f32 %v3945_v36, %v3607_v51 }
 0x215   : > { %v1943_v26 = vadd.f32 0.014752088, %v1942_v12  ;;  %v1838_v11 = vsel %vm4017_vm11, %v3955_v19, %v1834_v52  ;;  %v2055_v50 = vadd.f32 1.0, %v2453_v20  ;;  %v1967_v60 = vmul.f32 %v4004_v47, %v4004_v47  ;;  %v1372_v19 = vpop.f32.mrf.mxu2 }
 0x216   : > { %v1872_v32 = vsub.f32 1.0, %v1871_v16  ;;  %v4029_v1 = vadd.f32 1.0, %v1908_v55  ;;  %v1933_v58 = vmul.f32 %v1932_v27, %v3975_v7  ;;  %v2454_v59 = vclamps-f32 %v1804_v40, 1.0 }
 0x217   : > { %v1944_v43 = vmul.f32 %v1943_v26, %v3975_v7  ;;  %v1859_v10 = vmul.f32 %v1858_v15, %v3820_v45  ;;  %v1896_v23 = vadd.f32 0.18741608, %v1895_v8  ;;  %v4035_v41 = vmin.f32 %v1967_v60, 16.0 }
 0x218   : > { %v1873_v36 = vmul.f32 %v4007_v4, %v1872_v32  ;;  %v1843_v35 = vsel %vm3995_vm9, %v1842_v63, %v1838_v11  ;;  %vm1875_vm12 = vweird.f32 %v3964_v21  ;;  %v1879_v17 = vand.u32 2147483647, %v3964_v21 }
 0x219   : > { %2601 = vrcp.f32 %v4029_v1  ;;  %vm1876_vm13 = vweird.f32 %v4007_v4  ;;  %v1945_v45 = vadd.f32 0.112945676, %v1944_v43  ;;  %v1969_v0 = vmul.f32 2.1237322e-06, %v4035_v41 }
 0x21a   : > { %v1874_v42 = vadd.f32 %v4007_v4, %v1873_v36  ;;  %v1934_v61 = vadd.f32 0.05243302, %v1933_v58  ;;  %v1980_v54 = vmul.f32 3.8918573e-05, %v4035_v41  ;;  %v2056_v48 = vadd.f32 1.0, %v2454_v59  ;;  %vm4057_vm14 = vmor %vm1875_vm12, %vm1876_vm13  ;;  %v533_v36 = vpop.f32.mrf.mxu1 }
 0x21b   : > { %v4047_v29 = vadd.f32 %v3864_v56, %v1372_v19  ;;  %v1881_v39 = vand.u32 2147483648, %v3964_v21  ;;  %v1897_v46 = vmul.f32 %v1896_v23, %v3902_v28  ;;  %v1946_v25 = vmul.f32 %v1945_v45, %v3975_v7 }
 0x21c   : > { %v2071_v14 = vmul.f32 %v2055_v50, %v3823_v18  ;;  %v1970_v22 = vadd.f32 0.00028619796, %v1969_v0  ;;  %v1981_v49 = vadd.f32 0.001143296, %v1980_v54  ;;  %v529_v56 = vadd.f32 %v528_v37, %v3607_v51 }
 0x21d   : > { %v2072_v20 = vmul.f32 %v2056_v48, %v3844_v9  ;;  %v1844_v52 = vmul.f32 %v1843_v35, %v3983_v38  ;;  %v1878_v28 = vsel %vm4057_vm14, %v4007_v4, %v1874_v42  ;;  %vm1880_vm15 = vcmp.eq.f32.partialorder %v1879_v17, 8.507059e+37 }
 0x21e   : > { %v1947_v18 = vadd.f32 0.4994258, %v1946_v25  ;;  %v1935_v21 = vmul.f32 %v1934_v61, %v3975_v7  ;;  %v1982_v40 = vmul.f32 %v1981_v49, %v4035_v41  ;;  %v4070_v44 = vmul.f32 0.70710677, %v4047_v29 }
 0x21f   : > { %v2602_v33 = vpop.eup %2601  ;;  %v2088_v6 = vadd.f32 %v2072_v20, %v529_v56  ;;  %v1882_v37 = vor.u32 1.1754944e-38, %v1881_v39  ;;  %v2087_v12 = vadd.f32 %v2071_v14, %v527_v53  ;;  %v1898_v63 = vadd.f32 1.1283791, %v1897_v46 }
 0x220   : > { %v1911_v9 = vmul.f32 %v2602_v33, %v4029_v1  ;;  %v1948_v38 = vmul.f32 %v1947_v18, %v3975_v7  ;;  %v1971_v4 = vmul.f32 %v1970_v22, %v4035_v41  ;;  %v1983_v15 = vadd.f32 0.014752088, %v1982_v40 }
 0x221   : > { %v2007_v16 = vmul.f32 %v4070_v44, %v4070_v44  ;;  %v1883_v8 = vsel %vm1880_vm15, %v1882_v37, %v1878_v28  ;;  %v2099_v27 = vpack.c.bf16 %v2088_v6, %v2087_v12  ;;  %v1936_v26 = vadd.f32 0.18741608, %v1935_v21 }
 0x222   : > { %v1912_v34 = vsub.f32 1.0, %v1911_v9  ;;  %v4077_v55 = vadd.f32 1.0, %v1948_v38  ;;  %v1984_v11 = vmul.f32 %v1983_v15, %v4035_v41  ;;  %v2455_v50 = vclamps-f32 %v1844_v52, 1.0 }
 0x223   : > { %v4080_v32 = vmin.f32 %v2007_v16, 16.0  ;;  %vm1915_vm0 = vweird.f32 %v4029_v1  ;;  %vm1916_vm1 = vweird.f32 %v2602_v33  ;;  %v1884_v53 = vmul.f32 %v1883_v8, %v1859_v10  ;;  %v536_v8 = vpop.f32.mrf.mxu1 }
 0x224   : > { %v1913_v60 = vmul.f32 %v2602_v33, %v1912_v34  ;;  %2603 = vrcp.f32 %v4077_v55  ;;  %2199 = vmatmul.bf16.gmra.mxu3 %v2099_v27  ;;  %v1919_v58 = vand.u32 2147483647, %v4029_v1  ;;  %v1921_v43 = vand.u32 2147483648, %v4029_v1  ;;  %vm4092_vm2 = vmor %vm1915_vm0, %vm1916_vm1 }
 0x225   : > { %v1972_v59 = vadd.f32 0.0036580483, %v1971_v4  ;;  %v1985_v19 = vadd.f32 0.112945676, %v1984_v11  ;;  %v2009_v35 = vmul.f32 2.1237322e-06, %v4080_v32  ;;  %v1899_v45 = vmul.f32 %v1898_v63, %v3884_v13 }
 0x226   : > { %v1914_v23 = vadd.f32 %v2602_v33, %v1913_v60  ;;  %v2020_v17 = vmul.f32 3.8918573e-05, %v4080_v32  ;;  %v1386_v42 = vmul.f32 0.5, %v3804_v5  ;;  %v1937_v0 = vmul.f32 %v1936_v26, %v3975_v7 }
 0x227   : > { %v2057_v61 = vadd.f32 1.0, %v2455_v50  ;;  %v1986_v48 = vmul.f32 %v1985_v19, %v4035_v41  ;;  %v2010_v39 = vadd.f32 0.00028619796, %v2009_v35  ;;  %vm1920_vm3 = vcmp.eq.f32.partialorder %v1919_v58, 8.507059e+37 }
 0x228   : > { %v1918_v54 = vsel %vm4092_vm2, %v2602_v33, %v1914_v23  ;;  %v2021_v46 = vadd.f32 0.001143296, %v2020_v17  ;;  %v1922_v5 = vor.u32 1.1754944e-38, %v1921_v43  ;;  %v1973_v13 = vmul.f32 %v1972_v59, %v4035_v41 }
 0x229   : > { %v2456_v25 = vclamps-f32 %v1884_v53, 1.0  ;;  %v1987_v14 = vadd.f32 0.4994258, %v1986_v48  ;;  %v2011_v2 = vmul.f32 %v2010_v39, %v4080_v32  ;;  %v532_v7 = vadd.f32 %v4049_v3, %v3607_v51 }
 0x22a   : > { %v2604_v1 = vpop.eup %2603  ;;  %v2022_v22 = vmul.f32 %v2021_v46, %v4080_v32  ;;  %v1923_v49 = vsel %vm1920_vm3, %v1922_v5, %v1918_v54  ;;  %v1938_v56 = vadd.f32 1.1283791, %v1937_v0  ;;  %v1961_v28 = vand.u32 2147483648, %v4077_v55  ;;  %v4128_v54 = vld [vmem:[%s4190_s6] ss:$0 sm:$0xff] }
 0x22b   : > { %v1951_v20 = vmul.f32 %v2604_v1, %v4077_v55  ;;  %v2058_v52 = vadd.f32 1.0, %v2456_v25  ;;  %v1988_v18 = vmul.f32 %v1987_v14, %v4035_v41  ;;  %v2073_v21 = vmul.f32 %v2057_v61, %v3870_v57 }
 0x22c   : > { %v2023_v33 = vadd.f32 0.014752088, %v2022_v22  ;;  %v1974_v6 = vadd.f32 0.05243302, %v1973_v13  ;;  %v534_v37 = vadd.f32 %v533_v36, %v3607_v51  ;;  %v1924_v38 = vmul.f32 %v1923_v49, %v1899_v45  ;;  %v538_v13 = vpop.f32.mrf.mxu1 }
 0x22d   : > { %v1952_v40 = vsub.f32 1.0, %v1951_v20  ;;  %v2074_v9 = vmul.f32 %v2058_v52, %v1386_v42  ;;  %v4110_v12 = vadd.f32 1.0, %v1988_v18  ;;  %v2012_v3 = vadd.f32 0.0036580483, %v2011_v2 }
 0x22e   : > { %v2024_v63 = vmul.f32 %v2023_v33, %v4080_v32  ;;  %vm1956_vm4 = vweird.f32 %v2604_v1  ;;  %v1959_v15 = vand.u32 2147483647, %v4077_v55  ;;  %v2089_v57 = vadd.f32 %v2073_v21, %v532_v7 }
 0x22f   : > { %v1953_v4 = vmul.f32 %v2604_v1, %v1952_v40  ;;  %v2090_v16 = vadd.f32 %v2074_v9, %v534_v37  ;;  %2605 = vrcp.f32 %v4110_v12  ;;  %vm1955_vm5 = vweird.f32 %v4077_v55 }
 0x230   : > { %v1975_v27 = vmul.f32 %v1974_v6, %v4035_v41  ;;  %v2025_v26 = vadd.f32 0.112945676, %v2024_v63  ;;  %vm1957_vm6 = vmor %vm1955_vm5, %vm1956_vm4  ;;  %v1962_v11 = vor.u32 1.1754944e-38, %v1961_v28  ;;  %v2013_v50 = vmul.f32 %v2012_v3, %v4080_v32 }
 0x231   : > { %v1954_v34 = vadd.f32 %v2604_v1, %v1953_v4  ;;  %v2457_v60 = vclamps-f32 %v1924_v38, 1.0  ;;  %v2100_v53 = vpack.c.bf16 %v2090_v16, %v2089_v57  ;;  %v1939_v58 = vmul.f32 %v1938_v56, %v3950_v62 }
 0x232   : > { %vm1960_vm7 = vcmp.eq.f32.partialorder %v1959_v15, 8.507059e+37  ;;  %v2026_v59 = vmul.f32 %v2025_v26, %v4080_v32  ;;  %v1976_v55 = vadd.f32 0.18741608, %v1975_v27  ;;  %v2014_v17 = vadd.f32 0.05243302, %v2013_v50 }
 0x233   : > { %v1958_v43 = vsel %vm1957_vm6, %v2604_v1, %v1954_v34  ;;  %v2059_v42 = vadd.f32 1.0, %v2457_v60  ;;  %v1387_v0 = vmul.f32 0.5, %v3867_v24  ;;  %v1388_v62 = vmul.f32 0.5, %v3919_v31  ;;  %v2180_v24 = vpop.f32.mrf.mxu3 }
 0x234   : > { %v1963_v36 = vsel %vm1960_vm7, %v1962_v11, %v1958_v43  ;;  %2204 = vmatmul.bf16.gmra.mxu3 %v2100_v53  ;;  %v2027_v19 = vadd.f32 0.4994258, %v2026_v59  ;;  %v1977_v48 = vmul.f32 %v1976_v55, %v4035_v41  ;;  %v537_v5 = vadd.f32 %v536_v8, %v3607_v51  ;;  %v541_v8 = vpop.f32.mrf.mxu1 }
 0x235   : > { %v1964_v23 = vmul.f32 %v1963_v36, %v1939_v58  ;;  %v2606_v35 = vpop.eup %2605  ;;  %v2015_v31 = vmul.f32 %v2014_v17, %v4080_v32  ;;  %v2075_v25 = vmul.f32 %v2059_v42, %v1387_v0  ;;  %v2181_v14 = vadd.f32 %v4128_v54, %v2180_v24 }
 0x236   : > { %v1991_v45 = vmul.f32 %v2606_v35, %v4110_v12  ;;  %v2028_v10 = vmul.f32 %v2027_v19, %v4080_v32  ;;  %vm1996_vm8 = vweird.f32 %v2606_v35  ;;  %v2001_v41 = vand.u32 2147483648, %v4110_v12 }
 0x237   : > { %v2458_v61 = vclamps-f32 %v1964_v23, 1.0  ;;  %v1999_v22 = vand.u32 2147483647, %v4110_v12  ;;  %v539_v7 = vadd.f32 %v538_v13, %v3607_v51  ;;  %2220 = vst [vmem:[%s4135_s11] sm:$0xff] %v2181_v14  ;;  %vm1995_vm9 = vweird.f32 %v4110_v12 }
 0x238   : > { %v1992_v39 = vsub.f32 1.0, %v1991_v45  ;;  %v2029_v46 = vadd.f32 1.0, %v2028_v10  ;;  %v1978_v20 = vadd.f32 1.1283791, %v1977_v48  ;;  %vm1997_vm10 = vmor %vm1995_vm9, %vm1996_vm8  ;;  %v2016_v52 = vadd.f32 0.18741608, %v2015_v31 }
 0x239   : > { %v2060_v1 = vadd.f32 1.0, %v2458_v61  ;;  %v2091_v28 = vadd.f32 %v2075_v25, %v537_v5  ;;  %v2002_v21 = vor.u32 1.1754944e-38, %v2001_v41  ;;  %vm2000_vm11 = vcmp.eq.f32.partialorder %v1999_v22, 8.507059e+37 }
 0x23a   : > { %v1993_v2 = vmul.f32 %v2606_v35, %v1992_v39  ;;  %2607 = vrcp.f32 %v2029_v46  ;;  %v1979_v38 = vmul.f32 %v1978_v20, %v4004_v47  ;;  %v2017_v3 = vmul.f32 %v2016_v52, %v4080_v32 }
 0x23b   : > { %v2076_v49 = vmul.f32 %v2060_v1, %v1388_v62  ;;  %v2182_v9 = vpop.f32.mrf.mxu3  ;;  %v2041_v16 = vand.u32 2147483648, %v2029_v46  ;;  %v2039_v27 = vand.u32 2147483647, %v2029_v46  ;;  %vm2035_vm13 = vweird.f32 %v2029_v46 }
 0x23c   : > { %v1994_v56 = vadd.f32 %v2606_v35, %v1993_v2  ;;  %v2183_v12 = vadd.f32 %v4128_v54, %v2182_v9  ;;  %v2018_v57 = vadd.f32 1.1283791, %v2017_v3  ;;  %v1389_v36 = vmul.f32 0.5, %v3988_v30  ;;  %v543_v55 = vpop.f32.mrf.mxu1 }
 0x23d   : > { %v2092_v18 = vadd.f32 %v2076_v49, %v539_v7  ;;  %v2042_v47 = vor.u32 1.1754944e-38, %v2041_v16  ;;  %vm2040_vm15 = vcmp.eq.f32.partialorder %v2039_v27, 8.507059e+37  ;;  %v1390_v19 = vmul.f32 0.5, %v4047_v29 }
 0x23e   : > { %v1998_v33 = vsel %vm1997_vm10, %v2606_v35, %v1994_v56  ;;  %2221 = vst [vmem:[%s4135_s11 + $0x8] sm:$0xff] %v2183_v12  ;;  %v2019_v32 = vmul.f32 %v2018_v57, %v4070_v44  ;;  %v542_v35 = vadd.f32 %v541_v8, %v3607_v51  ;;  %v544_v42 = vadd.f32 %v543_v55, %v3607_v51 }
 0x23f   : > { %v2101_v40 = vpack.c.bf16 %v2092_v18, %v2091_v28  ;;  %v2003_v37 = vsel %vm2000_vm11, %v2002_v21, %v1998_v33 }
 0x240   : > { %v2608_v6 = vpop.eup %2607  ;;  %v2004_v4 = vmul.f32 %v2003_v37, %v1979_v38 }
 0x241   : > { %v2031_v63 = vmul.f32 %v2608_v6, %v2029_v46  ;;  %vm2036_vm12 = vweird.f32 %v2608_v6 }
 0x242   : > { %v2459_v11 = vclamps-f32 %v2004_v4, 1.0  ;;  %vm2037_vm14 = vmor %vm2035_vm13, %vm2036_vm12 }
 0x243   : > { %v2032_v15 = vsub.f32 1.0, %v2031_v63 }
 0x244   : > { %2209 = vmatmul.bf16.gmra.mxu3 %v2101_v40  ;;  %v2061_v58 = vadd.f32 1.0, %v2459_v11 }
 0x245   : > { %v2033_v34 = vmul.f32 %v2608_v6, %v2032_v15 }
 0x246   : > { %v2077_v44 = vmul.f32 %v2061_v58, %v1389_v36 }
 0x247   : > { %v2034_v26 = vadd.f32 %v2608_v6, %v2033_v34 }
 0x248   : > { %v2093_v10 = vadd.f32 %v2077_v44, %v542_v35 }
 0x249   : > { %v2038_v50 = vsel %vm2037_vm14, %v2608_v6, %v2034_v26  ;;  %v2185_v43 = vpop.f32.mrf.mxu3 }
 0x24a   : > { %v2043_v60 = vsel %vm2040_vm15, %v2042_v47, %v2038_v50  ;;  %v2186_v59 = vadd.f32 %v4128_v54, %v2185_v43 }
 0x24b   : > { %v2044_v53 = vmul.f32 %v2043_v60, %v2019_v32 }
 0x24c   : > { %2222 = vst [vmem:[%s4135_s11 + $0x10] sm:$0xff] %v2186_v59 }
 0x24d   : > { %v2460_v23 = vclamps-f32 %v2044_v53, 1.0 }
 0x24f   : > { %v2062_v17 = vadd.f32 1.0, %v2460_v23 }
 0x251   : > { %v2078_v45 = vmul.f32 %v2062_v17, %v1390_v19  ;;  %v2187_v62 = vpop.f32.mrf.mxu3 }
 0x252   : > { %v2188_v30 = vadd.f32 %v4128_v54, %v2187_v62 }
 0x253   : > { %v2094_v0 = vadd.f32 %v2078_v45, %v544_v42 }
 0x254   : > { %2223 = vst [vmem:[%s4135_s11 + $0x18] sm:$0xff] %v2188_v30 }
 0x255   : > { %v2102_v61 = vpack.c.bf16 %v2094_v0, %v2093_v10 }
 0x257   : > { %2214 = vmatmul.bf16.gmra.mxu3 %v2102_v61 }
 0x26a   : > { %v2190_v29 = vpop.f32.mrf.mxu3 }
 0x26b   : > { %v2191_v48 = vadd.f32 %v4128_v54, %v2190_v29 }
 0x26d   : > { %2224 = vst [vmem:[%s4135_s11 + $0x20] sm:$0xff] %v2191_v48 }
 0x272   : > { %v2192_v39 = vpop.f32.mrf.mxu3 }
 0x273   : > { %v2193_v51 = vadd.f32 %v4128_v54, %v2192_v39 }
 0x275   : > { %2225 = vst [vmem:[%s4135_s11 + $0x28] sm:$0xff] %v2193_v51 }
 0x297   : > { %v2195_v46 = vpop.f32.mrf.mxu3 }
 0x298   : > { %v2196_v5 = vadd.f32 %v4128_v54, %v2195_v46 }
 0x29a   : > { %2226 = vst [vmem:[%s4135_s11 + $0x30] sm:$0xff] %v2196_v5 }
 0x29f   : > { %v2197_v13 = vpop.f32.mrf.mxu3 }
 0x2a0   : > { %v2198_v24 = vadd.f32 %v4128_v54, %v2197_v13 }
 0x2a2   : > { %2227 = vst [vmem:[%s4135_s11 + $0x38] sm:$0xff] %v2198_v24 }
 0x2a7   : > { %v2200_v31 = vpop.f32.mrf.mxu3 }
 0x2a8   : > { %v2201_v25 = vadd.f32 %v4128_v54, %v2200_v31 }
 0x2aa   : > { %2228 = vst [vmem:[%s4135_s11 + $0x40] sm:$0xff] %v2201_v25 }
 0x2af   : > { %v2202_v1 = vpop.f32.mrf.mxu3 }
 0x2b0   : > { %v2203_v14 = vadd.f32 %v4128_v54, %v2202_v1 }
 0x2b2   : > { %2229 = vst [vmem:[%s4135_s11 + $0x48] sm:$0xff] %v2203_v14 }
 0x2b7   : > { %v2205_v2 = vpop.f32.mrf.mxu3 }
 0x2b8   : > { %v2206_v41 = vadd.f32 %v4128_v54, %v2205_v2 }
 0x2ba   : > { %2230 = vst [vmem:[%s4135_s11 + $0x50] sm:$0xff] %v2206_v41 }
 0x2bf   : > { %v2207_v22 = vpop.f32.mrf.mxu3 }
 0x2c0   : > { %v2208_v7 = vadd.f32 %v4128_v54, %v2207_v22 }
 0x2c2   : > { %2231 = vst [vmem:[%s4135_s11 + $0x58] sm:$0xff] %v2208_v7 }
 0x2c7   : > { %v2210_v49 = vpop.f32.mrf.mxu3 }
 0x2c8   : > { %v2211_v56 = vadd.f32 %v4128_v54, %v2210_v49 }
 0x2ca   : > { %2232 = vst [vmem:[%s4135_s11 + $0x60] sm:$0xff] %v2211_v56 }
 0x2cf   : > { %v2212_v20 = vpop.f32.mrf.mxu3 }
 0x2d0   : > { %v2213_v52 = vadd.f32 %v4128_v54, %v2212_v20 }
 0x2d2   : > { %2233 = vst [vmem:[%s4135_s11 + $0x68] sm:$0xff] %v2213_v52 }
 0x2da   : > { %v2215_v28 = vpop.f32.mrf.mxu3 }
 0x2db   : > { %v2216_v18 = vadd.f32 %v4128_v54, %v2215_v28 }
 0x2dd   : > { %2234 = vst [vmem:[%s4135_s11 + $0x70] sm:$0xff] %v2216_v18 }
 0x2e2   : > { %v2217_v33 = vpop.f32.mrf.mxu3 }
 0x2e3   : > { %v2218_v21 = vadd.f32 %v4128_v54, %v2217_v33 }
 0x2e5   : > { %2235 = vst [vmem:[%s4135_s11 + $0x78] sm:$0xff] %v2218_v21 }
 0x2e6 PF: > { %s17_s24 = sadd.s32 1, %s2624_s24  }
 0x2e7   : > { %p14_p4 = scmp.ge.s32.totalorder %s17_s24, 6  }
 0x2e9   :  { %16 = sbr.rel (!%p14_p4) target bundleno = 1 (0x1), region = 78 }

</bundles_post_ra>
